<compile_context>
chip_gen: v5e
topology: v5e:2x2
jax: 0.10.0
libtpu: 0.0.40
codegen_flags: <defaults>
</compile_context>

<pallas_src>
import jax
import jax.numpy as jnp
from jax.experimental import pallas as pl
from jax.experimental.pallas import tpu as pltpu


# (cin, cout, kernel, stride, padding) for conv1/2/3 of the FlowNetC encoder.
_LAYER_SPECS = (
    (3, 64, 7, 2, 3),
    (64, 128, 5, 2, 2),
    (128, 256, 5, 2, 2),
)


def _round_up(x, m):
    return (x + m - 1) // m * m


# ----------------------------------------------------------------------------
# Pallas kernel: one (tm, Kc) patch tile @ resident (Kc, Cout) weights,
# fused bias + LeakyReLU(0.1). bf16 operands, f32 MXU accumulation, bf16 store.
# ----------------------------------------------------------------------------
def _matmul_bias_lrelu_kernel(p_ref, w_ref, b_ref, o_ref):
    y = jnp.dot(p_ref[...], w_ref[...], preferred_element_type=jnp.float32)
    y = y + b_ref[...]                                   # f32 epilogue (v5e VPU has no bf16)
    o_ref[...] = jnp.where(y >= 0.0, y, 0.1 * y).astype(o_ref.dtype)


def _pick_tm(M, Kc):
    """Row tile for the patch matmul.

    * large enough to amortize the ~0.35us/grid-step pipeline overhead,
    * small enough that double-buffered bf16 patch tiles stay <= ~16 MiB
      (inside the 32 MiB scoped VMEM limit, v7x-safe),
    * capped near M/4 so the 'parallel' M axis keeps >= ~4 tiles
      (both v7x TensorCores get work and pipelining overlaps).
    """
    if M <= 256:
        return _round_up(M, 16)
    per_buf_rows = (8 << 20) // (2 * Kc)            # one bf16 patch buffer <= 8 MiB
    quarter_cap = _round_up((M + 3) // 4, 256)
    tm = min(4096, per_buf_rows, quarter_cap)
    tm = max(256, (tm // 256) * 256)                 # MXU-friendly row granularity
    return tm


def _fused_matmul_bias_lrelu(patches, weights, bias, tm):
    """patches: (M_pad, Kc) bf16; weights: (Kc, Cout) bf16; bias: (1, Cout) f32.
    M_pad is a multiple of tm.  Returns (M_pad, Cout) bf16."""
    M, Kc = patches.shape
    _, Co = weights.shape
    grid = (M // tm,)
    return pl.pallas_call(
        _matmul_bias_lrelu_kernel,
        out_shape=jax.ShapeDtypeStruct((M, Co), jnp.bfloat16),
        grid_spec=pltpu.PrefetchScalarGridSpec(
            num_scalar_prefetch=0,
            grid=grid,
            in_specs=[
                pl.BlockSpec((tm, Kc), lambda i: (i, 0)),   # streamed patch tiles
                pl.BlockSpec((Kc, Co), lambda i: (0, 0)),   # resident weights
                pl.BlockSpec((1, Co), lambda i: (0, 0)),    # resident bias
            ],
            out_specs=pl.BlockSpec((tm, Co), lambda i: (i, 0)),
        ),
        compiler_params=pltpu.CompilerParams(
            dimension_semantics=("parallel",),   # megacore sharding on v7x
            vmem_limit_bytes=32 << 20,
        ),
    )(patches, weights, bias)


# ----------------------------------------------------------------------------
# Conv layer = bf16 im2col (XLA glue) + tiled fused Pallas matmul/bias/LeakyReLU
# ----------------------------------------------------------------------------
def conv_layer(x_nhwc, w_mat, b_mat, *, cout, k, stride, padding):
    """x_nhwc: (N, H, W, Cin) f32 or bf16.
    w_mat: (Kc_pad, Cout) bf16 pre-reshaped/padded; b_mat: (1, Cout) f32."""
    N, H, W, Cin = x_nhwc.shape
    Kc = k * k * Cin
    Kc_pad, Co = w_mat.shape
    assert Co == cout
    Ho = (H + 2 * padding - k) // stride + 1
    Wo = (W + 2 * padding - k) // stride + 1
    M = N * Ho * Wo

    # Cast once BEFORE im2col so every expanded byte is bf16 (conv2/3 inputs
    # already arrive as bf16 kernel outputs -> this is a no-op there).
    x_bf16 = x_nhwc.astype(jnp.bfloat16)
    xp = jnp.pad(x_bf16, ((0, 0), (padding, padding), (padding, padding), (0, 0)))

    # im2col with (kh, kw, cin) patch-feature ordering (matches weight layout).
    # TODO(synk): fuse this gather into the Pallas kernel (k*k tap reduction
    # axis) so the expanded patch tensor never hits HBM.
    slices = []
    for ky in range(k):
        for kx in range(k):
            s = xp[:, ky:ky + (Ho - 1) * stride + 1:stride,
                      kx:kx + (Wo - 1) * stride + 1:stride, :]
            slices.append(s)                                  # (N, Ho, Wo, Cin)
    patches = jnp.stack(slices, axis=3).reshape(M, Kc)

    tm = _pick_tm(M, Kc_pad)
    M_pad = _round_up(M, tm)
    patches = jnp.pad(patches, ((0, M_pad - M), (0, Kc_pad - Kc)))

    out = _fused_matmul_bias_lrelu(patches, w_mat, b_mat, tm)  # (M_pad, Cout) bf16
    if M_pad != M:
        out = out[:M]
    return out.reshape(N, Ho, Wo, cout)                        # NHWC bf16


# ----------------------------------------------------------------------------
# Parameter handling
# ----------------------------------------------------------------------------
def init_params(key):
    """Deterministic kaiming-ish init, PyTorch layout: (w OIHW f32, b (Cout,) f32)."""
    params = []
    for i, (cin, cout, k, _, _) in enumerate(_LAYER_SPECS):
        kw_key, kb_key = jax.random.split(jax.random.fold_in(key, i))
        fan_in = cin * k * k
        scale = (2.0 / fan_in) ** 0.5
        w = scale * jax.random.normal(kw_key, (cout, cin, k, k), jnp.float32)
        b = 0.01 * jax.random.normal(kb_key, (cout,), jnp.float32)
        params.append((w, b))
    return params


def prepare_params(raw_params):
    """One-time reshape/pad/cast so no weight massaging happens per forward call.

    (Cout, Cin, Kh, Kw) -> (Kh*Kw*Cin, Cout) in (kh, kw, cin) order.
    K dim zero-padded only to a multiple of 16 (bf16 sublane tile); Cout left
    at its native width (full-array-dim blocks keep stores legal & lane-dense
    enough while minimizing HBM bytes). Weights bf16, bias (1, Cout) f32.
    """
    prepped = []
    for w_oihw, b in raw_params:
        cout, cin, kh, kw = w_oihw.shape
        kc = kh * kw * cin
        kc_pad = _round_up(kc, 16)
        w_mat = jnp.transpose(w_oihw, (2, 3, 1, 0)).reshape(kc, cout)
        w_mat = jnp.pad(w_mat, ((0, kc_pad - kc), (0, 0)))
        b_mat = b.reshape(1, cout).astype(jnp.float32)
        prepped.append((w_mat.astype(jnp.bfloat16), b_mat))
    return prepped


# ----------------------------------------------------------------------------
# FeatureExtractor forward
# ----------------------------------------------------------------------------
@jax.jit
def feature_extractor(x_nchw, params):
    """Input NCHW f32; returns (conv2_out, conv3_out) in NCHW f32 (PyTorch layout)."""
    x = jnp.transpose(x_nchw, (0, 2, 3, 1))                    # -> NHWC
    (w1, b1), (w2, b2), (w3, b3) = params

    x = conv_layer(x, w1, b1, cout=64, k=7, stride=2, padding=3)            # conv1
    conv2_out = conv_layer(x, w2, b2, cout=128, k=5, stride=2, padding=2)   # conv2
    conv3_out = conv_layer(conv2_out, w3, b3, cout=256, k=5, stride=2, padding=2)  # conv3

    # Cast back to f32 on the final transposes to preserve the module interface.
    return (jnp.transpose(conv2_out, (0, 3, 1, 2)).astype(jnp.float32),
            jnp.transpose(conv3_out, (0, 3, 1, 2)).astype(jnp.float32))


if __name__ == "__main__":
    key = jax.random.PRNGKey(0)
    xkey, pkey = jax.random.split(key)

    # Small image: batch=2, 3 channels, 16x16 spatial.
    x = jax.random.normal(xkey, (2, 3, 16, 16), jnp.float32)
    params = prepare_params(init_params(pkey))

    conv2_out, conv3_out = feature_extractor(x, params)
    jax.block_until_ready((conv2_out, conv3_out))

    assert conv2_out.shape == (2, 128, 4, 4), conv2_out.shape
    assert conv3_out.shape == (2, 256, 2, 2), conv3_out.shape
    assert bool(jnp.all(jnp.isfinite(conv2_out))) and bool(jnp.all(jnp.isfinite(conv3_out)))

    print("KERNEL_OK")
</pallas_src>

<mosaic_0001>
module attributes {stable_mosaic.version = 11 : i64} {
  func.func @_matmul_bias_lrelu_kernel(%arg0: i32, %arg1: memref<128x160xbf16, #tpu.memory_space<vmem>>, %arg2: memref<160x64xbf16, #tpu.memory_space<vmem>>, %arg3: memref<1x64xf32, #tpu.memory_space<vmem>>, %arg4: memref<128x64xbf16, #tpu.memory_space<vmem>>) attributes {dimension_semantics = [#tpu.dimension_semantics<parallel>], iteration_bounds = array<i64: 1>, scalar_prefetch = 0 : i64, scratch_operands = 0 : i64, tpu.core_type = #tpu.core_type<tc>, window_params = [{transform_indices = @transform_0, window_bounds = array<i64: 128, 160>}, {pipeline_mode = #tpu.pipeline_mode<synchronous>, transform_indices = @transform_1, window_bounds = array<i64: 160, 64>}, {pipeline_mode = #tpu.pipeline_mode<synchronous>, transform_indices = @transform_2, window_bounds = array<i64: 1, 64>}, {transform_indices = @transform_3, window_bounds = array<i64: 128, 64>}]} {
    %c0 = arith.constant 0 : index
    %c0_0 = arith.constant 0 : index
    %0 = vector.load %arg1[%c0, %c0_0] : memref<128x160xbf16, #tpu.memory_space<vmem>>, vector<128x160xbf16>
    %c0_1 = arith.constant 0 : index
    %c0_2 = arith.constant 0 : index
    %1 = vector.load %arg2[%c0_1, %c0_2] : memref<160x64xbf16, #tpu.memory_space<vmem>>, vector<160x64xbf16>
    %cst = arith.constant dense<0.000000e+00> : vector<128x64xf32>
    %2 = tpu.matmul %0, %1, %cst {dimension_numbers = #tpu.dot_dimension_numbers<[1], [0], [0], [1], [0, 0, 1, 1], [], []>} : vector<128x160xbf16>, vector<160x64xbf16>, vector<128x64xf32> -> vector<128x64xf32>
    %c0_3 = arith.constant 0 : index
    %c0_4 = arith.constant 0 : index
    %3 = vector.load %arg3[%c0_3, %c0_4] : memref<1x64xf32, #tpu.memory_space<vmem>>, vector<1x64xf32>
    %4 = vector.broadcast %3 : vector<1x64xf32> to vector<128x64xf32>
    %5 = arith.addf %2, %4 : vector<128x64xf32>
    %cst_5 = arith.constant 0.000000e+00 : f32
    %6 = vector.broadcast %cst_5 : f32 to vector<128x64xf32>
    %7 = arith.cmpf oge, %5, %6 : vector<128x64xf32>
    %cst_6 = arith.constant 1.000000e-01 : f32
    %8 = vector.broadcast %cst_6 : f32 to vector<128x64xf32>
    %9 = arith.mulf %8, %5 : vector<128x64xf32>
    %10 = arith.select %7, %5, %9 : vector<128x64xi1>, vector<128x64xf32>
    %11 = arith.truncf %10 : vector<128x64xf32> to vector<128x64xbf16>
    %c0_7 = arith.constant 0 : index
    %c0_8 = arith.constant 0 : index
    %12 = vector.load %arg4[%c0_7, %c0_8] : memref<128x64xbf16, #tpu.memory_space<vmem>>, vector<128x64xbf16>
    tpu.vector_store %arg4[%c0_7, %c0_8], %11 {strides = array<i32>} : memref<128x64xbf16, #tpu.memory_space<vmem>>, vector<128x64xbf16>,
    return
  }
  func.func @transform_0(%arg0: i32) -> (i32, i32) {
    %c0_i32 = arith.constant 0 : i32
    %c0_i32_0 = arith.constant 0 : i32
    return %arg0, %c0_i32 : i32, i32
  }
  func.func @transform_1(%arg0: i32) -> (i32, i32) {
    %c0_i32 = arith.constant 0 : i32
    %c0_i32_0 = arith.constant 0 : i32
    %c0_i32_1 = arith.constant 0 : i32
    return %c0_i32, %c0_i32_0 : i32, i32
  }
  func.func @transform_2(%arg0: i32) -> (i32, i32) {
    %c0_i32 = arith.constant 0 : i32
    %c0_i32_0 = arith.constant 0 : i32
    %c0_i32_1 = arith.constant 0 : i32
    return %c0_i32, %c0_i32_0 : i32, i32
  }
  func.func @transform_3(%arg0: i32) -> (i32, i32) {
    %c0_i32 = arith.constant 0 : i32
    %c0_i32_0 = arith.constant 0 : i32
    return %arg0, %c0_i32 : i32, i32
  }
}

module attributes {stable_mosaic.version = 11 : i64} {
  func.func @_matmul_bias_lrelu_kernel(%arg0: i32, %arg1: memref<32x1600xbf16, #tpu.memory_space<vmem>>, %arg2: memref<1600x128xbf16, #tpu.memory_space<vmem>>, %arg3: memref<1x128xf32, #tpu.memory_space<vmem>>, %arg4: memref<32x128xbf16, #tpu.memory_space<vmem>>) attributes {dimension_semantics = [#tpu.dimension_semantics<parallel>], iteration_bounds = array<i64: 1>, scalar_prefetch = 0 : i64, scratch_operands = 0 : i64, tpu.core_type = #tpu.core_type<tc>, window_params = [{transform_indices = @transform_0, window_bounds = array<i64: 32, 1600>}, {pipeline_mode = #tpu.pipeline_mode<synchronous>, transform_indices = @transform_1, window_bounds = array<i64: 1600, 128>}, {pipeline_mode = #tpu.pipeline_mode<synchronous>, transform_indices = @transform_2, window_bounds = array<i64: 1, 128>}, {transform_indices = @transform_3, window_bounds = array<i64: 32, 128>}]} {
    %c0 = arith.constant 0 : index
    %c0_0 = arith.constant 0 : index
    %0 = vector.load %arg1[%c0, %c0_0] : memref<32x1600xbf16, #tpu.memory_space<vmem>>, vector<32x1600xbf16>
    %c0_1 = arith.constant 0 : index
    %c0_2 = arith.constant 0 : index
    %1 = vector.load %arg2[%c0_1, %c0_2] : memref<1600x128xbf16, #tpu.memory_space<vmem>>, vector<1600x128xbf16>
    %cst = arith.constant dense<0.000000e+00> : vector<32x128xf32>
    %2 = tpu.matmul %0, %1, %cst {dimension_numbers = #tpu.dot_dimension_numbers<[1], [0], [0], [1], [0, 0, 1, 1], [], []>} : vector<32x1600xbf16>, vector<1600x128xbf16>, vector<32x128xf32> -> vector<32x128xf32>
    %c0_3 = arith.constant 0 : index
    %c0_4 = arith.constant 0 : index
    %3 = vector.load %arg3[%c0_3, %c0_4] : memref<1x128xf32, #tpu.memory_space<vmem>>, vector<1x128xf32>
    %4 = vector.broadcast %3 : vector<1x128xf32> to vector<32x128xf32>
    %5 = arith.addf %2, %4 : vector<32x128xf32>
    %cst_5 = arith.constant 0.000000e+00 : f32
    %6 = vector.broadcast %cst_5 : f32 to vector<32x128xf32>
    %7 = arith.cmpf oge, %5, %6 : vector<32x128xf32>
    %cst_6 = arith.constant 1.000000e-01 : f32
    %8 = vector.broadcast %cst_6 : f32 to vector<32x128xf32>
    %9 = arith.mulf %8, %5 : vector<32x128xf32>
    %10 = arith.select %7, %5, %9 : vector<32x128xi1>, vector<32x128xf32>
    %11 = arith.truncf %10 : vector<32x128xf32> to vector<32x128xbf16>
    %c0_7 = arith.constant 0 : index
    %c0_8 = arith.constant 0 : index
    %12 = vector.load %arg4[%c0_7, %c0_8] : memref<32x128xbf16, #tpu.memory_space<vmem>>, vector<32x128xbf16>
    tpu.vector_store %arg4[%c0_7, %c0_8], %11 {strides = array<i32>} : memref<32x128xbf16, #tpu.memory_space<vmem>>, vector<32x128xbf16>,
    return
  }
  func.func @transform_0(%arg0: i32) -> (i32, i32) {
    %c0_i32 = arith.constant 0 : i32
    %c0_i32_0 = arith.constant 0 : i32
    return %arg0, %c0_i32 : i32, i32
  }
  func.func @transform_1(%arg0: i32) -> (i32, i32) {
    %c0_i32 = arith.constant 0 : i32
    %c0_i32_0 = arith.constant 0 : i32
    %c0_i32_1 = arith.constant 0 : i32
    return %c0_i32, %c0_i32_0 : i32, i32
  }
  func.func @transform_2(%arg0: i32) -> (i32, i32) {
    %c0_i32 = arith.constant 0 : i32
    %c0_i32_0 = arith.constant 0 : i32
    %c0_i32_1 = arith.constant 0 : i32
    return %c0_i32, %c0_i32_0 : i32, i32
  }
  func.func @transform_3(%arg0: i32) -> (i32, i32) {
    %c0_i32 = arith.constant 0 : i32
    %c0_i32_0 = arith.constant 0 : i32
    return %arg0, %c0_i32 : i32, i32
  }
}

module attributes {stable_mosaic.version = 11 : i64} {
  func.func @_matmul_bias_lrelu_kernel(%arg0: i32, %arg1: memref<16x3200xbf16, #tpu.memory_space<vmem>>, %arg2: memref<3200x256xbf16, #tpu.memory_space<vmem>>, %arg3: memref<1x256xf32, #tpu.memory_space<vmem>>, %arg4: memref<16x256xbf16, #tpu.memory_space<vmem>>) attributes {dimension_semantics = [#tpu.dimension_semantics<parallel>], iteration_bounds = array<i64: 1>, scalar_prefetch = 0 : i64, scratch_operands = 0 : i64, tpu.core_type = #tpu.core_type<tc>, window_params = [{transform_indices = @transform_0, window_bounds = array<i64: 16, 3200>}, {pipeline_mode = #tpu.pipeline_mode<synchronous>, transform_indices = @transform_1, window_bounds = array<i64: 3200, 256>}, {pipeline_mode = #tpu.pipeline_mode<synchronous>, transform_indices = @transform_2, window_bounds = array<i64: 1, 256>}, {transform_indices = @transform_3, window_bounds = array<i64: 16, 256>}]} {
    %c0 = arith.constant 0 : index
    %c0_0 = arith.constant 0 : index
    %0 = vector.load %arg1[%c0, %c0_0] : memref<16x3200xbf16, #tpu.memory_space<vmem>>, vector<16x3200xbf16>
    %c0_1 = arith.constant 0 : index
    %c0_2 = arith.constant 0 : index
    %1 = vector.load %arg2[%c0_1, %c0_2] : memref<3200x256xbf16, #tpu.memory_space<vmem>>, vector<3200x256xbf16>
    %cst = arith.constant dense<0.000000e+00> : vector<16x256xf32>
    %2 = tpu.matmul %0, %1, %cst {dimension_numbers = #tpu.dot_dimension_numbers<[1], [0], [0], [1], [0, 0, 1, 1], [], []>} : vector<16x3200xbf16>, vector<3200x256xbf16>, vector<16x256xf32> -> vector<16x256xf32>
    %c0_3 = arith.constant 0 : index
    %c0_4 = arith.constant 0 : index
    %3 = vector.load %arg3[%c0_3, %c0_4] : memref<1x256xf32, #tpu.memory_space<vmem>>, vector<1x256xf32>
    %4 = vector.broadcast %3 : vector<1x256xf32> to vector<16x256xf32>
    %5 = arith.addf %2, %4 : vector<16x256xf32>
    %cst_5 = arith.constant 0.000000e+00 : f32
    %6 = vector.broadcast %cst_5 : f32 to vector<16x256xf32>
    %7 = arith.cmpf oge, %5, %6 : vector<16x256xf32>
    %cst_6 = arith.constant 1.000000e-01 : f32
    %8 = vector.broadcast %cst_6 : f32 to vector<16x256xf32>
    %9 = arith.mulf %8, %5 : vector<16x256xf32>
    %10 = arith.select %7, %5, %9 : vector<16x256xi1>, vector<16x256xf32>
    %11 = arith.truncf %10 : vector<16x256xf32> to vector<16x256xbf16>
    %c0_7 = arith.constant 0 : index
    %c0_8 = arith.constant 0 : index
    %12 = vector.load %arg4[%c0_7, %c0_8] : memref<16x256xbf16, #tpu.memory_space<vmem>>, vector<16x256xbf16>
    tpu.vector_store %arg4[%c0_7, %c0_8], %11 {strides = array<i32>} : memref<16x256xbf16, #tpu.memory_space<vmem>>, vector<16x256xbf16>,
    return
  }
  func.func @transform_0(%arg0: i32) -> (i32, i32) {
    %c0_i32 = arith.constant 0 : i32
    %c0_i32_0 = arith.constant 0 : i32
    return %arg0, %c0_i32 : i32, i32
  }
  func.func @transform_1(%arg0: i32) -> (i32, i32) {
    %c0_i32 = arith.constant 0 : i32
    %c0_i32_0 = arith.constant 0 : i32
    %c0_i32_1 = arith.constant 0 : i32
    return %c0_i32, %c0_i32_0 : i32, i32
  }
  func.func @transform_2(%arg0: i32) -> (i32, i32) {
    %c0_i32 = arith.constant 0 : i32
    %c0_i32_0 = arith.constant 0 : i32
    %c0_i32_1 = arith.constant 0 : i32
    return %c0_i32, %c0_i32_0 : i32, i32
  }
  func.func @transform_3(%arg0: i32) -> (i32, i32) {
    %c0_i32 = arith.constant 0 : i32
    %c0_i32_0 = arith.constant 0 : i32
    return %arg0, %c0_i32 : i32, i32
  }
}

</mosaic_0001>

<bundles_post_ra>
// kernel: feature_extractor.3
= control target key start
LH: loop header
LB: loop body
LE: loop exit
PB: predicated region body
PF: predicated region fallthrough
CT: control target
= control target key end

     0   :  { %vm187_vm0 = vcmask 261120   ;;  %vm374_vm2 = vcmask 519168   ;;  %s792_s1 = inlined_call_operand.vmem [shape: bf16[160,64], index: 1, kind: input, shape index: {}]   ;;  %s793_s0 = inlined_call_operand.vmem [shape: bf16[128,160], index: 0, kind: input, shape index: {}]   ;;  %s794_s2 = inlined_call_operand.vmem [shape: f32[1,64], index: 2, kind: input, shape index: {}]   ;;  %s795_s3 = inlined_call_operand.vmem [shape: bf16[128,64], index: 3, kind: output, shape index: {}]  }
   0x1   :  { %v530_v0 = vld [vmem:[%s792_s1 + $0x38] sm:$0xff]  ;;  %v532_v1 = vld [vmem:[%s792_s1 + $0x48] sm:$0xff]  ;;  %v529_v2 = vld [vmem:[%s792_s1 + $0x30] sm:$0xff] }
   0x2   :  { %212 = vmatpush.bf16.msra.mxu0 %v530_v0  ;;  %533 = vmatpush.bf16.msra.mxu2 %v530_v0  ;;  %v531_v3 = vld [vmem:[%s792_s1 + $0x40] sm:$0xff]  ;;  %v399_v5 = vld [vmem:[%s793_s0 + $0x8] sm:$0xf0]  ;;  %v517_v8 = vld [vmem:[%s793_s0 + $0x54] sm:$0xf] }
   0x3   :  { %267 = vmatpush.bf16.msra.mxu1 %v532_v1  ;;  %v507_v4 = vld [vmem:[%s793_s0 + $0x4] sm:$0xf]  ;;  %541 = vmatpush.bf16.msra.mxu3 %v532_v1  ;;  %v528_v7 = vld [vmem:[%s792_s1 + $0x28] sm:$0xff]  ;;  %v439_v9 = vld [vmem:[%s793_s0 + $0x58] sm:$0xf0] }
   0x4   :  { %v402_v6 = vor.u32 %v507_v4, %v399_v5  ;;  %v527_v10 = vld [vmem:[%s792_s1 + $0x20] sm:$0xff]  ;;  %v442_v11 = vor.u32 %v517_v8, %v439_v9  ;;  %v526_v12 = vld [vmem:[%s792_s1 + $0x18] sm:$0xff]  ;;  %v525_v13 = vld [vmem:[%s792_s1 + $0x10] sm:$0xff] }
   0x5   :  { %v509_v14 = vld [vmem:[%s793_s0 + $0x14] sm:$0xf]  ;;  %v407_v15 = vld [vmem:[%s793_s0 + $0x18] sm:$0xf0]  ;;  %v524_v17 = vld [vmem:[%s792_s1 + $0x8] sm:$0xff] }
   0x6   :  { %213 = vmatpush.bf16.msra.mxu0 %v529_v2  ;;  %534 = vmatpush.bf16.msra.mxu2 %v529_v2  ;;  %v410_v16 = vor.u32 %v509_v14, %v407_v15  ;;  %v519_v18 = vld [vmem:[%s793_s0 + $0x64] sm:$0xf]  ;;  %v447_v19 = vld [vmem:[%s793_s0 + $0x68] sm:$0xf0]  ;;  %v397_v21 = vld [vmem:[%s793_s0] sm:$0xf] }
   0x7   :  { %268 = vmatpush.bf16.msra.mxu1 %v531_v3  ;;  %542 = vmatpush.bf16.msra.mxu3 %v531_v3  ;;  %v523_v20 = vld [vmem:[%s792_s1] sm:$0xff]  ;;  %v508_v22 = vld [vmem:[%s793_s0 + $0x4] sm:$0xf0]  ;;  %v450_v23 = vor.u32 %v519_v18, %v447_v19  ;;  %v415_v29 = vld [vmem:[%s793_s0 + $0x28] sm:$0xf0] }
   0x8   :  { %v429_v24 = vld [vmem:[%s793_s0 + $0x40] sm:$0xf]  ;;  %v516_v25 = vld [vmem:[%s793_s0 + $0x44] sm:$0xf0]  ;;  %v398_v26 = vor.u32 %v508_v22, %v397_v21  ;;  %v511_v28 = vld [vmem:[%s793_s0 + $0x24] sm:$0xf] }
   0x9   :  { %v430_v27 = vor.u32 %v516_v25, %v429_v24  ;;  %v418_v30 = vor.u32 %v511_v28, %v415_v29  ;;  %v521_v31 = vld [vmem:[%s793_s0 + $0x74] sm:$0xf]  ;;  %v455_v32 = vld [vmem:[%s793_s0 + $0x78] sm:$0xf0]  ;;  %v405_v33 = vld [vmem:[%s793_s0 + $0x10] sm:$0xf] }
   0xa   :  { %499 = vmatmul.msk.bf16.vlgmr.msra.gmra.mxu1 %vm187_vm0, %v402_v6  ;;  %214 = vmatpush.bf16.msra.mxu0 %v528_v7  ;;  %v510_v34 = vld [vmem:[%s793_s0 + $0x14] sm:$0xf0]  ;;  %v458_v35 = vor.u32 %v521_v31, %v455_v32  ;;  %v437_v36 = vld [vmem:[%s793_s0 + $0x50] sm:$0xf]  ;;  %v513_v40 = vld [vmem:[%s793_s0 + $0x34] sm:$0xf] }
   0xb   :  { %535 = vmatpush.bf16.msra.mxu2 %v528_v7  ;;  %504 = vmatmul.msk.bf16.vlgmr.msra.gmra.mxu3 %vm187_vm0, %v442_v11  ;;  %v518_v37 = vld [vmem:[%s793_s0 + $0x54] sm:$0xf0]  ;;  %v406_v38 = vor.u32 %v510_v34, %v405_v33  ;;  %v423_v41 = vld [vmem:[%s793_s0 + $0x38] sm:$0xf0]  ;;  %v413_v43 = vld [vmem:[%s793_s0 + $0x20] sm:$0xf] }
   0xc   :  { %v438_v39 = vor.u32 %v518_v37, %v437_v36  ;;  %v426_v42 = vor.u32 %v513_v40, %v423_v41  ;;  %v512_v44 = vld [vmem:[%s793_s0 + $0x24] sm:$0xf0]  ;;  %v445_v45 = vld [vmem:[%s793_s0 + $0x60] sm:$0xf]  ;;  %v515_v49 = vld [vmem:[%s793_s0 + $0x44] sm:$0xf] }
   0xd   :  { %v520_v46 = vld [vmem:[%s793_s0 + $0x64] sm:$0xf0]  ;;  %v414_v47 = vor.u32 %v512_v44, %v413_v43  ;;  %v431_v50 = vld [vmem:[%s793_s0 + $0x48] sm:$0xf0]  ;;  %v421_v52 = vld [vmem:[%s793_s0 + $0x30] sm:$0xf] }
   0xe   :  { %215 = vmatpush.bf16.msra.mxu0 %v527_v10  ;;  %v446_v48 = vor.u32 %v520_v46, %v445_v45  ;;  %v434_v51 = vor.u32 %v515_v49, %v431_v50  ;;  %v514_v53 = vld [vmem:[%s793_s0 + $0x34] sm:$0xf0]  ;;  %v453_v54 = vld [vmem:[%s793_s0 + $0x70] sm:$0xf]  ;;  %v701_v61 = vld [vmem:[%s794_s2] ss:$0 sm:$0xff] }
   0xf   :  { %536 = vmatpush.bf16.msra.mxu2 %v527_v10  ;;  %v522_v55 = vld [vmem:[%s793_s0 + $0x74] sm:$0xf0]  ;;  %v422_v56 = vor.u32 %v514_v53, %v421_v52 }
  0x10   :  { %v454_v57 = vor.u32 %v522_v55, %v453_v54 }
  0x12   :  { %216 = vmatpush.bf16.msra.mxu0 %v526_v12 }
  0x13   :  { %537 = vmatpush.bf16.msra.mxu2 %v526_v12 }
  0x16   :  { %217 = vmatpush.bf16.msra.mxu0 %v525_v13 }
  0x17   :  { %538 = vmatpush.bf16.msra.mxu2 %v525_v13 }
  0x1a   :  { %500 = vmatmul.msk.bf16.gmra.mxu1 %vm187_vm0, %v410_v16  ;;  %218 = vmatpush.bf16.msra.mxu0 %v524_v17 }
  0x1b   :  { %539 = vmatpush.bf16.msra.mxu2 %v524_v17  ;;  %505 = vmatmul.msk.bf16.gmra.mxu3 %vm187_vm0, %v450_v23 }
  0x1e   :  { %219 = vmatpush.bf16.msra.mxu0 %v523_v20 }
  0x1f   :  { %540 = vmatpush.bf16.msra.mxu2 %v523_v20 }
  0x21   :  { %220 = vmatmul.bf16.vlgmr.msra.gmra.mxu0 %v398_v26 }
  0x22   :  { %240 = vmatmul.bf16.vlgmr.msra.gmra.mxu2 %v430_v27 }
  0x2a   :  { %501 = vmatmul.msk.bf16.gmra.mxu1 %vm187_vm0, %v418_v30 }
  0x2b   :  { %506 = vmatmul.msk.bf16.gmra.mxu3 %vm187_vm0, %v458_v35 }
  0x31   :  { %225 = vmatmul.bf16.gmra.mxu0 %v406_v38 }
  0x32   :  { %245 = vmatmul.bf16.gmra.mxu2 %v438_v39 }
  0x3a   :  { %502 = vmatmul.msk.bf16.gmra.mxu1 %vm187_vm0, %v426_v42 }
  0x41   :  { %230 = vmatmul.bf16.gmra.mxu0 %v414_v47 }
  0x42   :  { %250 = vmatmul.bf16.gmra.mxu2 %v446_v48 }
  0x4a   :  { %503 = vmatmul.msk.bf16.gmra.mxu1 %vm187_vm0, %v434_v51 }
  0x51   :  { %235 = vmatmul.bf16.gmra.mxu0 %v422_v56 }
  0x52   :  { %255 = vmatmul.bf16.gmra.mxu2 %v454_v57 }
  0x87   :  { %v270_v58 = vpop.f32.mrf.mxu1 }
  0x8e   :  { %v295_v13 = vpop.f32.mrf.mxu3 }
  0x8f   :  { %v272_v59 = vpop.f32.mrf.mxu1 }
  0x96   :  { %v297_v27 = vpop.f32.mrf.mxu3 }
  0x97   :  { %v275_v60 = vpop.f32.mrf.mxu1 }
  0x9e   :  { %v221_v62 = vpop.f32.mrf.mxu0  ;;  %v300_v43 = vpop.f32.mrf.mxu3 }
  0x9f   :  { %v222_v63 = vadd.f32 %v701_v61, %v221_v62  ;;  %v277_v0 = vpop.f32.mrf.mxu1 }
  0xa1   :  { %v271_v1 = vadd.f32 %v270_v58, %v222_v63 }
  0xa3   :  { %vm310_vm1 = vcmp.ge.f32.partialorder %v271_v1, 0.0  ;;  %v326_v2 = vmul.f32 0.1, %v271_v1 }
  0xa5   :  { %v342_v3 = vsel %vm310_vm1, %v271_v1, %v326_v2  ;;  %v241_v4 = vpop.f32.mrf.mxu2 }
  0xa6   :  { %v358_v5 = vpack.c.bf16 %v342_v3, %v342_v3  ;;  %v223_v6 = vpop.f32.mrf.mxu0  ;;  %v242_v50 = vadd.f32 %v701_v61, %v241_v4  ;;  %v302_v63 = vpop.f32.mrf.mxu3 }
  0xa7   :  { %v224_v7 = vadd.f32 %v701_v61, %v223_v6  ;;  %v280_v8 = vpop.f32.mrf.mxu1 }
  0xa8   :  { %375 = vst.msk [vmem:[%s795_s3] sm:$0xf] %vm374_vm2, %v358_v5 }
  0xa9   :  { %v273_v9 = vadd.f32 %v272_v59, %v224_v7 }
  0xab   :  { %vm311_vm3 = vcmp.ge.f32.partialorder %v273_v9, 0.0  ;;  %v327_v10 = vmul.f32 0.1, %v273_v9 }
  0xad   :  { %v343_v11 = vsel %vm311_vm3, %v273_v9, %v327_v10  ;;  %v709_v12 = vpop.f32.mrf.mxu2 }
  0xae   :  { %v359_v14 = vpack.c.bf16 %v343_v11, %v343_v11  ;;  %v226_v15 = vpop.f32.mrf.mxu0  ;;  %v244_v6 = vadd.f32 %v701_v61, %v709_v12 }
  0xaf   :  { %v227_v16 = vadd.f32 %v701_v61, %v226_v15  ;;  %v282_v17 = vpop.f32.mrf.mxu1 }
  0xb0   :  { %376 = vst.msk [vmem:[%s795_s3 + $0x4] sm:$0xf] %vm374_vm2, %v359_v14 }
  0xb1   :  { %v276_v18 = vadd.f32 %v275_v60, %v227_v16 }
  0xb3   :  { %vm312_vm4 = vcmp.ge.f32.partialorder %v276_v18, 0.0  ;;  %v328_v19 = vmul.f32 0.1, %v276_v18 }
  0xb5   :  { %v344_v20 = vsel %vm312_vm4, %v276_v18, %v328_v19  ;;  %v246_v21 = vpop.f32.mrf.mxu2 }
  0xb6   :  { %v360_v22 = vpack.c.bf16 %v344_v20, %v344_v20  ;;  %v247_v23 = vadd.f32 %v701_v61, %v246_v21  ;;  %v228_v24 = vpop.f32.mrf.mxu0 }
  0xb7   :  { %v229_v25 = vadd.f32 %v701_v61, %v228_v24  ;;  %v718_v26 = vpop.f32.mrf.mxu1 }
  0xb8   :  { %377 = vst.msk [vmem:[%s795_s3 + $0x8] sm:$0xf] %vm374_vm2, %v360_v22  ;;  %v296_v28 = vadd.f32 %v295_v13, %v247_v23  ;;  %v305_v23 = vpop.f32.mrf.mxu3 }
  0xb9   :  { %v278_v29 = vadd.f32 %v277_v0, %v229_v25 }
  0xba   :  { %vm320_vm5 = vcmp.ge.f32.partialorder %v296_v28, 0.0  ;;  %v336_v30 = vmul.f32 0.1, %v296_v28 }
  0xbb   :  { %vm313_vm6 = vcmp.ge.f32.partialorder %v278_v29, 0.0  ;;  %v329_v31 = vmul.f32 0.1, %v278_v29 }
  0xbc   :  { %v352_v32 = vsel %vm320_vm5, %v296_v28, %v336_v30 }
  0xbd   :  { %v368_v33 = vpack.c.bf16 %v352_v32, %v352_v32  ;;  %v345_v34 = vsel %vm313_vm6, %v278_v29, %v329_v31  ;;  %v248_v35 = vpop.f32.mrf.mxu2 }
  0xbe   :  { %v361_v36 = vpack.c.bf16 %v345_v34, %v345_v34  ;;  %v249_v37 = vadd.f32 %v701_v61, %v248_v35  ;;  %v231_v38 = vpop.f32.mrf.mxu0 }
  0xbf   :  { %385 = vst.msk [vmem:[%s795_s3 + $0x28] sm:$0xf] %vm374_vm2, %v368_v33  ;;  %v232_v39 = vadd.f32 %v701_v61, %v231_v38  ;;  %v730_v40 = vpop.f32.mrf.mxu1 }
  0xc0   :  { %378 = vst.msk [vmem:[%s795_s3 + $0xc] sm:$0xf] %vm374_vm2, %v361_v36  ;;  %v298_v41 = vadd.f32 %v297_v27, %v249_v37 }
  0xc1   :  { %v281_v42 = vadd.f32 %v280_v8, %v232_v39  ;;  %v307_v39 = vpop.f32.mrf.mxu3 }
  0xc2   :  { %vm321_vm7 = vcmp.ge.f32.partialorder %v298_v41, 0.0  ;;  %v337_v44 = vmul.f32 0.1, %v298_v41 }
  0xc3   :  { %vm314_vm8 = vcmp.ge.f32.partialorder %v281_v42, 0.0  ;;  %v330_v45 = vmul.f32 0.1, %v281_v42 }
  0xc4   :  { %v353_v46 = vsel %vm321_vm7, %v298_v41, %v337_v44 }
  0xc5   :  { %v369_v47 = vpack.c.bf16 %v353_v46, %v353_v46  ;;  %v346_v48 = vsel %vm314_vm8, %v281_v42, %v330_v45  ;;  %v251_v49 = vpop.f32.mrf.mxu2 }
  0xc6   :  { %v362_v51 = vpack.c.bf16 %v346_v48, %v346_v48  ;;  %v252_v52 = vadd.f32 %v701_v61, %v251_v49  ;;  %v233_v53 = vpop.f32.mrf.mxu0 }
  0xc7   :  { %386 = vst.msk [vmem:[%s795_s3 + $0x2c] sm:$0xf] %vm374_vm2, %v369_v47  ;;  %v234_v54 = vadd.f32 %v701_v61, %v233_v53  ;;  %v290_v55 = vpop.f32.mrf.mxu1 }
  0xc8   :  { %379 = vst.msk [vmem:[%s795_s3 + $0x10] sm:$0xf] %vm374_vm2, %v362_v51  ;;  %v301_v56 = vadd.f32 %v300_v43, %v252_v52  ;;  %v291_v57 = vadd.f32 %v290_v55, %v242_v50 }
  0xc9   :  { %v283_v58 = vadd.f32 %v282_v17, %v234_v54 }
  0xca   :  { %vm322_vm9 = vcmp.ge.f32.partialorder %v301_v56, 0.0  ;;  %v338_v59 = vmul.f32 0.1, %v301_v56  ;;  %vm318_vm10 = vcmp.ge.f32.partialorder %v291_v57, 0.0  ;;  %v334_v60 = vmul.f32 0.1, %v291_v57 }
  0xcb   :  { %vm315_vm11 = vcmp.ge.f32.partialorder %v283_v58, 0.0  ;;  %v331_v62 = vmul.f32 0.1, %v283_v58 }
  0xcc   :  { %v354_v0 = vsel %vm322_vm9, %v301_v56, %v338_v59  ;;  %v350_v1 = vsel %vm318_vm10, %v291_v57, %v334_v60 }
  0xcd   :  { %v370_v2 = vpack.c.bf16 %v354_v0, %v354_v0  ;;  %v347_v3 = vsel %vm315_vm11, %v283_v58, %v331_v62  ;;  %v366_v4 = vpack.c.bf16 %v350_v1, %v350_v1  ;;  %v253_v5 = vpop.f32.mrf.mxu2 }
  0xce   :  { %v363_v7 = vpack.c.bf16 %v347_v3, %v347_v3  ;;  %v254_v8 = vadd.f32 %v701_v61, %v253_v5  ;;  %v236_v9 = vpop.f32.mrf.mxu0 }
  0xcf   :  { %387 = vst.msk [vmem:[%s795_s3 + $0x30] sm:$0xf] %vm374_vm2, %v370_v2  ;;  %v237_v10 = vadd.f32 %v701_v61, %v236_v9  ;;  %v292_v11 = vpop.f32.mrf.mxu1 }
  0xd0   :  { %380 = vst.msk [vmem:[%s795_s3 + $0x14] sm:$0xf] %vm374_vm2, %v363_v7  ;;  %v303_v13 = vadd.f32 %v302_v63, %v254_v8  ;;  %v293_v14 = vadd.f32 %v292_v11, %v244_v6 }
  0xd1   :  { %383 = vst.msk [vmem:[%s795_s3 + $0x20] sm:$0xf] %vm374_vm2, %v366_v4  ;;  %v286_v12 = vadd.f32 %v718_v26, %v237_v10 }
  0xd2   :  { %vm323_vm12 = vcmp.ge.f32.partialorder %v303_v13, 0.0  ;;  %v339_v15 = vmul.f32 0.1, %v303_v13  ;;  %vm319_vm13 = vcmp.ge.f32.partialorder %v293_v14, 0.0  ;;  %v335_v16 = vmul.f32 0.1, %v293_v14 }
  0xd3   :  { %vm316_vm14 = vcmp.ge.f32.partialorder %v286_v12, 0.0  ;;  %v332_v17 = vmul.f32 0.1, %v286_v12 }
  0xd4   :  { %v355_v18 = vsel %vm323_vm12, %v303_v13, %v339_v15  ;;  %v351_v19 = vsel %vm319_vm13, %v293_v14, %v335_v16 }
  0xd5   :  { %v371_v20 = vpack.c.bf16 %v355_v18, %v355_v18  ;;  %v348_v21 = vsel %vm316_vm14, %v286_v12, %v332_v17  ;;  %v367_v22 = vpack.c.bf16 %v351_v19, %v351_v19  ;;  %v256_v24 = vpop.f32.mrf.mxu2 }
  0xd6   :  { %v364_v25 = vpack.c.bf16 %v348_v21, %v348_v21  ;;  %v257_v27 = vadd.f32 %v701_v61, %v256_v24  ;;  %v238_v28 = vpop.f32.mrf.mxu0 }
  0xd7   :  { %388 = vst.msk [vmem:[%s795_s3 + $0x34] sm:$0xf] %vm374_vm2, %v371_v20  ;;  %v239_v26 = vadd.f32 %v701_v61, %v238_v28 }
  0xd8   :  { %381 = vst.msk [vmem:[%s795_s3 + $0x18] sm:$0xf] %vm374_vm2, %v364_v25  ;;  %v306_v29 = vadd.f32 %v305_v23, %v257_v27 }
  0xd9   :  { %384 = vst.msk [vmem:[%s795_s3 + $0x24] sm:$0xf] %vm374_vm2, %v367_v22  ;;  %v288_v30 = vadd.f32 %v730_v40, %v239_v26 }
  0xda   :  { %vm324_vm15 = vcmp.ge.f32.partialorder %v306_v29, 0.0  ;;  %v340_v31 = vmul.f32 0.1, %v306_v29 }
  0xdb   :  { %vm317_vm0 = vcmp.ge.f32.partialorder %v288_v30, 0.0  ;;  %v333_v32 = vmul.f32 0.1, %v288_v30 }
  0xdc   :  { %v356_v33 = vsel %vm324_vm15, %v306_v29, %v340_v31 }
  0xdd   :  { %v372_v34 = vpack.c.bf16 %v356_v33, %v356_v33  ;;  %v349_v35 = vsel %vm317_vm0, %v288_v30, %v333_v32  ;;  %v258_v36 = vpop.f32.mrf.mxu2 }
  0xde   :  { %v365_v37 = vpack.c.bf16 %v349_v35, %v349_v35  ;;  %v259_v38 = vadd.f32 %v701_v61, %v258_v36 }
  0xdf   :  { %389 = vst.msk [vmem:[%s795_s3 + $0x38] sm:$0xf] %vm374_vm2, %v372_v34 }
  0xe0   :  { %382 = vst.msk [vmem:[%s795_s3 + $0x1c] sm:$0xf] %vm374_vm2, %v365_v37  ;;  %v308_v40 = vadd.f32 %v307_v39, %v259_v38 }
  0xe2   :  { %vm325_vm1 = vcmp.ge.f32.partialorder %v308_v40, 0.0  ;;  %v341_v41 = vmul.f32 0.1, %v308_v40 }
  0xe4   :  { %v357_v42 = vsel %vm325_vm1, %v308_v40, %v341_v41 }
  0xe5   :  { %v373_v43 = vpack.c.bf16 %v357_v42, %v357_v42 }
  0xe7   :  { %390 = vst.msk [vmem:[%s795_s3 + $0x3c] sm:$0xf] %vm374_vm2, %v373_v43 }

// kernel: feature_extractor.4
= control target key start
LH: loop header
LB: loop body
LE: loop exit
PB: predicated region body
PF: predicated region fallthrough
CT: control target
= control target key end

     0   :  { %vm977_vm0 = vcmask 523264   ;;  %s2388_s1 = inlined_call_operand.vmem [shape: bf16[1600,128], index: 1, kind: input, shape index: {}]   ;;  %s2389_s0 = inlined_call_operand.vmem [shape: bf16[32,1600], index: 0, kind: input, shape index: {}]   ;;  %s2390_s2 = inlined_call_operand.vmem [shape: f32[1,128], index: 2, kind: input, shape index: {}]   ;;  %s2391_s3 = inlined_call_operand.vmem [shape: bf16[32,128], index: 3, kind: output, shape index: {}]  }
   0x1   :  { %v1794_v0 = vld [vmem:[%s2388_s1 + $0x38] sm:$0xff]  ;;  %v1793_v4 = vld [vmem:[%s2388_s1 + $0x30] sm:$0xff]  ;;  %v1792_v8 = vld [vmem:[%s2388_s1 + $0x28] sm:$0xff] }
   0x2   :  { %v1802_v1 = vld [vmem:[%s2388_s1 + $0x78] sm:$0xff]  ;;  %984 = vmatpush.bf16.msra.mxu0 %v1794_v0  ;;  %v1801_v5 = vld [vmem:[%s2388_s1 + $0x70] sm:$0xff]  ;;  %v1800_v9 = vld [vmem:[%s2388_s1 + $0x68] sm:$0xff] }
   0x3   :  { %v1810_v2 = vld [vmem:[%s2388_s1 + $0xb8] sm:$0xff]  ;;  %1003 = vmatpush.bf16.msra.mxu1 %v1802_v1  ;;  %v1809_v6 = vld [vmem:[%s2388_s1 + $0xb0] sm:$0xff]  ;;  %v1808_v10 = vld [vmem:[%s2388_s1 + $0xa8] sm:$0xff] }
   0x4   :  { %v1818_v3 = vld [vmem:[%s2388_s1 + $0xf8] sm:$0xff]  ;;  %1022 = vmatpush.bf16.msra.mxu2 %v1810_v2  ;;  %v1817_v7 = vld [vmem:[%s2388_s1 + $0xf0] sm:$0xff]  ;;  %v1816_v11 = vld [vmem:[%s2388_s1 + $0xe8] sm:$0xff] }
   0x5   :  { %1041 = vmatpush.bf16.msra.mxu3 %v1818_v3  ;;  %v1791_v12 = vld [vmem:[%s2388_s1 + $0x20] sm:$0xff]  ;;  %v1790_v16 = vld [vmem:[%s2388_s1 + $0x18] sm:$0xff]  ;;  %v1789_v20 = vld [vmem:[%s2388_s1 + $0x10] sm:$0xff] }
   0x6   :  { %985 = vmatpush.bf16.msra.mxu0 %v1793_v4  ;;  %v1799_v13 = vld [vmem:[%s2388_s1 + $0x60] sm:$0xff]  ;;  %v1798_v17 = vld [vmem:[%s2388_s1 + $0x58] sm:$0xff]  ;;  %v1797_v21 = vld [vmem:[%s2388_s1 + $0x50] sm:$0xff] }
   0x7   :  { %1004 = vmatpush.bf16.msra.mxu1 %v1801_v5  ;;  %v1807_v14 = vld [vmem:[%s2388_s1 + $0xa0] sm:$0xff]  ;;  %v1806_v18 = vld [vmem:[%s2388_s1 + $0x98] sm:$0xff]  ;;  %v1805_v22 = vld [vmem:[%s2388_s1 + $0x90] sm:$0xff] }
   0x8   :  { %1023 = vmatpush.bf16.msra.mxu2 %v1809_v6  ;;  %v1815_v15 = vld [vmem:[%s2388_s1 + $0xe0] sm:$0xff]  ;;  %v1814_v19 = vld [vmem:[%s2388_s1 + $0xd8] sm:$0xff]  ;;  %v1813_v23 = vld [vmem:[%s2388_s1 + $0xd0] sm:$0xff] }
   0x9   :  { %1042 = vmatpush.bf16.msra.mxu3 %v1817_v7  ;;  %v1788_v24 = vld [vmem:[%s2388_s1 + $0x8] sm:$0xff]  ;;  %v1787_v28 = vld [vmem:[%s2388_s1] sm:$0xff]  ;;  %v1767_v33 = vld [vmem:[%s2389_s0 + $0x30] sm:$0xf0] }
   0xa   :  { %986 = vmatpush.bf16.msra.mxu0 %v1792_v8  ;;  %v1796_v25 = vld [vmem:[%s2388_s1 + $0x48] sm:$0xff]  ;;  %v1795_v29 = vld [vmem:[%s2388_s1 + $0x40] sm:$0xff]  ;;  %v1259_v35 = vld [vmem:[%s2389_s0 + $0x34] sm:$0xf0] }
   0xb   :  { %1005 = vmatpush.bf16.msra.mxu1 %v1800_v9  ;;  %v1804_v26 = vld [vmem:[%s2388_s1 + $0x88] sm:$0xff]  ;;  %v1803_v30 = vld [vmem:[%s2388_s1 + $0x80] sm:$0xff]  ;;  %v1768_v37 = vld [vmem:[%s2389_s0 + $0x38] sm:$0xf0] }
   0xc   :  { %1024 = vmatpush.bf16.msra.mxu2 %v1808_v10  ;;  %v1812_v27 = vld [vmem:[%s2388_s1 + $0xc8] sm:$0xff]  ;;  %v1811_v31 = vld [vmem:[%s2388_s1 + $0xc0] sm:$0xff]  ;;  %v1826_v40 = vld [vmem:[%s2388_s1 + $0x138] sm:$0xff] }
   0xd   :  { %1043 = vmatpush.bf16.msra.mxu3 %v1816_v11  ;;  %v1257_v32 = vld [vmem:[%s2389_s0] sm:$0xf]  ;;  %v1761_v34 = vld [vmem:[%s2389_s0 + $0x4] sm:$0xf]  ;;  %v1265_v36 = vld [vmem:[%s2389_s0 + $0x8] sm:$0xf] }
   0xe   :  { %987 = vmatpush.bf16.msra.mxu0 %v1791_v12  ;;  %v1762_v38 = vld [vmem:[%s2389_s0 + $0xc] sm:$0xf]  ;;  %v1267_v39 = vld [vmem:[%s2389_s0 + $0x3c] sm:$0xf0]  ;;  %v1834_v41 = vld [vmem:[%s2388_s1 + $0x178] sm:$0xff]  ;;  %v1258_v42 = vor.u32 %v1767_v33, %v1257_v32  ;;  %v1262_v43 = vor.u32 %v1761_v34, %v1259_v35  ;;  %v1266_v44 = vor.u32 %v1768_v37, %v1265_v36 }
   0xf   :  { %1006 = vmatpush.bf16.msra.mxu1 %v1799_v13  ;;  %v1270_v45 = vor.u32 %v1762_v38, %v1267_v39  ;;  %v1842_v46 = vld [vmem:[%s2388_s1 + $0x1b8] sm:$0xff]  ;;  %v1825_v48 = vld [vmem:[%s2388_s1 + $0x130] sm:$0xff]  ;;  %v1824_v52 = vld [vmem:[%s2388_s1 + $0x128] sm:$0xff] }
  0x10   :  { %1025 = vmatpush.bf16.msra.mxu2 %v1807_v14  ;;  %v1850_v47 = vld [vmem:[%s2388_s1 + $0x1f8] sm:$0xff]  ;;  %v1833_v49 = vld [vmem:[%s2388_s1 + $0x170] sm:$0xff]  ;;  %v1832_v53 = vld [vmem:[%s2388_s1 + $0x168] sm:$0xff] }
  0x11   :  { %1044 = vmatpush.bf16.msra.mxu3 %v1815_v15  ;;  %v1841_v50 = vld [vmem:[%s2388_s1 + $0x1b0] sm:$0xff]  ;;  %v1840_v54 = vld [vmem:[%s2388_s1 + $0x1a8] sm:$0xff]  ;;  %v1823_v56 = vld [vmem:[%s2388_s1 + $0x120] sm:$0xff] }
  0x12   :  { %988 = vmatpush.bf16.msra.mxu0 %v1790_v16  ;;  %v1849_v51 = vld [vmem:[%s2388_s1 + $0x1f0] sm:$0xff]  ;;  %v1848_v55 = vld [vmem:[%s2388_s1 + $0x1e8] sm:$0xff]  ;;  %v1831_v57 = vld [vmem:[%s2388_s1 + $0x160] sm:$0xff] }
  0x13   :  { %1007 = vmatpush.bf16.msra.mxu1 %v1798_v17  ;;  %v1839_v58 = vld [vmem:[%s2388_s1 + $0x1a0] sm:$0xff]  ;;  %v1309_v60 = vld [vmem:[%s2389_s0 + $0x68] sm:$0xf]  ;;  %v1780_v61 = vld [vmem:[%s2389_s0 + $0x98] sm:$0xf0] }
  0x14   :  { %1026 = vmatpush.bf16.msra.mxu2 %v1806_v18  ;;  %v1847_v59 = vld [vmem:[%s2388_s1 + $0x1e0] sm:$0xff]  ;;  %v1774_v62 = vld [vmem:[%s2389_s0 + $0x6c] sm:$0xf]  ;;  %v1317_v0 = vld [vmem:[%s2389_s0 + $0x70] sm:$0xf]  ;;  %v1310_v6 = vor.u32 %v1780_v61, %v1309_v60 }
  0x15   :  { %1045 = vmatpush.bf16.msra.mxu3 %v1814_v19  ;;  %v1311_v63 = vld [vmem:[%s2389_s0 + $0x9c] sm:$0xf0]  ;;  %v1781_v1 = vld [vmem:[%s2389_s0 + $0xa0] sm:$0xf0]  ;;  %v1775_v2 = vld [vmem:[%s2389_s0 + $0x74] sm:$0xf] }
  0x16   :  { %989 = vmatpush.bf16.msra.mxu0 %v1789_v20  ;;  %v1319_v3 = vld [vmem:[%s2389_s0 + $0xa4] sm:$0xf0]  ;;  %v1822_v4 = vld [vmem:[%s2388_s1 + $0x118] sm:$0xff]  ;;  %v1314_v7 = vor.u32 %v1774_v62, %v1311_v63  ;;  %v1318_v8 = vor.u32 %v1781_v1, %v1317_v0  ;;  %v1821_v12 = vld [vmem:[%s2388_s1 + $0x110] sm:$0xff] }
  0x17   :  { %1008 = vmatpush.bf16.msra.mxu1 %v1797_v21  ;;  %v1830_v5 = vld [vmem:[%s2388_s1 + $0x158] sm:$0xff]  ;;  %v1322_v9 = vor.u32 %v1775_v2, %v1319_v3  ;;  %v1829_v13 = vld [vmem:[%s2388_s1 + $0x150] sm:$0xff]  ;;  %v1820_v16 = vld [vmem:[%s2388_s1 + $0x108] sm:$0xff] }
  0x18   :  { %1027 = vmatpush.bf16.msra.mxu2 %v1805_v22  ;;  %v1838_v10 = vld [vmem:[%s2388_s1 + $0x198] sm:$0xff]  ;;  %v1837_v14 = vld [vmem:[%s2388_s1 + $0x190] sm:$0xff]  ;;  %v1828_v17 = vld [vmem:[%s2388_s1 + $0x148] sm:$0xff] }
  0x19   :  { %1046 = vmatpush.bf16.msra.mxu3 %v1813_v23  ;;  %v1846_v11 = vld [vmem:[%s2388_s1 + $0x1d8] sm:$0xff]  ;;  %v1845_v15 = vld [vmem:[%s2388_s1 + $0x1d0] sm:$0xff]  ;;  %v1836_v18 = vld [vmem:[%s2388_s1 + $0x188] sm:$0xff] }
  0x1a   :  { %990 = vmatpush.bf16.msra.mxu0 %v1788_v24  ;;  %v1844_v19 = vld [vmem:[%s2388_s1 + $0x1c8] sm:$0xff]  ;;  %v1819_v20 = vld [vmem:[%s2388_s1 + $0x100] sm:$0xff]  ;;  %v1273_v22 = vld [vmem:[%s2389_s0 + $0x10] sm:$0xf] }
  0x1b   :  { %1009 = vmatpush.bf16.msra.mxu1 %v1796_v25  ;;  %v1827_v21 = vld [vmem:[%s2388_s1 + $0x140] sm:$0xff]  ;;  %v1764_v32 = vld [vmem:[%s2389_s0 + $0x1c] sm:$0xf]  ;;  %v1283_v33 = vld [vmem:[%s2389_s0 + $0x4c] sm:$0xf0] }
  0x1c   :  { %1028 = vmatpush.bf16.msra.mxu2 %v1804_v26  ;;  %v1835_v23 = vld [vmem:[%s2388_s1 + $0x180] sm:$0xff]  ;;  %v1858_v26 = vld [vmem:[%s2388_s1 + $0x238] sm:$0xff]  ;;  %v1286_v39 = vor.u32 %v1764_v32, %v1283_v33  ;;  %v1341_v32 = vld [vmem:[%s2389_s0 + $0x88] sm:$0xf] }
  0x1d   :  { %1047 = vmatpush.bf16.msra.mxu3 %v1812_v27  ;;  %v1843_v24 = vld [vmem:[%s2388_s1 + $0x1c0] sm:$0xff]  ;;  %v1866_v27 = vld [vmem:[%s2388_s1 + $0x278] sm:$0xff] }
  0x1e   :  { %991 = vmatpush.bf16.msra.mxu0 %v1787_v28  ;;  %v1769_v25 = vld [vmem:[%s2389_s0 + $0x40] sm:$0xf0]  ;;  %v1763_v28 = vld [vmem:[%s2389_s0 + $0x14] sm:$0xf]  ;;  %v1874_v34 = vld [vmem:[%s2388_s1 + $0x2b8] sm:$0xff] }
  0x1f   :  { %1010 = vmatpush.bf16.msra.mxu1 %v1795_v29  ;;  %v1275_v29 = vld [vmem:[%s2389_s0 + $0x44] sm:$0xf0]  ;;  %v1882_v35 = vld [vmem:[%s2388_s1 + $0x2f8] sm:$0xff]  ;;  %v1274_v36 = vor.u32 %v1769_v25, %v1273_v22 }
  0x20   :  { %1029 = vmatpush.bf16.msra.mxu2 %v1803_v30  ;;  %v1281_v30 = vld [vmem:[%s2389_s0 + $0x18] sm:$0xf]  ;;  %v1278_v37 = vor.u32 %v1763_v28, %v1275_v29  ;;  %v1772_v22 = vld [vmem:[%s2389_s0 + $0x58] sm:$0xf0]  ;;  %v1885_v29 = vld [vmem:[%s2388_s1 + $0x310] sm:$0xff] }
  0x21   :  { %1048 = vmatpush.bf16.msra.mxu3 %v1811_v31  ;;  %992 = vmatmul.bf16.vlgmr.msra.gmra.mxu0 %v1258_v42  ;;  %v1770_v31 = vld [vmem:[%s2389_s0 + $0x48] sm:$0xf0]  ;;  %v1873_v42 = vld [vmem:[%s2388_s1 + $0x2b0] sm:$0xff]  ;;  %v1854_v60 = vld [vmem:[%s2388_s1 + $0x218] sm:$0xff] }
  0x22   :  { %1060 = vmatpush.bf16.msrb.mxu0 %v1826_v40  ;;  %1011 = vmatmul.bf16.vlgmr.msra.gmra.mxu1 %v1262_v43  ;;  %v1282_v38 = vor.u32 %v1770_v31, %v1281_v30  ;;  %v1857_v40 = vld [vmem:[%s2388_s1 + $0x230] sm:$0xff]  ;;  %v1862_v61 = vld [vmem:[%s2388_s1 + $0x258] sm:$0xff]  ;;  %v1884_v30 = vld [vmem:[%s2388_s1 + $0x308] sm:$0xff] }
  0x23   :  { %1079 = vmatpush.bf16.msrb.mxu1 %v1834_v41  ;;  %1030 = vmatmul.bf16.vlgmr.msra.gmra.mxu2 %v1266_v44  ;;  %v1865_v41 = vld [vmem:[%s2388_s1 + $0x270] sm:$0xff]  ;;  %v1856_v44 = vld [vmem:[%s2388_s1 + $0x228] sm:$0xff]  ;;  %v1870_v62 = vld [vmem:[%s2388_s1 + $0x298] sm:$0xff] }
  0x24   :  { %1049 = vmatmul.bf16.vlgmr.msra.gmra.mxu3 %v1270_v45  ;;  %1098 = vmatpush.bf16.msrb.mxu2 %v1842_v46  ;;  %v1881_v43 = vld [vmem:[%s2388_s1 + $0x2f0] sm:$0xff]  ;;  %v1864_v45 = vld [vmem:[%s2388_s1 + $0x268] sm:$0xff]  ;;  %v1878_v63 = vld [vmem:[%s2388_s1 + $0x2d8] sm:$0xff] }
  0x25   :  { %1117 = vmatpush.bf16.msrb.mxu3 %v1850_v47  ;;  %v1872_v46 = vld [vmem:[%s2388_s1 + $0x2a8] sm:$0xff]  ;;  %v1883_v31 = vld [vmem:[%s2388_s1 + $0x300] sm:$0xff]  ;;  %v1784_v33 = vld [vmem:[%s2389_s0 + $0xb8] sm:$0xf0] }
  0x26   :  { %1061 = vmatpush.bf16.msrb.mxu0 %v1825_v48  ;;  %v1880_v47 = vld [vmem:[%s2388_s1 + $0x2e8] sm:$0xff]  ;;  %v1855_v48 = vld [vmem:[%s2388_s1 + $0x220] sm:$0xff] }
  0x27   :  { %1080 = vmatpush.bf16.msrb.mxu1 %v1833_v49  ;;  %v1863_v49 = vld [vmem:[%s2388_s1 + $0x260] sm:$0xff] }
  0x28   :  { %1099 = vmatpush.bf16.msrb.mxu2 %v1841_v50  ;;  %v1871_v50 = vld [vmem:[%s2388_s1 + $0x2a0] sm:$0xff] }
  0x29   :  { %1118 = vmatpush.bf16.msrb.mxu3 %v1849_v51  ;;  %v1879_v51 = vld [vmem:[%s2388_s1 + $0x2e0] sm:$0xff] }
  0x2a   :  { %1062 = vmatpush.bf16.msrb.mxu0 %v1824_v52  ;;  %v1325_v52 = vld [vmem:[%s2389_s0 + $0x78] sm:$0xf] }
  0x2b   :  { %1081 = vmatpush.bf16.msrb.mxu1 %v1832_v53  ;;  %v1782_v53 = vld [vmem:[%s2389_s0 + $0xa8] sm:$0xf0] }
  0x2c   :  { %1100 = vmatpush.bf16.msrb.mxu2 %v1840_v54  ;;  %v1776_v54 = vld [vmem:[%s2389_s0 + $0x7c] sm:$0xf]  ;;  %v1326_v0 = vor.u32 %v1782_v53, %v1325_v52 }
  0x2d   :  { %1119 = vmatpush.bf16.msrb.mxu3 %v1848_v55  ;;  %v1327_v55 = vld [vmem:[%s2389_s0 + $0xac] sm:$0xf0] }
  0x2e   :  { %1063 = vmatpush.bf16.msrb.mxu0 %v1823_v56  ;;  %v1333_v56 = vld [vmem:[%s2389_s0 + $0x80] sm:$0xf]  ;;  %v1330_v1 = vor.u32 %v1776_v54, %v1327_v55 }
  0x2f   :  { %1082 = vmatpush.bf16.msrb.mxu1 %v1831_v57  ;;  %v1783_v57 = vld [vmem:[%s2389_s0 + $0xb0] sm:$0xf0] }
  0x30   :  { %1101 = vmatpush.bf16.msrb.mxu2 %v1839_v58  ;;  %v1777_v58 = vld [vmem:[%s2389_s0 + $0x84] sm:$0xf]  ;;  %v1334_v2 = vor.u32 %v1783_v57, %v1333_v56 }
  0x31   :  { %1120 = vmatpush.bf16.msrb.mxu3 %v1847_v59  ;;  %997 = vmatmul.bf16.gmra.mxu0 %v1310_v6  ;;  %v1335_v59 = vld [vmem:[%s2389_s0 + $0xb4] sm:$0xf0]  ;;  %v1869_v6 = vld [vmem:[%s2388_s1 + $0x290] sm:$0xff] }
  0x32   :  { %1064 = vmatpush.bf16.msrb.mxu0 %v1822_v4  ;;  %1016 = vmatmul.bf16.gmra.mxu1 %v1314_v7  ;;  %v1338_v3 = vor.u32 %v1777_v58, %v1335_v59  ;;  %v1853_v4 = vld [vmem:[%s2388_s1 + $0x210] sm:$0xff] }
  0x33   :  { %1083 = vmatpush.bf16.msrb.mxu1 %v1830_v5  ;;  %1035 = vmatmul.bf16.gmra.mxu2 %v1318_v8  ;;  %v1861_v5 = vld [vmem:[%s2388_s1 + $0x250] sm:$0xff]  ;;  %v1852_v8 = vld [vmem:[%s2388_s1 + $0x208] sm:$0xff] }
  0x34   :  { %1054 = vmatmul.bf16.gmra.mxu3 %v1322_v9  ;;  %1102 = vmatpush.bf16.msrb.mxu2 %v1838_v10  ;;  %v1877_v7 = vld [vmem:[%s2388_s1 + $0x2d0] sm:$0xff]  ;;  %v1860_v9 = vld [vmem:[%s2388_s1 + $0x248] sm:$0xff] }
  0x35   :  { %1121 = vmatpush.bf16.msrb.mxu3 %v1846_v11  ;;  %v1868_v10 = vld [vmem:[%s2388_s1 + $0x288] sm:$0xff] }
  0x36   :  { %1065 = vmatpush.bf16.msrb.mxu0 %v1821_v12  ;;  %v1876_v11 = vld [vmem:[%s2388_s1 + $0x2c8] sm:$0xff]  ;;  %v1851_v12 = vld [vmem:[%s2388_s1 + $0x200] sm:$0xff] }
  0x37   :  { %1084 = vmatpush.bf16.msrb.mxu1 %v1829_v13  ;;  %v1859_v13 = vld [vmem:[%s2388_s1 + $0x240] sm:$0xff] }
  0x38   :  { %1103 = vmatpush.bf16.msrb.mxu2 %v1837_v14  ;;  %v1867_v14 = vld [vmem:[%s2388_s1 + $0x280] sm:$0xff] }
  0x39   :  { %1122 = vmatpush.bf16.msrb.mxu3 %v1845_v15  ;;  %v1875_v15 = vld [vmem:[%s2388_s1 + $0x2c0] sm:$0xff] }
  0x3a   :  { %1066 = vmatpush.bf16.msrb.mxu0 %v1820_v16  ;;  %v1289_v16 = vld [vmem:[%s2389_s0 + $0x20] sm:$0xf] }
  0x3b   :  { %1085 = vmatpush.bf16.msrb.mxu1 %v1828_v17  ;;  %v1771_v17 = vld [vmem:[%s2389_s0 + $0x50] sm:$0xf0] }
  0x3c   :  { %1104 = vmatpush.bf16.msrb.mxu2 %v1836_v18  ;;  %v1886_v18 = vld [vmem:[%s2388_s1 + $0x318] sm:$0xff]  ;;  %v1290_v25 = vor.u32 %v1771_v17, %v1289_v16 }
  0x3d   :  { %1123 = vmatpush.bf16.msrb.mxu3 %v1844_v19  ;;  %v1765_v19 = vld [vmem:[%s2389_s0 + $0x24] sm:$0xf] }
  0x3e   :  { %1067 = vmatpush.bf16.msrb.mxu0 %v1819_v20  ;;  %v1291_v20 = vld [vmem:[%s2389_s0 + $0x54] sm:$0xf0] }
  0x3f   :  { %1086 = vmatpush.bf16.msrb.mxu1 %v1827_v21  ;;  %v1297_v21 = vld [vmem:[%s2389_s0 + $0x28] sm:$0xf] }
  0x40   :  { %1105 = vmatpush.bf16.msrb.mxu2 %v1835_v23  ;;  %v1766_v23 = vld [vmem:[%s2389_s0 + $0x2c] sm:$0xf] }
  0x41   :  { %1124 = vmatpush.bf16.msrb.mxu3 %v1843_v24  ;;  %1068 = vmatmul.bf16.vlgmr.msrb.gmra.mxu0 %v1274_v36  ;;  %v1299_v24 = vld [vmem:[%s2389_s0 + $0x5c] sm:$0xf0]  ;;  %v1349_v36 = vld [vmem:[%s2389_s0 + $0x90] sm:$0xf] }
  0x42   :  { %1136 = vmatpush.bf16.msra.mxu0 %v1858_v26  ;;  %1087 = vmatmul.bf16.vlgmr.msrb.gmra.mxu1 %v1278_v37  ;;  %v1294_v26 = vor.u32 %v1765_v19, %v1291_v20  ;;  %v1302_v28 = vor.u32 %v1766_v23, %v1299_v24  ;;  %v1785_v37 = vld [vmem:[%s2389_s0 + $0xc0] sm:$0xf0] }
  0x43   :  { %1155 = vmatpush.bf16.msra.mxu1 %v1866_v27  ;;  %1106 = vmatmul.bf16.vlgmr.msrb.gmra.mxu2 %v1282_v38  ;;  %v1298_v27 = vor.u32 %v1772_v22, %v1297_v21  ;;  %v1779_v38 = vld [vmem:[%s2389_s0 + $0x94] sm:$0xf] }
  0x44   :  { %1174 = vmatpush.bf16.msra.mxu2 %v1874_v34  ;;  %1125 = vmatmul.bf16.vlgmr.msrb.gmra.mxu3 %v1286_v39  ;;  %v1778_v34 = vld [vmem:[%s2389_s0 + $0x8c] sm:$0xf]  ;;  %v1351_v39 = vld [vmem:[%s2389_s0 + $0xc4] sm:$0xf0] }
  0x45   :  { %1193 = vmatpush.bf16.msra.mxu3 %v1882_v35  ;;  %v1343_v35 = vld [vmem:[%s2389_s0 + $0xbc] sm:$0xf0] }
  0x46   :  { %1137 = vmatpush.bf16.msra.mxu0 %v1857_v40  ;;  %v1342_v40 = vor.u32 %v1784_v33, %v1341_v32 }
  0x47   :  { %1156 = vmatpush.bf16.msra.mxu1 %v1865_v41  ;;  %v1346_v41 = vor.u32 %v1778_v34, %v1343_v35 }
  0x48   :  { %1175 = vmatpush.bf16.msra.mxu2 %v1873_v42  ;;  %v1350_v42 = vor.u32 %v1785_v37, %v1349_v36 }
  0x49   :  { %1194 = vmatpush.bf16.msra.mxu3 %v1881_v43  ;;  %v1354_v43 = vor.u32 %v1779_v38, %v1351_v39 }
  0x4a   :  { %1138 = vmatpush.bf16.msra.mxu0 %v1856_v44  ;;  %v1305_v44 = vld [vmem:[%s2389_s0 + $0x30] sm:$0xf] }
  0x4b   :  { %1157 = vmatpush.bf16.msra.mxu1 %v1864_v45  ;;  %v1773_v45 = vld [vmem:[%s2389_s0 + $0x60] sm:$0xf0] }
  0x4c   :  { %1176 = vmatpush.bf16.msra.mxu2 %v1872_v46  ;;  %v1357_v46 = vld [vmem:[%s2389_s0 + $0x98] sm:$0xf] }
  0x4d   :  { %1195 = vmatpush.bf16.msra.mxu3 %v1880_v47  ;;  %v1786_v47 = vld [vmem:[%s2389_s0 + $0xc8] sm:$0xf0] }
  0x4e   :  { %1139 = vmatpush.bf16.msra.mxu0 %v1855_v48  ;;  %v1306_v48 = vor.u32 %v1773_v45, %v1305_v44 }
  0x4f   :  { %1158 = vmatpush.bf16.msra.mxu1 %v1863_v49  ;;  %v1358_v49 = vor.u32 %v1786_v47, %v1357_v46 }
  0x50   :  { %1177 = vmatpush.bf16.msra.mxu2 %v1871_v50  ;;  %v1902_v50 = vld [vmem:[%s2390_s2] ss:$0 sm:$0xff] }
  0x51   :  { %1196 = vmatpush.bf16.msra.mxu3 %v1879_v51  ;;  %1073 = vmatmul.bf16.gmra.mxu0 %v1326_v0 }
  0x52   :  { %1140 = vmatpush.bf16.msra.mxu0 %v1854_v60  ;;  %1092 = vmatmul.bf16.gmra.mxu1 %v1330_v1 }
  0x53   :  { %1159 = vmatpush.bf16.msra.mxu1 %v1862_v61  ;;  %1111 = vmatmul.bf16.gmra.mxu2 %v1334_v2 }
  0x54   :  { %1178 = vmatpush.bf16.msra.mxu2 %v1870_v62  ;;  %1130 = vmatmul.bf16.gmra.mxu3 %v1338_v3 }
  0x55   :  { %1197 = vmatpush.bf16.msra.mxu3 %v1878_v63 }
  0x56   :  { %1141 = vmatpush.bf16.msra.mxu0 %v1853_v4 }
  0x57   :  { %1160 = vmatpush.bf16.msra.mxu1 %v1861_v5 }
  0x58   :  { %1179 = vmatpush.bf16.msra.mxu2 %v1869_v6 }
  0x59   :  { %1198 = vmatpush.bf16.msra.mxu3 %v1877_v7 }
  0x5a   :  { %1142 = vmatpush.bf16.msra.mxu0 %v1852_v8 }
  0x5b   :  { %1161 = vmatpush.bf16.msra.mxu1 %v1860_v9 }
  0x5c   :  { %1180 = vmatpush.bf16.msra.mxu2 %v1868_v10 }
  0x5d   :  { %1199 = vmatpush.bf16.msra.mxu3 %v1876_v11 }
  0x5e   :  { %1143 = vmatpush.bf16.msra.mxu0 %v1851_v12 }
  0x5f   :  { %1162 = vmatpush.bf16.msra.mxu1 %v1859_v13 }
  0x60   :  { %1181 = vmatpush.bf16.msra.mxu2 %v1867_v14 }
  0x61   :  { %1200 = vmatpush.bf16.msra.mxu3 %v1875_v15  ;;  %1144 = vmatmul.bf16.vlgmr.msra.gmra.mxu0 %v1290_v25 }
  0x62   :  { %1216 = vmatpush.bf16.msrb.mxu0 %v1886_v18  ;;  %1163 = vmatmul.bf16.vlgmr.msra.gmra.mxu1 %v1294_v26 }
  0x63   :  { %1898 = vmatpush.bf16.msrb.mxu1 %v1886_v18  ;;  %1182 = vmatmul.bf16.vlgmr.msra.gmra.mxu2 %v1298_v27 }
  0x64   :  { %1201 = vmatmul.bf16.vlgmr.msra.gmra.mxu3 %v1302_v28 }
  0x66   :  { %1217 = vmatpush.bf16.msrb.mxu0 %v1885_v29 }
  0x67   :  { %1899 = vmatpush.bf16.msrb.mxu1 %v1885_v29 }
  0x6a   :  { %1218 = vmatpush.bf16.msrb.mxu0 %v1884_v30 }
  0x6b   :  { %1900 = vmatpush.bf16.msrb.mxu1 %v1884_v30 }
  0x6e   :  { %1219 = vmatpush.bf16.msrb.mxu0 %v1883_v31 }
  0x6f   :  { %1901 = vmatpush.bf16.msrb.mxu1 %v1883_v31 }
  0x71   :  { %1149 = vmatmul.bf16.gmra.mxu0 %v1342_v40 }
  0x72   :  { %1168 = vmatmul.bf16.gmra.mxu1 %v1346_v41 }
  0x73   :  { %1187 = vmatmul.bf16.gmra.mxu2 %v1350_v42 }
  0x74   :  { %1206 = vmatmul.bf16.gmra.mxu3 %v1354_v43 }
  0x81   :  { %1759 = vmatmul.msk.bf16.vlgmr.msrb.gmra.mxu0 %vm977_vm0, %v1306_v48 }
  0x82   :  { %1760 = vmatmul.msk.bf16.vlgmr.msrb.gmra.mxu1 %vm977_vm0, %v1358_v49 }
  0x9e   :  { %v993_v51 = vpop.f32.mrf.mxu0 }
  0x9f   :  { %v1012_v52 = vpop.f32.mrf.mxu1  ;;  %v994_v53 = vadd.f32 %v1902_v50, %v993_v51 }
  0xa1   :  { %v1013_v54 = vadd.f32 %v1012_v52, %v994_v53 }
  0xa6   :  { %v1031_v55 = vpop.f32.mrf.mxu2  ;;  %v995_v58 = vpop.f32.mrf.mxu0 }
  0xa7   :  { %v1050_v56 = vpop.f32.mrf.mxu3  ;;  %v1032_v57 = vadd.f32 %v1031_v55, %v1013_v54  ;;  %v1014_v59 = vpop.f32.mrf.mxu1  ;;  %v996_v60 = vadd.f32 %v1902_v50, %v995_v58 }
  0xa9   :  { %v1051_v61 = vadd.f32 %v1050_v56, %v1032_v57  ;;  %v1015_v62 = vadd.f32 %v1014_v59, %v996_v60 }
  0xae   :  { %v1033_v63 = vpop.f32.mrf.mxu2  ;;  %v998_v1 = vpop.f32.mrf.mxu0 }
  0xaf   :  { %v1052_v0 = vpop.f32.mrf.mxu3  ;;  %v1017_v2 = vpop.f32.mrf.mxu1  ;;  %v999_v3 = vadd.f32 %v1902_v50, %v998_v1  ;;  %v1034_v36 = vadd.f32 %v1033_v63, %v1015_v62 }
  0xb1   :  { %v1018_v4 = vadd.f32 %v1017_v2, %v999_v3  ;;  %v1053_v41 = vadd.f32 %v1052_v0, %v1034_v36 }
  0xb6   :  { %v1036_v5 = vpop.f32.mrf.mxu2  ;;  %v1000_v7 = vpop.f32.mrf.mxu0 }
  0xb7   :  { %v1055_v6 = vpop.f32.mrf.mxu3  ;;  %v1019_v8 = vpop.f32.mrf.mxu1  ;;  %v1001_v29 = vadd.f32 %v1902_v50, %v1000_v7  ;;  %v1037_v30 = vadd.f32 %v1036_v5, %v1018_v4 }
  0xb9   :  { %v1020_v35 = vadd.f32 %v1019_v8, %v1001_v29  ;;  %v1056_v37 = vadd.f32 %v1055_v6, %v1037_v30 }
  0xbe   :  { %v1038_v9 = vpop.f32.mrf.mxu2  ;;  %v1069_v11 = vpop.f32.mrf.mxu0 }
  0xbf   :  { %v1057_v10 = vpop.f32.mrf.mxu3  ;;  %v1088_v12 = vpop.f32.mrf.mxu1  ;;  %v1039_v38 = vadd.f32 %v1038_v9, %v1020_v35  ;;  %v1070_v39 = vadd.f32 %v1069_v11, %v1051_v61 }
  0xc1   :  { %v1058_v42 = vadd.f32 %v1057_v10, %v1039_v38  ;;  %v1089_v46 = vadd.f32 %v1088_v12, %v1070_v39 }
  0xc6   :  { %v1107_v13 = vpop.f32.mrf.mxu2  ;;  %v1071_v15 = vpop.f32.mrf.mxu0 }
  0xc7   :  { %v1126_v14 = vpop.f32.mrf.mxu3  ;;  %v1090_v16 = vpop.f32.mrf.mxu1  ;;  %v1072_v47 = vadd.f32 %v1071_v15, %v1053_v41  ;;  %v1108_v51 = vadd.f32 %v1107_v13, %v1089_v46 }
  0xc9   :  { %v1091_v53 = vadd.f32 %v1090_v16, %v1072_v47  ;;  %v1127_v55 = vadd.f32 %v1126_v14, %v1108_v51 }
  0xce   :  { %v1109_v17 = vpop.f32.mrf.mxu2  ;;  %v1074_v19 = vpop.f32.mrf.mxu0 }
  0xcf   :  { %v1128_v18 = vpop.f32.mrf.mxu3  ;;  %v1093_v20 = vpop.f32.mrf.mxu1  ;;  %v1075_v40 = vadd.f32 %v1074_v19, %v1056_v37  ;;  %v1110_v56 = vadd.f32 %v1109_v17, %v1091_v53 }
  0xd1   :  { %v1094_v48 = vadd.f32 %v1093_v20, %v1075_v40  ;;  %v1129_v0 = vadd.f32 %v1128_v18, %v1110_v56 }
  0xd6   :  { %v1112_v21 = vpop.f32.mrf.mxu2  ;;  %v1076_v23 = vpop.f32.mrf.mxu0 }
  0xd7   :  { %v1131_v22 = vpop.f32.mrf.mxu3  ;;  %v1095_v24 = vpop.f32.mrf.mxu1  ;;  %v1077_v49 = vadd.f32 %v1076_v23, %v1058_v42  ;;  %v1113_v52 = vadd.f32 %v1112_v21, %v1094_v48 }
  0xd9   :  { %v1096_v54 = vadd.f32 %v1095_v24, %v1077_v49  ;;  %v1132_v57 = vadd.f32 %v1131_v22, %v1113_v52 }
  0xde   :  { %v1114_v25 = vpop.f32.mrf.mxu2  ;;  %v1145_v27 = vpop.f32.mrf.mxu0 }
  0xdf   :  { %v1133_v26 = vpop.f32.mrf.mxu3  ;;  %v1164_v28 = vpop.f32.mrf.mxu1  ;;  %v1115_v58 = vadd.f32 %v1114_v25, %v1096_v54  ;;  %v1146_v62 = vadd.f32 %v1145_v27, %v1127_v55 }
  0xe1   :  { %v1134_v1 = vadd.f32 %v1133_v26, %v1115_v58  ;;  %v1165_v3 = vadd.f32 %v1164_v28, %v1146_v62 }
  0xe6   :  { %v1183_v31 = vpop.f32.mrf.mxu2  ;;  %v1147_v33 = vpop.f32.mrf.mxu0 }
  0xe7   :  { %v1202_v32 = vpop.f32.mrf.mxu3  ;;  %v1166_v34 = vpop.f32.mrf.mxu1  ;;  %v1148_v4 = vadd.f32 %v1147_v33, %v1129_v0  ;;  %v1184_v7 = vadd.f32 %v1183_v31, %v1165_v3 }
  0xe9   :  { %v1167_v12 = vadd.f32 %v1166_v34, %v1148_v4  ;;  %v1203_v14 = vadd.f32 %v1202_v32, %v1184_v7 }
  0xee   :  { %v1185_v43 = vpop.f32.mrf.mxu2  ;;  %v1150_v44 = vpop.f32.mrf.mxu0 }
  0xef   :  { %v1169_v45 = vpop.f32.mrf.mxu1  ;;  %v1204_v50 = vpop.f32.mrf.mxu3  ;;  %v1151_v63 = vadd.f32 %v1150_v44, %v1132_v57  ;;  %v1186_v15 = vadd.f32 %v1185_v43, %v1167_v12 }
  0xf1   :  { %v1170_v5 = vadd.f32 %v1169_v45, %v1151_v63  ;;  %v1205_v21 = vadd.f32 %v1204_v50, %v1186_v15 }
  0xf6   :  { %v1188_v59 = vpop.f32.mrf.mxu2  ;;  %v1152_v60 = vpop.f32.mrf.mxu0 }
  0xf7   :  { %v1171_v61 = vpop.f32.mrf.mxu1  ;;  %v1207_v2 = vpop.f32.mrf.mxu3  ;;  %v1153_v6 = vadd.f32 %v1152_v60, %v1134_v1  ;;  %v1189_v8 = vadd.f32 %v1188_v59, %v1170_v5 }
  0xf9   :  { %v1172_v13 = vadd.f32 %v1171_v61, %v1153_v6  ;;  %v1208_v16 = vadd.f32 %v1207_v2, %v1189_v8 }
  0xfe   :  { %v1190_v9 = vpop.f32.mrf.mxu2  ;;  %v1221_v10 = vpop.f32.mrf.mxu0 }
  0xff   :  { %v1226_v11 = vpop.f32.mrf.mxu1  ;;  %v1191_v17 = vadd.f32 %v1190_v9, %v1172_v13  ;;  %v1222_v19 = vadd.f32 %v1221_v10, %v1203_v14  ;;  %v1209_v18 = vpop.f32.mrf.mxu3 }
 0x100   :  { %v1227_v20 = vadd.f32 %v1226_v11, %v1208_v16 }
 0x101   :  { %v1210_v22 = vadd.f32 %v1209_v18, %v1191_v17  ;;  %v1235_v25 = vmul.f32 0.1, %v1222_v19  ;;  %vm1231_vm1 = vcmp.ge.f32.partialorder %v1222_v19, 0.0 }
 0x102   :  { %v1237_v26 = vmul.f32 0.1, %v1227_v20  ;;  %vm1233_vm2 = vcmp.ge.f32.partialorder %v1227_v20, 0.0 }
 0x103   :  { %v1239_v31 = vsel %vm1231_vm1, %v1222_v19, %v1235_v25 }
 0x104   :  { %v1241_v32 = vsel %vm1233_vm2, %v1227_v20, %v1237_v26 }
 0x106   :  { %v1223_v23 = vpop.f32.mrf.mxu0 }
 0x107   :  { %v1228_v24 = vpop.f32.mrf.mxu1  ;;  %v1224_v27 = vadd.f32 %v1223_v23, %v1205_v21 }
 0x108   :  { %v1229_v28 = vadd.f32 %v1228_v24, %v1210_v22 }
 0x109   :  { %vm1232_vm3 = vcmp.ge.f32.partialorder %v1224_v27, 0.0  ;;  %v1236_v29 = vmul.f32 0.1, %v1224_v27 }
 0x10a   :  { %vm1234_vm4 = vcmp.ge.f32.partialorder %v1229_v28, 0.0  ;;  %v1238_v30 = vmul.f32 0.1, %v1229_v28 }
 0x10b   :  { %v1240_v33 = vsel %vm1232_vm3, %v1224_v27, %v1236_v29 }
 0x10c   :  { %v1242_v34 = vsel %vm1234_vm4, %v1229_v28, %v1238_v30  ;;  %v1890_v35 = vpack.c.bf16 %v1240_v33, %v1239_v31 }
 0x10d   :  { %v1895_v36 = vpack.c.bf16 %v1242_v34, %v1241_v32 }
 0x10e   :  { %1891 = vst [vmem:[%s2391_s3] sm:$0xff] %v1890_v35  }
 0x10f   :  { %1897 = vst [vmem:[%s2391_s3 + $0x8] sm:$0xff] %v1895_v36  }

// kernel: feature_extractor.5
= control target key start
LH: loop header
LB: loop body
LE: loop exit
PB: predicated region body
PF: predicated region fallthrough
CT: control target
= control target key end

     0   :  { %s8149_s1 = inlined_call_operand.vmem [shape: bf16[3200,256], index: 1, kind: input, shape index: {}]   ;;  %s8150_s0 = inlined_call_operand.vmem [shape: bf16[16,3200], index: 0, kind: input, shape index: {}]   ;;  %s8151_s2 = inlined_call_operand.vmem [shape: f32[1,256], index: 2, kind: input, shape index: {}]   ;;  %s8152_s3 = inlined_call_operand.vmem [shape: bf16[16,256], index: 3, kind: output, shape index: {}]  }
   0x1   :  { %v3450_v0 = vld [vmem:[%s8149_s1 + $0x70] sm:$0xf]  ;;  %v5032_v1 = vld [vmem:[%s8149_s1 + $0x74] sm:$0xf0]  ;;  %v3442_v11 = vld [vmem:[%s8149_s1 + $0x60] sm:$0xf] }
   0x2   :  { %v3514_v2 = vld [vmem:[%s8149_s1 + $0xf0] sm:$0xf]  ;;  %v3451_v3 = vor.u32 %v5032_v1, %v3450_v0  ;;  %v5048_v4 = vld [vmem:[%s8149_s1 + $0xf4] sm:$0xf0]  ;;  %v5030_v13 = vld [vmem:[%s8149_s1 + $0x64] sm:$0xf0] }
   0x3   :  { %v3578_v5 = vld [vmem:[%s8149_s1 + $0x170] sm:$0xf]  ;;  %v5064_v6 = vld [vmem:[%s8149_s1 + $0x174] sm:$0xf0]  ;;  %v3515_v7 = vor.u32 %v5048_v4, %v3514_v2  ;;  %v3506_v14 = vld [vmem:[%s8149_s1 + $0xe0] sm:$0xf]  ;;  %v3443_v16 = vor.u32 %v5030_v13, %v3442_v11 }
   0x4   :  { %v3579_v8 = vor.u32 %v5064_v6, %v3578_v5  ;;  %v3642_v9 = vld [vmem:[%s8149_s1 + $0x1f0] sm:$0xf]  ;;  %v5080_v10 = vld [vmem:[%s8149_s1 + $0x1f4] sm:$0xf0]  ;;  %2572 = vmatpush.bf16.msra.mxu0 %v3451_v3  ;;  %v5046_v15 = vld [vmem:[%s8149_s1 + $0xe4] sm:$0xf0] }
   0x5   :  { %v3643_v12 = vor.u32 %v5080_v10, %v3642_v9  ;;  %2586 = vmatpush.bf16.msra.mxu1 %v3515_v7  ;;  %v3507_v17 = vor.u32 %v5046_v15, %v3506_v14  ;;  %v3570_v18 = vld [vmem:[%s8149_s1 + $0x160] sm:$0xf]  ;;  %v5062_v19 = vld [vmem:[%s8149_s1 + $0x164] sm:$0xf0]  ;;  %v3434_v23 = vld [vmem:[%s8149_s1 + $0x50] sm:$0xf] }
   0x6   :  { %2600 = vmatpush.bf16.msra.mxu2 %v3579_v8  ;;  %v3634_v20 = vld [vmem:[%s8149_s1 + $0x1e0] sm:$0xf]  ;;  %v3571_v21 = vor.u32 %v5062_v19, %v3570_v18  ;;  %v5078_v22 = vld [vmem:[%s8149_s1 + $0x1e4] sm:$0xf0]  ;;  %v5028_v24 = vld [vmem:[%s8149_s1 + $0x54] sm:$0xf0] }
   0x7   :  { %2614 = vmatpush.bf16.msra.mxu3 %v3643_v12  ;;  %v3635_v25 = vor.u32 %v5078_v22, %v3634_v20  ;;  %v3498_v26 = vld [vmem:[%s8149_s1 + $0xd0] sm:$0xf]  ;;  %v5044_v27 = vld [vmem:[%s8149_s1 + $0xd4] sm:$0xf0]  ;;  %v3435_v29 = vor.u32 %v5028_v24, %v3434_v23  ;;  %v3426_v35 = vld [vmem:[%s8149_s1 + $0x40] sm:$0xf] }
   0x8   :  { %v3562_v28 = vld [vmem:[%s8149_s1 + $0x150] sm:$0xf]  ;;  %2573 = vmatpush.bf16.msra.mxu0 %v3443_v16  ;;  %v5060_v30 = vld [vmem:[%s8149_s1 + $0x154] sm:$0xf0]  ;;  %v3499_v33 = vor.u32 %v5044_v27, %v3498_v26  ;;  %v5026_v36 = vld [vmem:[%s8149_s1 + $0x44] sm:$0xf0] }
   0x9   :  { %v3626_v31 = vld [vmem:[%s8149_s1 + $0x1d0] sm:$0xf]  ;;  %v5076_v32 = vld [vmem:[%s8149_s1 + $0x1d4] sm:$0xf0]  ;;  %2587 = vmatpush.bf16.msra.mxu1 %v3507_v17  ;;  %v3563_v34 = vor.u32 %v5060_v30, %v3562_v28  ;;  %v3490_v37 = vld [vmem:[%s8149_s1 + $0xc0] sm:$0xf]  ;;  %v3427_v44 = vor.u32 %v5026_v36, %v3426_v35 }
   0xa   :  { %2601 = vmatpush.bf16.msra.mxu2 %v3571_v21  ;;  %v3627_v38 = vor.u32 %v5076_v32, %v3626_v31  ;;  %v5042_v39 = vld [vmem:[%s8149_s1 + $0xc4] sm:$0xf0]  ;;  %v3554_v40 = vld [vmem:[%s8149_s1 + $0x140] sm:$0xf]  ;;  %v3418_v47 = vld [vmem:[%s8149_s1 + $0x30] sm:$0xf] }
   0xb   :  { %2615 = vmatpush.bf16.msra.mxu3 %v3635_v25  ;;  %v5058_v41 = vld [vmem:[%s8149_s1 + $0x144] sm:$0xf0]  ;;  %v3618_v42 = vld [vmem:[%s8149_s1 + $0x1c0] sm:$0xf]  ;;  %v3491_v45 = vor.u32 %v5042_v39, %v3490_v37  ;;  %v5024_v48 = vld [vmem:[%s8149_s1 + $0x34] sm:$0xf0] }
   0xc   :  { %v5074_v43 = vld [vmem:[%s8149_s1 + $0x1c4] sm:$0xf0]  ;;  %2574 = vmatpush.bf16.msra.mxu0 %v3435_v29  ;;  %v3555_v46 = vor.u32 %v5058_v41, %v3554_v40  ;;  %v3482_v49 = vld [vmem:[%s8149_s1 + $0xb0] sm:$0xf]  ;;  %v5040_v51 = vld [vmem:[%s8149_s1 + $0xb4] sm:$0xf0]  ;;  %v3419_v56 = vor.u32 %v5024_v48, %v3418_v47 }
   0xd   :  { %2588 = vmatpush.bf16.msra.mxu1 %v3499_v33  ;;  %v3619_v50 = vor.u32 %v5074_v43, %v3618_v42  ;;  %v3546_v52 = vld [vmem:[%s8149_s1 + $0x130] sm:$0xf]  ;;  %v5056_v53 = vld [vmem:[%s8149_s1 + $0x134] sm:$0xf0]  ;;  %v3483_v57 = vor.u32 %v5040_v51, %v3482_v49  ;;  %v3410_v59 = vld [vmem:[%s8149_s1 + $0x20] sm:$0xf] }
   0xe   :  { %2602 = vmatpush.bf16.msra.mxu2 %v3563_v34  ;;  %v3610_v54 = vld [vmem:[%s8149_s1 + $0x1b0] sm:$0xf]  ;;  %v5072_v55 = vld [vmem:[%s8149_s1 + $0x1b4] sm:$0xf0]  ;;  %v3547_v58 = vor.u32 %v5056_v53, %v3546_v52  ;;  %v5022_v60 = vld [vmem:[%s8149_s1 + $0x24] sm:$0xf0] }
   0xf   :  { %2616 = vmatpush.bf16.msra.mxu3 %v3627_v38  ;;  %v3474_v61 = vld [vmem:[%s8149_s1 + $0xa0] sm:$0xf]  ;;  %v3611_v62 = vor.u32 %v5072_v55, %v3610_v54  ;;  %v5038_v63 = vld [vmem:[%s8149_s1 + $0xa4] sm:$0xf0]  ;;  %v3411_v4 = vor.u32 %v5022_v60, %v3410_v59  ;;  %v3402_v7 = vld [vmem:[%s8149_s1 + $0x10] sm:$0xf] }
  0x10   :  { %2575 = vmatpush.bf16.msra.mxu0 %v3427_v44  ;;  %v3538_v0 = vld [vmem:[%s8149_s1 + $0x120] sm:$0xf]  ;;  %v5054_v1 = vld [vmem:[%s8149_s1 + $0x124] sm:$0xf0]  ;;  %v3475_v5 = vor.u32 %v5038_v63, %v3474_v61  ;;  %v5020_v8 = vld [vmem:[%s8149_s1 + $0x14] sm:$0xf0] }
  0x11   :  { %2589 = vmatpush.bf16.msra.mxu1 %v3491_v45  ;;  %v3602_v2 = vld [vmem:[%s8149_s1 + $0x1a0] sm:$0xf]  ;;  %v5070_v3 = vld [vmem:[%s8149_s1 + $0x1a4] sm:$0xf0]  ;;  %v3539_v6 = vor.u32 %v5054_v1, %v3538_v0  ;;  %v3466_v9 = vld [vmem:[%s8149_s1 + $0x90] sm:$0xf]  ;;  %v3403_v16 = vor.u32 %v5020_v8, %v3402_v7 }
  0x12   :  { %2603 = vmatpush.bf16.msra.mxu2 %v3555_v46  ;;  %v3603_v10 = vor.u32 %v5070_v3, %v3602_v2  ;;  %v5036_v11 = vld [vmem:[%s8149_s1 + $0x94] sm:$0xf0]  ;;  %v3530_v12 = vld [vmem:[%s8149_s1 + $0x110] sm:$0xf]  ;;  %v3394_v17 = vld [vmem:[%s8149_s1] sm:$0xf] }
  0x13   :  { %2617 = vmatpush.bf16.msra.mxu3 %v3619_v50  ;;  %v5052_v13 = vld [vmem:[%s8149_s1 + $0x114] sm:$0xf0]  ;;  %v3594_v14 = vld [vmem:[%s8149_s1 + $0x190] sm:$0xf]  ;;  %v5018_v18 = vld [vmem:[%s8149_s1 + $0x4] sm:$0xf0]  ;;  %v3467_v19 = vor.u32 %v5036_v11, %v3466_v9 }
  0x14   :  { %2576 = vmatpush.bf16.msra.mxu0 %v3419_v56  ;;  %v5068_v15 = vld [vmem:[%s8149_s1 + $0x194] sm:$0xf0]  ;;  %v3531_v20 = vor.u32 %v5052_v13, %v3530_v12  ;;  %v3458_v21 = vld [vmem:[%s8149_s1 + $0x80] sm:$0xf]  ;;  %v5034_v22 = vld [vmem:[%s8149_s1 + $0x84] sm:$0xf0]  ;;  %v3395_v31 = vor.u32 %v5018_v18, %v3394_v17 }
  0x15   :  { %2590 = vmatpush.bf16.msra.mxu1 %v3483_v57  ;;  %v3522_v23 = vld [vmem:[%s8149_s1 + $0x100] sm:$0xf]  ;;  %v3595_v24 = vor.u32 %v5068_v15, %v3594_v14  ;;  %v5050_v25 = vld [vmem:[%s8149_s1 + $0x104] sm:$0xf0]  ;;  %v3706_v26 = vld [vmem:[%s8149_s1 + $0x270] sm:$0xf]  ;;  %v3459_v35 = vor.u32 %v5034_v22, %v3458_v21 }
  0x16   :  { %2604 = vmatpush.bf16.msra.mxu2 %v3547_v58  ;;  %v5096_v27 = vld [vmem:[%s8149_s1 + $0x274] sm:$0xf0]  ;;  %v3770_v28 = vld [vmem:[%s8149_s1 + $0x2f0] sm:$0xf]  ;;  %v3586_v33 = vld [vmem:[%s8149_s1 + $0x180] sm:$0xf]  ;;  %v3523_v36 = vor.u32 %v5050_v25, %v3522_v23 }
  0x17   :  { %2618 = vmatpush.bf16.msra.mxu3 %v3611_v62  ;;  %v5112_v29 = vld [vmem:[%s8149_s1 + $0x2f4] sm:$0xf0]  ;;  %v3834_v30 = vld [vmem:[%s8149_s1 + $0x370] sm:$0xf]  ;;  %v5066_v34 = vld [vmem:[%s8149_s1 + $0x184] sm:$0xf0]  ;;  %v3707_v39 = vor.u32 %v5096_v27, %v3706_v26 }
  0x18   :  { %2577 = vmatpush.bf16.msra.mxu0 %v3411_v4  ;;  %v5128_v32 = vld [vmem:[%s8149_s1 + $0x374] sm:$0xf0]  ;;  %v3898_v37 = vld [vmem:[%s8149_s1 + $0x3f0] sm:$0xf]  ;;  %v3771_v40 = vor.u32 %v5112_v29, %v3770_v28  ;;  %v3698_v41 = vld [vmem:[%s8149_s1 + $0x260] sm:$0xf]  ;;  %v3587_v44 = vor.u32 %v5066_v34, %v3586_v33 }
  0x19   :  { %2591 = vmatpush.bf16.msra.mxu1 %v3475_v5  ;;  %v5144_v38 = vld [vmem:[%s8149_s1 + $0x3f4] sm:$0xf0]  ;;  %v5094_v42 = vld [vmem:[%s8149_s1 + $0x264] sm:$0xf0]  ;;  %v3835_v43 = vor.u32 %v5128_v32, %v3834_v30  ;;  %v3762_v45 = vld [vmem:[%s8149_s1 + $0x2e0] sm:$0xf] }
  0x1a   :  { %2605 = vmatpush.bf16.msra.mxu2 %v3539_v6  ;;  %v5110_v46 = vld [vmem:[%s8149_s1 + $0x2e4] sm:$0xf0]  ;;  %v3826_v47 = vld [vmem:[%s8149_s1 + $0x360] sm:$0xf]  ;;  %v3899_v48 = vor.u32 %v5144_v38, %v3898_v37  ;;  %v3690_v52 = vld [vmem:[%s8149_s1 + $0x250] sm:$0xf]  ;;  %v3699_v56 = vor.u32 %v5094_v42, %v3698_v41 }
  0x1b   :  { %2619 = vmatpush.bf16.msra.mxu3 %v3603_v10  ;;  %v5126_v49 = vld [vmem:[%s8149_s1 + $0x364] sm:$0xf0]  ;;  %v3890_v50 = vld [vmem:[%s8149_s1 + $0x3e0] sm:$0xf]  ;;  %v5004_v54 = vld [vmem:[%s8150_s0 + $0x60] sm:$0xf0]  ;;  %v3763_v57 = vor.u32 %v5110_v46, %v3762_v45 }
  0x1c   :  { %2578 = vmatpush.bf16.msra.mxu0 %v3403_v16  ;;  %v5142_v51 = vld [vmem:[%s8149_s1 + $0x3e4] sm:$0xf0]  ;;  %v3294_v53 = vld [vmem:[%s8150_s0] sm:$0xf]  ;;  %v5092_v58 = vld [vmem:[%s8149_s1 + $0x254] sm:$0xf0]  ;;  %v3827_v62 = vor.u32 %v5126_v49, %v3826_v47 }
  0x1d   :  { %2592 = vmatpush.bf16.msra.mxu1 %v3467_v19  ;;  %v3302_v55 = vld [vmem:[%s8150_s0 + $0x8] sm:$0xf]  ;;  %v3754_v59 = vld [vmem:[%s8149_s1 + $0x2d0] sm:$0xf]  ;;  %v5696_v60 = vor.u32 %v5004_v54, %v3294_v53  ;;  %v5005_v61 = vld [vmem:[%s8150_s0 + $0x68] sm:$0xf0]  ;;  %v3891_v3 = vor.u32 %v5142_v51, %v3890_v50  ;;  %v3691_v11 = vor.u32 %v5092_v58, %v3690_v52 }
  0x1e   :  { %2606 = vmatpush.bf16.msra.mxu2 %v3531_v20  ;;  %v5108_v63 = vld [vmem:[%s8149_s1 + $0x2d4] sm:$0xf0]  ;;  %v3818_v0 = vld [vmem:[%s8149_s1 + $0x350] sm:$0xf]  ;;  %v5710_v2 = vor.u32 %v5005_v61, %v3302_v55  ;;  %v4992_v5 = vld [vmem:[%s8150_s0 + $0x4] sm:$0xf] }
  0x1f   :  { %2620 = vmatpush.bf16.msra.mxu3 %v3595_v24  ;;  %v5124_v1 = vld [vmem:[%s8149_s1 + $0x354] sm:$0xf0]  ;;  %v3882_v4 = vld [vmem:[%s8149_s1 + $0x3d0] sm:$0xf]  ;;  %v3296_v6 = vld [vmem:[%s8150_s0 + $0x64] sm:$0xf0]  ;;  %v3755_v12 = vor.u32 %v5108_v63, %v3754_v59 }
  0x20   :  { %2579 = vmatpush.bf16.msra.mxu0 %v3395_v31  ;;  %v5140_v7 = vld [vmem:[%s8149_s1 + $0x3d4] sm:$0xf0]  ;;  %v5726_v8 = vor.u32 %v4992_v5, %v3296_v6  ;;  %v4993_v9 = vld [vmem:[%s8150_s0 + $0xc] sm:$0xf]  ;;  %v3304_v10 = vld [vmem:[%s8150_s0 + $0x6c] sm:$0xf0]  ;;  %v3819_v15 = vor.u32 %v5124_v1, %v3818_v0 }
  0x21   :  { %2593 = vmatpush.bf16.msra.mxu1 %v3459_v35  ;;  %v3682_v13 = vld [vmem:[%s8149_s1 + $0x240] sm:$0xf]  ;;  %v5737_v14 = vor.u32 %v4993_v9, %v3304_v10  ;;  %v5090_v16 = vld [vmem:[%s8149_s1 + $0x244] sm:$0xf0]  ;;  %v3883_v19 = vor.u32 %v5140_v7, %v3882_v4  ;;  %v3674_v26 = vld [vmem:[%s8149_s1 + $0x230] sm:$0xf] }
  0x22   :  { %2607 = vmatpush.bf16.msra.mxu2 %v3523_v36  ;;  %v3746_v17 = vld [vmem:[%s8149_s1 + $0x2c0] sm:$0xf]  ;;  %v5106_v18 = vld [vmem:[%s8149_s1 + $0x2c4] sm:$0xf0]  ;;  %v3683_v24 = vor.u32 %v5090_v16, %v3682_v13  ;;  %v5088_v28 = vld [vmem:[%s8149_s1 + $0x234] sm:$0xf0] }
  0x23   :  { %2621 = vmatpush.bf16.msra.mxu3 %v3587_v44  ;;  %2580 = vmatmul.bf16.vlgmr.msra.gmra.mxu0 %v5696_v60  ;;  %v3810_v20 = vld [vmem:[%s8149_s1 + $0x340] sm:$0xf]  ;;  %v5122_v21 = vld [vmem:[%s8149_s1 + $0x344] sm:$0xf0]  ;;  %v3747_v25 = vor.u32 %v5106_v18, %v3746_v17  ;;  %v3738_v29 = vld [vmem:[%s8149_s1 + $0x2b0] sm:$0xf]  ;;  %v3675_v36 = vor.u32 %v5088_v28, %v3674_v26 }
  0x24   :  { %2628 = vmatpush.bf16.msrb.mxu0 %v3707_v39  ;;  %2594 = vmatmul.bf16.vlgmr.msra.gmra.mxu1 %v5726_v8  ;;  %v3874_v22 = vld [vmem:[%s8149_s1 + $0x3c0] sm:$0xf]  ;;  %v5138_v23 = vld [vmem:[%s8149_s1 + $0x3c4] sm:$0xf0]  ;;  %v3811_v27 = vor.u32 %v5122_v21, %v3810_v20  ;;  %v5104_v30 = vld [vmem:[%s8149_s1 + $0x2b4] sm:$0xf0] }
  0x25   :  { %2642 = vmatpush.bf16.msrb.mxu1 %v3771_v40  ;;  %2608 = vmatmul.bf16.vlgmr.msra.gmra.mxu2 %v5710_v2  ;;  %v3875_v31 = vor.u32 %v5138_v23, %v3874_v22  ;;  %v3802_v32 = vld [vmem:[%s8149_s1 + $0x330] sm:$0xf]  ;;  %v5120_v33 = vld [vmem:[%s8149_s1 + $0x334] sm:$0xf0]  ;;  %v3739_v37 = vor.u32 %v5104_v30, %v3738_v29  ;;  %v3666_v38 = vld [vmem:[%s8149_s1 + $0x220] sm:$0xf] }
  0x26   :  { %2656 = vmatpush.bf16.msrb.mxu2 %v3835_v43  ;;  %2622 = vmatmul.bf16.vlgmr.msra.gmra.mxu3 %v5737_v14  ;;  %v3866_v34 = vld [vmem:[%s8149_s1 + $0x3b0] sm:$0xf]  ;;  %v5136_v35 = vld [vmem:[%s8149_s1 + $0x3b4] sm:$0xf0]  ;;  %v3803_v39 = vor.u32 %v5120_v33, %v3802_v32  ;;  %v5086_v40 = vld [vmem:[%s8149_s1 + $0x224] sm:$0xf0] }
  0x27   :  { %2670 = vmatpush.bf16.msrb.mxu3 %v3899_v48  ;;  %v3730_v41 = vld [vmem:[%s8149_s1 + $0x2a0] sm:$0xf]  ;;  %v5102_v42 = vld [vmem:[%s8149_s1 + $0x2a4] sm:$0xf0]  ;;  %v3867_v43 = vor.u32 %v5136_v35, %v3866_v34  ;;  %v3667_v48 = vor.u32 %v5086_v40, %v3666_v38  ;;  %v3658_v50 = vld [vmem:[%s8149_s1 + $0x210] sm:$0xf] }
  0x28   :  { %2629 = vmatpush.bf16.msrb.mxu0 %v3699_v56  ;;  %v3794_v44 = vld [vmem:[%s8149_s1 + $0x320] sm:$0xf]  ;;  %v5118_v45 = vld [vmem:[%s8149_s1 + $0x324] sm:$0xf0]  ;;  %v3731_v49 = vor.u32 %v5102_v42, %v3730_v41  ;;  %v5084_v51 = vld [vmem:[%s8149_s1 + $0x214] sm:$0xf0] }
  0x29   :  { %2643 = vmatpush.bf16.msrb.mxu1 %v3763_v57  ;;  %v3858_v46 = vld [vmem:[%s8149_s1 + $0x3a0] sm:$0xf]  ;;  %v5134_v47 = vld [vmem:[%s8149_s1 + $0x3a4] sm:$0xf0]  ;;  %v3795_v52 = vor.u32 %v5118_v45, %v3794_v44  ;;  %v3722_v53 = vld [vmem:[%s8149_s1 + $0x290] sm:$0xf]  ;;  %v3659_v1 = vor.u32 %v5084_v51, %v3658_v50 }
  0x2a   :  { %2657 = vmatpush.bf16.msrb.mxu2 %v3827_v62  ;;  %v5100_v54 = vld [vmem:[%s8149_s1 + $0x294] sm:$0xf0]  ;;  %v3786_v55 = vld [vmem:[%s8149_s1 + $0x310] sm:$0xf]  ;;  %v3859_v56 = vor.u32 %v5134_v47, %v3858_v46  ;;  %v3650_v61 = vld [vmem:[%s8149_s1 + $0x200] sm:$0xf] }
  0x2b   :  { %2671 = vmatpush.bf16.msrb.mxu3 %v3891_v3  ;;  %v5116_v57 = vld [vmem:[%s8149_s1 + $0x314] sm:$0xf0]  ;;  %v3850_v58 = vld [vmem:[%s8149_s1 + $0x390] sm:$0xf]  ;;  %v5082_v62 = vld [vmem:[%s8149_s1 + $0x204] sm:$0xf0]  ;;  %v3723_v3 = vor.u32 %v5100_v54, %v3722_v53 }
  0x2c   :  { %2630 = vmatpush.bf16.msrb.mxu0 %v3691_v11  ;;  %v5132_v59 = vld [vmem:[%s8149_s1 + $0x394] sm:$0xf0]  ;;  %v3714_v63 = vld [vmem:[%s8149_s1 + $0x280] sm:$0xf]  ;;  %v5098_v0 = vld [vmem:[%s8149_s1 + $0x284] sm:$0xf0]  ;;  %v3787_v7 = vor.u32 %v5116_v57, %v3786_v55  ;;  %v3651_v20 = vor.u32 %v5082_v62, %v3650_v61 }
  0x2d   :  { %2644 = vmatpush.bf16.msrb.mxu1 %v3755_v12  ;;  %v3778_v4 = vld [vmem:[%s8149_s1 + $0x300] sm:$0xf]  ;;  %v5114_v5 = vld [vmem:[%s8149_s1 + $0x304] sm:$0xf0]  ;;  %v3962_v6 = vld [vmem:[%s8149_s1 + $0x470] sm:$0xf]  ;;  %v3851_v12 = vor.u32 %v5132_v59, %v3850_v58  ;;  %v3715_v21 = vor.u32 %v5098_v0, %v3714_v63 }
  0x2e   :  { %2658 = vmatpush.bf16.msrb.mxu2 %v3819_v15  ;;  %v5160_v9 = vld [vmem:[%s8149_s1 + $0x474] sm:$0xf0]  ;;  %v4026_v10 = vld [vmem:[%s8149_s1 + $0x4f0] sm:$0xf]  ;;  %v3842_v16 = vld [vmem:[%s8149_s1 + $0x380] sm:$0xf] }
  0x2f   :  { %2672 = vmatpush.bf16.msrb.mxu3 %v3883_v19  ;;  %v5176_v11 = vld [vmem:[%s8149_s1 + $0x4f4] sm:$0xf0]  ;;  %v4090_v13 = vld [vmem:[%s8149_s1 + $0x570] sm:$0xf]  ;;  %v5130_v17 = vld [vmem:[%s8149_s1 + $0x384] sm:$0xf0]  ;;  %v3963_v26 = vor.u32 %v5160_v9, %v3962_v6 }
  0x30   :  { %2631 = vmatpush.bf16.msrb.mxu0 %v3683_v24  ;;  %v5192_v15 = vld [vmem:[%s8149_s1 + $0x574] sm:$0xf0]  ;;  %v3310_v18 = vld [vmem:[%s8150_s0 + $0x10] sm:$0xf]  ;;  %v5006_v19 = vld [vmem:[%s8150_s0 + $0x70] sm:$0xf0]  ;;  %v4027_v30 = vor.u32 %v5176_v11, %v4026_v10  ;;  %v3843_v35 = vor.u32 %v5130_v17, %v3842_v16 }
  0x31   :  { %2645 = vmatpush.bf16.msrb.mxu1 %v3747_v25  ;;  %v3318_v22 = vld [vmem:[%s8150_s0 + $0x18] sm:$0xf]  ;;  %v5007_v23 = vld [vmem:[%s8150_s0 + $0x78] sm:$0xf0]  ;;  %v4154_v24 = vld [vmem:[%s8149_s1 + $0x5f0] sm:$0xf]  ;;  %v3779_v25 = vor.u32 %v5114_v5, %v3778_v4 }
  0x32   :  { %2659 = vmatpush.bf16.msrb.mxu2 %v3811_v27  ;;  %v5208_v27 = vld [vmem:[%s8149_s1 + $0x5f4] sm:$0xf0]  ;;  %v4994_v28 = vld [vmem:[%s8150_s0 + $0x14] sm:$0xf]  ;;  %v4995_v32 = vld [vmem:[%s8150_s0 + $0x1c] sm:$0xf]  ;;  %v5920_v40 = vor.u32 %v5007_v23, %v3318_v22 }
  0x33   :  { %2673 = vmatpush.bf16.msrb.mxu3 %v3875_v31  ;;  %v3312_v29 = vld [vmem:[%s8150_s0 + $0x74] sm:$0xf0]  ;;  %v4091_v31 = vor.u32 %v5192_v15, %v4090_v13  ;;  %v3954_v33 = vld [vmem:[%s8149_s1 + $0x460] sm:$0xf]  ;;  %v5158_v34 = vld [vmem:[%s8149_s1 + $0x464] sm:$0xf0]  ;;  %v4155_v41 = vor.u32 %v5208_v27, %v4154_v24 }
  0x34   :  { %2632 = vmatpush.bf16.msrb.mxu0 %v3675_v36  ;;  %v5909_v36 = vor.u32 %v5006_v19, %v3310_v18  ;;  %v4018_v38 = vld [vmem:[%s8149_s1 + $0x4e0] sm:$0xf]  ;;  %v5928_v44 = vor.u32 %v4994_v28, %v3312_v29  ;;  %v3955_v45 = vor.u32 %v5158_v34, %v3954_v33  ;;  %v5206_v47 = vld [vmem:[%s8149_s1 + $0x5e4] sm:$0xf0]  ;;  %v3946_v50 = vld [vmem:[%s8149_s1 + $0x450] sm:$0xf] }
  0x35   :  { %2646 = vmatpush.bf16.msrb.mxu1 %v3739_v37  ;;  %v3320_v37 = vld [vmem:[%s8150_s0 + $0x7c] sm:$0xf0]  ;;  %v5156_v51 = vld [vmem:[%s8149_s1 + $0x454] sm:$0xf0]  ;;  %v4010_v53 = vld [vmem:[%s8149_s1 + $0x4d0] sm:$0xf] }
  0x36   :  { %2660 = vmatpush.bf16.msrb.mxu2 %v3803_v39  ;;  %v5174_v39 = vld [vmem:[%s8149_s1 + $0x4e4] sm:$0xf0]  ;;  %v4082_v42 = vld [vmem:[%s8149_s1 + $0x560] sm:$0xf]  ;;  %v5172_v54 = vld [vmem:[%s8149_s1 + $0x4d4] sm:$0xf0]  ;;  %v3947_v58 = vor.u32 %v5156_v51, %v3946_v50 }
  0x37   :  { %2674 = vmatpush.bf16.msrb.mxu3 %v3867_v43  ;;  %v5190_v43 = vld [vmem:[%s8149_s1 + $0x564] sm:$0xf0]  ;;  %v4146_v46 = vld [vmem:[%s8149_s1 + $0x5e0] sm:$0xf]  ;;  %v5188_v57 = vld [vmem:[%s8149_s1 + $0x554] sm:$0xf0]  ;;  %v4011_v62 = vor.u32 %v5172_v54, %v4010_v53 }
  0x38   :  { %2633 = vmatpush.bf16.msrb.mxu0 %v3667_v48  ;;  %v5936_v48 = vor.u32 %v4995_v32, %v3320_v37  ;;  %v4147_v55 = vor.u32 %v5206_v47, %v4146_v46  ;;  %v4138_v59 = vld [vmem:[%s8149_s1 + $0x5d0] sm:$0xf]  ;;  %v5204_v61 = vld [vmem:[%s8149_s1 + $0x5d4] sm:$0xf0]  ;;  %v3938_v63 = vld [vmem:[%s8149_s1 + $0x440] sm:$0xf] }
  0x39   :  { %2647 = vmatpush.bf16.msrb.mxu1 %v3731_v49  ;;  %v4019_v49 = vor.u32 %v5174_v39, %v4018_v38  ;;  %v5154_v0 = vld [vmem:[%s8149_s1 + $0x444] sm:$0xf0]  ;;  %v4139_v5 = vor.u32 %v5204_v61, %v4138_v59  ;;  %v4066_v6 = vld [vmem:[%s8149_s1 + $0x540] sm:$0xf]  ;;  %v3930_v13 = vld [vmem:[%s8149_s1 + $0x430] sm:$0xf] }
  0x3a   :  { %2661 = vmatpush.bf16.msrb.mxu2 %v3795_v52  ;;  %v4083_v52 = vor.u32 %v5190_v43, %v4082_v42  ;;  %v5170_v4 = vld [vmem:[%s8149_s1 + $0x4c4] sm:$0xf0]  ;;  %v3939_v9 = vor.u32 %v5154_v0, %v3938_v63  ;;  %v4130_v10 = vld [vmem:[%s8149_s1 + $0x5c0] sm:$0xf]  ;;  %v5152_v15 = vld [vmem:[%s8149_s1 + $0x434] sm:$0xf0] }
  0x3b   :  { %2675 = vmatpush.bf16.msrb.mxu3 %v3859_v56  ;;  %v4074_v56 = vld [vmem:[%s8149_s1 + $0x550] sm:$0xf]  ;;  %v5202_v11 = vld [vmem:[%s8149_s1 + $0x5c4] sm:$0xf0]  ;;  %v5168_v18 = vld [vmem:[%s8149_s1 + $0x4b4] sm:$0xf0]  ;;  %v3931_v22 = vor.u32 %v5152_v15, %v3930_v13 }
  0x3c   :  { %2634 = vmatpush.bf16.msrb.mxu0 %v3659_v1  ;;  %v4075_v1 = vor.u32 %v5188_v57, %v4074_v56  ;;  %v3994_v17 = vld [vmem:[%s8149_s1 + $0x4b0] sm:$0xf]  ;;  %v4131_v19 = vor.u32 %v5202_v11, %v4130_v10  ;;  %v5200_v24 = vld [vmem:[%s8149_s1 + $0x5b4] sm:$0xf0]  ;;  %v5150_v27 = vld [vmem:[%s8149_s1 + $0x424] sm:$0xf0] }
  0x3d   :  { %2648 = vmatpush.bf16.msrb.mxu1 %v3723_v3  ;;  %v4002_v3 = vld [vmem:[%s8149_s1 + $0x4c0] sm:$0xf]  ;;  %v4122_v23 = vld [vmem:[%s8149_s1 + $0x5b0] sm:$0xf]  ;;  %v5182_v33 = vld [vmem:[%s8149_s1 + $0x524] sm:$0xf0] }
  0x3e   :  { %2662 = vmatpush.bf16.msrb.mxu2 %v3787_v7  ;;  %v5186_v7 = vld [vmem:[%s8149_s1 + $0x544] sm:$0xf0]  ;;  %v3986_v29 = vld [vmem:[%s8149_s1 + $0x4a0] sm:$0xf]  ;;  %v3914_v39 = vld [vmem:[%s8149_s1 + $0x410] sm:$0xf] }
  0x3f   :  { %2676 = vmatpush.bf16.msrb.mxu3 %v3851_v12  ;;  %v4003_v12 = vor.u32 %v5170_v4, %v4002_v3  ;;  %v4067_v16 = vor.u32 %v5186_v7, %v4066_v6  ;;  %v4050_v32 = vld [vmem:[%s8149_s1 + $0x520] sm:$0xf]  ;;  %v5198_v37 = vld [vmem:[%s8149_s1 + $0x5a4] sm:$0xf0]  ;;  %v3978_v42 = vld [vmem:[%s8149_s1 + $0x490] sm:$0xf] }
  0x40   :  { %2635 = vmatpush.bf16.msrb.mxu0 %v3651_v20  ;;  %v4058_v20 = vld [vmem:[%s8149_s1 + $0x530] sm:$0xf]  ;;  %v4051_v43 = vor.u32 %v5182_v33, %v4050_v32  ;;  %v5180_v47 = vld [vmem:[%s8149_s1 + $0x514] sm:$0xf0]  ;;  %v5146_v54 = vld [vmem:[%s8149_s1 + $0x404] sm:$0xf0] }
  0x41   :  { %2649 = vmatpush.bf16.msrb.mxu1 %v3715_v21  ;;  %v5184_v21 = vld [vmem:[%s8149_s1 + $0x534] sm:$0xf0]  ;;  %v4042_v46 = vld [vmem:[%s8149_s1 + $0x510] sm:$0xf]  ;;  %v5162_v56 = vld [vmem:[%s8149_s1 + $0x484] sm:$0xf0] }
  0x42   :  { %2663 = vmatpush.bf16.msrb.mxu2 %v3779_v25  ;;  %v3995_v25 = vor.u32 %v5168_v18, %v3994_v17  ;;  %v4059_v28 = vor.u32 %v5184_v21, %v4058_v20  ;;  %v4106_v50 = vld [vmem:[%s8149_s1 + $0x590] sm:$0xf]  ;;  %v5196_v51 = vld [vmem:[%s8149_s1 + $0x594] sm:$0xf0]  ;;  %v5178_v59 = vld [vmem:[%s8149_s1 + $0x504] sm:$0xf0]  ;;  %v4043_v0 = vor.u32 %v5180_v47, %v4042_v46 }
  0x43   :  { %2677 = vmatpush.bf16.msrb.mxu3 %v3843_v35  ;;  %2636 = vmatmul.bf16.vlgmr.msrb.gmra.mxu0 %v5909_v36  ;;  %v4114_v35 = vld [vmem:[%s8149_s1 + $0x5a0] sm:$0xf]  ;;  %v4218_v61 = vld [vmem:[%s8149_s1 + $0x670] sm:$0xf]  ;;  %v5256_v4 = vld [vmem:[%s8149_s1 + $0x774] sm:$0xf0] }
  0x44   :  { %2684 = vmatpush.bf16.msra.mxu0 %v3963_v26  ;;  %2650 = vmatmul.bf16.vlgmr.msrb.gmra.mxu1 %v5928_v44  ;;  %v3922_v26 = vld [vmem:[%s8149_s1 + $0x420] sm:$0xf]  ;;  %v4282_v63 = vld [vmem:[%s8149_s1 + $0x6f0] sm:$0xf]  ;;  %v5194_v7 = vld [vmem:[%s8149_s1 + $0x584] sm:$0xf0] }
  0x45   :  { %2698 = vmatpush.bf16.msra.mxu1 %v4027_v30  ;;  %2664 = vmatmul.bf16.vlgmr.msrb.gmra.mxu2 %v5920_v40  ;;  %v5166_v30 = vld [vmem:[%s8149_s1 + $0x4a4] sm:$0xf0]  ;;  %v3923_v34 = vor.u32 %v5150_v27, %v3922_v26  ;;  %v4346_v3 = vld [vmem:[%s8149_s1 + $0x770] sm:$0xf]  ;;  %v4098_v6 = vld [vmem:[%s8149_s1 + $0x580] sm:$0xf] }
  0x46   :  { %2712 = vmatpush.bf16.msra.mxu2 %v4091_v31  ;;  %2678 = vmatmul.bf16.vlgmr.msrb.gmra.mxu3 %v5936_v48  ;;  %v4123_v31 = vor.u32 %v5200_v24, %v4122_v23  ;;  %v3987_v38 = vor.u32 %v5166_v30, %v3986_v29  ;;  %v5008_v11 = vld [vmem:[%s8150_s0 + $0x80] sm:$0xf0]  ;;  %v5009_v13 = vld [vmem:[%s8150_s0 + $0x88] sm:$0xf0]  ;;  %v4410_v17 = vld [vmem:[%s8149_s1 + $0x7f0] sm:$0xf]  ;;  %v4099_v26 = vor.u32 %v5194_v7, %v4098_v6 }
  0x47   :  { %2726 = vmatpush.bf16.msra.mxu3 %v4155_v41  ;;  %v5148_v41 = vld [vmem:[%s8149_s1 + $0x414] sm:$0xf0]  ;;  %v4997_v23 = vld [vmem:[%s8150_s0 + $0x2c] sm:$0xf]  ;;  %v3336_v24 = vld [vmem:[%s8150_s0 + $0x8c] sm:$0xf0] }
  0x48   :  { %2685 = vmatpush.bf16.msra.mxu0 %v3955_v45  ;;  %v5164_v45 = vld [vmem:[%s8149_s1 + $0x494] sm:$0xf0]  ;;  %v3915_v53 = vor.u32 %v5148_v41, %v3914_v39  ;;  %v4210_v27 = vld [vmem:[%s8149_s1 + $0x660] sm:$0xf]  ;;  %v5238_v32 = vld [vmem:[%s8149_s1 + $0x6e4] sm:$0xf0]  ;;  %v6164_v41 = vor.u32 %v4997_v23, %v3336_v24 }
  0x49   :  { %2699 = vmatpush.bf16.msra.mxu1 %v4019_v49  ;;  %v4115_v49 = vor.u32 %v5198_v37, %v4114_v35  ;;  %v3979_v57 = vor.u32 %v5164_v45, %v3978_v42  ;;  %v5272_v18 = vld [vmem:[%s8149_s1 + $0x7f4] sm:$0xf0]  ;;  %v4274_v29 = vld [vmem:[%s8149_s1 + $0x6e0] sm:$0xf]  ;;  %v5270_v39 = vld [vmem:[%s8149_s1 + $0x7e4] sm:$0xf0] }
  0x4a   :  { %2713 = vmatpush.bf16.msra.mxu2 %v4083_v52  ;;  %v3906_v52 = vld [vmem:[%s8149_s1 + $0x400] sm:$0xf]  ;;  %v4202_v46 = vld [vmem:[%s8149_s1 + $0x650] sm:$0xf]  ;;  %v5220_v47 = vld [vmem:[%s8149_s1 + $0x654] sm:$0xf0] }
  0x4b   :  { %2727 = vmatpush.bf16.msra.mxu3 %v4147_v55  ;;  %v3970_v55 = vld [vmem:[%s8149_s1 + $0x480] sm:$0xf]  ;;  %v3907_v10 = vor.u32 %v5146_v54, %v3906_v52  ;;  %v4330_v52 = vld [vmem:[%s8149_s1 + $0x750] sm:$0xf]  ;;  %v5214_v24 = vld [vmem:[%s8149_s1 + $0x624] sm:$0xf0] }
  0x4c   :  { %2686 = vmatpush.bf16.msra.mxu0 %v3947_v58  ;;  %v4034_v58 = vld [vmem:[%s8149_s1 + $0x500] sm:$0xf]  ;;  %v3971_v15 = vor.u32 %v5162_v56, %v3970_v55  ;;  %v4394_v54 = vld [vmem:[%s8149_s1 + $0x7d0] sm:$0xf]  ;;  %v5268_v55 = vld [vmem:[%s8149_s1 + $0x7d4] sm:$0xf0]  ;;  %v4203_v56 = vor.u32 %v5220_v47, %v4202_v46 }
  0x4d   :  { %2700 = vmatpush.bf16.msra.mxu1 %v4011_v62  ;;  %v5224_v62 = vld [vmem:[%s8149_s1 + $0x674] sm:$0xf0]  ;;  %v4035_v20 = vor.u32 %v5178_v59, %v4034_v58  ;;  %v4338_v33 = vld [vmem:[%s8149_s1 + $0x760] sm:$0xf]  ;;  %v4298_v47 = vld [vmem:[%s8149_s1 + $0x710] sm:$0xf] }
  0x4e   :  { %2714 = vmatpush.bf16.msra.mxu2 %v4075_v1  ;;  %v5240_v1 = vld [vmem:[%s8149_s1 + $0x6f4] sm:$0xf0]  ;;  %v4194_v59 = vld [vmem:[%s8149_s1 + $0x640] sm:$0xf] }
  0x4f   :  { %2728 = vmatpush.bf16.msra.mxu3 %v4139_v5  ;;  %v4107_v5 = vor.u32 %v5196_v51, %v4106_v50  ;;  %v4283_v21 = vor.u32 %v5240_v1, %v4282_v63  ;;  %v5236_v51 = vld [vmem:[%s8149_s1 + $0x6d4] sm:$0xf0]  ;;  %v4395_v63 = vor.u32 %v5268_v55, %v4394_v54  ;;  %v4322_v1 = vld [vmem:[%s8149_s1 + $0x740] sm:$0xf] }
  0x50   :  { %2687 = vmatpush.bf16.msra.mxu0 %v3939_v9  ;;  %v3326_v9 = vld [vmem:[%s8150_s0 + $0x20] sm:$0xf] }
  0x51   :  { %2701 = vmatpush.bf16.msra.mxu1 %v4003_v12  ;;  %v3334_v12 = vld [vmem:[%s8150_s0 + $0x28] sm:$0xf]  ;;  %v6143_v30 = vor.u32 %v5008_v11, %v3326_v9  ;;  %v5216_v11 = vld [vmem:[%s8149_s1 + $0x634] sm:$0xf0]  ;;  %v4178_v23 = vld [vmem:[%s8149_s1 + $0x620] sm:$0xf] }
  0x52   :  { %2715 = vmatpush.bf16.msra.mxu2 %v4067_v16  ;;  %v4219_v16 = vor.u32 %v5224_v62, %v4218_v61  ;;  %v6154_v35 = vor.u32 %v5009_v13, %v3334_v12  ;;  %v5218_v61 = vld [vmem:[%s8149_s1 + $0x644] sm:$0xf0]  ;;  %v4258_v62 = vld [vmem:[%s8149_s1 + $0x6c0] sm:$0xf]  ;;  %v4250_v12 = vld [vmem:[%s8149_s1 + $0x6b0] sm:$0xf] }
  0x53   :  { %2729 = vmatpush.bf16.msra.mxu3 %v4131_v19  ;;  %v4996_v19 = vld [vmem:[%s8150_s0 + $0x24] sm:$0xf]  ;;  %v4195_v6 = vor.u32 %v5218_v61, %v4194_v59  ;;  %v4226_v55 = vld [vmem:[%s8149_s1 + $0x680] sm:$0xf] }
  0x54   :  { %2688 = vmatpush.bf16.msra.mxu0 %v3931_v22  ;;  %v3328_v22 = vld [vmem:[%s8150_s0 + $0x84] sm:$0xf0] }
  0x55   :  { %2702 = vmatpush.bf16.msra.mxu1 %v3995_v25  ;;  %v4347_v25 = vor.u32 %v5256_v4, %v4346_v3  ;;  %v6156_v37 = vor.u32 %v4996_v19, %v3328_v22  ;;  %v5250_v3 = vld [vmem:[%s8149_s1 + $0x744] sm:$0xf0]  ;;  %v4386_v4 = vld [vmem:[%s8149_s1 + $0x7c0] sm:$0xf]  ;;  %v5264_v19 = vld [vmem:[%s8149_s1 + $0x7b4] sm:$0xf0] }
  0x56   :  { %2716 = vmatpush.bf16.msra.mxu2 %v4059_v28  ;;  %v5222_v28 = vld [vmem:[%s8149_s1 + $0x664] sm:$0xf0]  ;;  %v4323_v9 = vor.u32 %v5250_v3, %v4322_v1  ;;  %v5304_v3 = vld [vmem:[%s8149_s1 + $0x8f4] sm:$0xf0] }
  0x57   :  { %2730 = vmatpush.bf16.msra.mxu3 %v4123_v31  ;;  %v4411_v31 = vor.u32 %v5272_v18, %v4410_v17  ;;  %v4211_v42 = vor.u32 %v5222_v28, %v4210_v27  ;;  %v5248_v17 = vld [vmem:[%s8149_s1 + $0x734] sm:$0xf0]  ;;  %v4378_v18 = vld [vmem:[%s8149_s1 + $0x7b0] sm:$0xf]  ;;  %v5230_v27 = vld [vmem:[%s8149_s1 + $0x6a4] sm:$0xf0] }
  0x58   :  { %2689 = vmatpush.bf16.msra.mxu0 %v3923_v34  ;;  %v5254_v34 = vld [vmem:[%s8149_s1 + $0x764] sm:$0xf0]  ;;  %v4306_v28 = vld [vmem:[%s8149_s1 + $0x720] sm:$0xf] }
  0x59   :  { %2703 = vmatpush.bf16.msra.mxu1 %v3987_v38  ;;  %v4402_v38 = vld [vmem:[%s8149_s1 + $0x7e0] sm:$0xf]  ;;  %v4339_v45 = vor.u32 %v5254_v34, %v4338_v33  ;;  %v4179_v33 = vor.u32 %v5214_v24, %v4178_v23  ;;  %v4170_v34 = vld [vmem:[%s8149_s1 + $0x610] sm:$0xf]  ;;  %v4999_v23 = vld [vmem:[%s8150_s0 + $0x3c] sm:$0xf] }
  0x5a   :  { %2717 = vmatpush.bf16.msra.mxu2 %v4051_v43  ;;  %v4275_v43 = vor.u32 %v5238_v32, %v4274_v29  ;;  %v4403_v50 = vor.u32 %v5270_v39, %v4402_v38  ;;  %v5246_v29 = vld [vmem:[%s8149_s1 + $0x724] sm:$0xf0]  ;;  %v3352_v24 = vld [vmem:[%s8150_s0 + $0x9c] sm:$0xf0] }
  0x5b   :  { %2731 = vmatpush.bf16.msra.mxu3 %v4115_v49  ;;  %v4266_v49 = vld [vmem:[%s8149_s1 + $0x6d0] sm:$0xf]  ;;  %v5262_v32 = vld [vmem:[%s8149_s1 + $0x7a4] sm:$0xf0]  ;;  %v4307_v39 = vor.u32 %v5246_v29, %v4306_v28  ;;  %v4530_v29 = vld [vmem:[%s8149_s1 + $0x8e0] sm:$0xf] }
  0x5c   :  { %2690 = vmatpush.bf16.msra.mxu0 %v3915_v53  ;;  %v5252_v53 = vld [vmem:[%s8149_s1 + $0x754] sm:$0xf0]  ;;  %v5286_v28 = vld [vmem:[%s8149_s1 + $0x864] sm:$0xf0] }
  0x5d   :  { %2704 = vmatpush.bf16.msra.mxu1 %v3979_v57  ;;  %v4267_v57 = vor.u32 %v5236_v51, %v4266_v49  ;;  %v4331_v58 = vor.u32 %v5252_v53, %v4330_v52  ;;  %v5244_v49 = vld [vmem:[%s8149_s1 + $0x714] sm:$0xf0]  ;;  %v4162_v52 = vld [vmem:[%s8149_s1 + $0x600] sm:$0xf]  ;;  %v5210_v53 = vld [vmem:[%s8149_s1 + $0x604] sm:$0xf0] }
  0x5e   :  { %2718 = vmatpush.bf16.msra.mxu2 %v4043_v0  ;;  %v5234_v0 = vld [vmem:[%s8149_s1 + $0x6c4] sm:$0xf0]  ;;  %v5260_v51 = vld [vmem:[%s8149_s1 + $0x794] sm:$0xf0]  ;;  %v4299_v61 = vor.u32 %v5244_v49, %v4298_v47 }
  0x5f   :  { %2732 = vmatpush.bf16.msra.mxu3 %v4107_v5  ;;  %v5266_v5 = vld [vmem:[%s8149_s1 + $0x7c4] sm:$0xf0]  ;;  %v4259_v7 = vor.u32 %v5234_v0, %v4258_v62  ;;  %v4474_v62 = vld [vmem:[%s8149_s1 + $0x870] sm:$0xf] }
  0x60   :  { %2691 = vmatpush.bf16.msra.mxu0 %v3907_v10  ;;  %v4186_v10 = vld [vmem:[%s8149_s1 + $0x630] sm:$0xf]  ;;  %v4387_v13 = vor.u32 %v5266_v5, %v4386_v4  ;;  %v5320_v5 = vld [vmem:[%s8149_s1 + $0x974] sm:$0xf0]  ;;  %v5334_v47 = vld [vmem:[%s8149_s1 + $0x9e4] sm:$0xf0] }
  0x61   :  { %2705 = vmatpush.bf16.msra.mxu1 %v3971_v15  ;;  %v5232_v15 = vld [vmem:[%s8149_s1 + $0x6b4] sm:$0xf0]  ;;  %v4538_v0 = vld [vmem:[%s8149_s1 + $0x8f0] sm:$0xf] }
  0x62   :  { %2719 = vmatpush.bf16.msra.mxu2 %v4035_v20  ;;  %v4187_v20 = vor.u32 %v5216_v11, %v4186_v10  ;;  %v4602_v4 = vld [vmem:[%s8149_s1 + $0x970] sm:$0xf]  ;;  %v4163_v10 = vor.u32 %v5210_v53, %v4162_v52  ;;  %v5010_v11 = vld [vmem:[%s8150_s0 + $0x90] sm:$0xf0]  ;;  %v5284_v52 = vld [vmem:[%s8149_s1 + $0x854] sm:$0xf0] }
  0x63   :  { %2733 = vmatpush.bf16.msra.mxu3 %v4099_v26  ;;  %2692 = vmatmul.bf16.vlgmr.msra.gmra.mxu0 %v6143_v30  ;;  %v4379_v26 = vor.u32 %v5264_v19, %v4378_v18  ;;  %v5336_v18 = vld [vmem:[%s8149_s1 + $0x9f4] sm:$0xf0]  ;;  %v4998_v19 = vld [vmem:[%s8150_s0 + $0x34] sm:$0xf]  ;;  %v4522_v53 = vld [vmem:[%s8149_s1 + $0x8d0] sm:$0xf] }
  0x64   :  { %2740 = vmatpush.bf16.msrb.mxu0 %v4219_v16  ;;  %2706 = vmatmul.bf16.vlgmr.msra.gmra.mxu1 %v6156_v37  ;;  %v4314_v16 = vld [vmem:[%s8149_s1 + $0x730] sm:$0xf] }
  0x65   :  { %2754 = vmatpush.bf16.msrb.mxu1 %v4283_v21  ;;  %2720 = vmatmul.bf16.vlgmr.msra.gmra.mxu2 %v6154_v35  ;;  %v4251_v21 = vor.u32 %v5232_v15, %v4250_v12  ;;  %v4315_v22 = vor.u32 %v5248_v17, %v4314_v16  ;;  %v3350_v12 = vld [vmem:[%s8150_s0 + $0x38] sm:$0xf]  ;;  %v4666_v17 = vld [vmem:[%s8149_s1 + $0x9f0] sm:$0xf] }
  0x66   :  { %2768 = vmatpush.bf16.msrb.mxu2 %v4347_v25  ;;  %2734 = vmatmul.bf16.vlgmr.msra.gmra.mxu3 %v6164_v41  ;;  %v4242_v25 = vld [vmem:[%s8149_s1 + $0x6a0] sm:$0xf] }
  0x67   :  { %2782 = vmatpush.bf16.msrb.mxu3 %v4411_v31  ;;  %v4370_v31 = vld [vmem:[%s8149_s1 + $0x7a0] sm:$0xf]  ;;  %v4243_v38 = vor.u32 %v5230_v27, %v4242_v25  ;;  %v4603_v25 = vor.u32 %v5320_v5, %v4602_v4  ;;  %v5298_v4 = vld [vmem:[%s8149_s1 + $0x8c4] sm:$0xf0] }
  0x68   :  { %2741 = vmatpush.bf16.msrb.mxu0 %v4211_v42  ;;  %v5212_v42 = vld [vmem:[%s8149_s1 + $0x614] sm:$0xf0]  ;;  %v4371_v46 = vor.u32 %v5262_v32, %v4370_v31  ;;  %v4466_v27 = vld [vmem:[%s8149_s1 + $0x860] sm:$0xf] }
  0x69   :  { %2755 = vmatpush.bf16.msrb.mxu1 %v4275_v43  ;;  %v4234_v43 = vld [vmem:[%s8149_s1 + $0x690] sm:$0xf]  ;;  %v4171_v54 = vor.u32 %v5212_v42, %v4170_v34  ;;  %v4594_v34 = vld [vmem:[%s8149_s1 + $0x960] sm:$0xf] }
  0x6a   :  { %2769 = vmatpush.bf16.msrb.mxu2 %v4339_v45  ;;  %v5228_v45 = vld [vmem:[%s8149_s1 + $0x694] sm:$0xf0]  ;;  %v4578_v5 = vld [vmem:[%s8149_s1 + $0x940] sm:$0xf] }
  0x6b   :  { %2783 = vmatpush.bf16.msrb.mxu3 %v4403_v50  ;;  %v4362_v50 = vld [vmem:[%s8149_s1 + $0x790] sm:$0xf]  ;;  %v4235_v59 = vor.u32 %v5228_v45, %v4234_v43  ;;  %v6386_v43 = vor.u32 %v4999_v23, %v3352_v24  ;;  %v4467_v45 = vor.u32 %v5286_v28, %v4466_v27  ;;  %v5328_v24 = vld [vmem:[%s8149_s1 + $0x9b4] sm:$0xf0]  ;;  %v4434_v27 = vld [vmem:[%s8149_s1 + $0x820] sm:$0xf] }
  0x6c   :  { %2742 = vmatpush.bf16.msrb.mxu0 %v4203_v56  ;;  %v5226_v56 = vld [vmem:[%s8149_s1 + $0x684] sm:$0xf0]  ;;  %v4363_v1 = vor.u32 %v5260_v51, %v4362_v50  ;;  %v4458_v51 = vld [vmem:[%s8149_s1 + $0x850] sm:$0xf] }
  0x6d   :  { %2756 = vmatpush.bf16.msrb.mxu1 %v4267_v57  ;;  %v4290_v57 = vld [vmem:[%s8149_s1 + $0x700] sm:$0xf]  ;;  %v4227_v15 = vor.u32 %v5226_v56, %v4226_v55  ;;  %v4586_v55 = vld [vmem:[%s8149_s1 + $0x950] sm:$0xf]  ;;  %v5316_v56 = vld [vmem:[%s8149_s1 + $0x954] sm:$0xf0] }
  0x6e   :  { %2770 = vmatpush.bf16.msrb.mxu2 %v4331_v58  ;;  %v5242_v58 = vld [vmem:[%s8149_s1 + $0x704] sm:$0xf0]  ;;  %v4634_v23 = vld [vmem:[%s8149_s1 + $0x9b0] sm:$0xf] }
  0x6f   :  { %2784 = vmatpush.bf16.msrb.mxu3 %v4395_v63  ;;  %v5288_v63 = vld [vmem:[%s8149_s1 + $0x874] sm:$0xf0]  ;;  %v4291_v16 = vor.u32 %v5242_v58, %v4290_v57  ;;  %v4459_v58 = vor.u32 %v5284_v52, %v4458_v51  ;;  %v5278_v28 = vld [vmem:[%s8149_s1 + $0x824] sm:$0xf0] }
  0x70   :  { %2743 = vmatpush.bf16.msrb.mxu0 %v4195_v6  ;;  %v4354_v6 = vld [vmem:[%s8149_s1 + $0x780] sm:$0xf]  ;;  %v5276_v52 = vld [vmem:[%s8149_s1 + $0x814] sm:$0xf0] }
  0x71   :  { %2757 = vmatpush.bf16.msrb.mxu1 %v4259_v7  ;;  %v5258_v7 = vld [vmem:[%s8149_s1 + $0x784] sm:$0xf0] }
  0x72   :  { %2771 = vmatpush.bf16.msrb.mxu2 %v4323_v9  ;;  %v3342_v9 = vld [vmem:[%s8150_s0 + $0x30] sm:$0xf] }
  0x73   :  { %2785 = vmatpush.bf16.msrb.mxu3 %v4387_v13  ;;  %v5011_v13 = vld [vmem:[%s8150_s0 + $0x98] sm:$0xf0]  ;;  %v6371_v31 = vor.u32 %v5010_v11, %v3342_v9  ;;  %v5330_v11 = vld [vmem:[%s8149_s1 + $0x9c4] sm:$0xf0] }
  0x74   :  { %2744 = vmatpush.bf16.msrb.mxu0 %v4187_v20  ;;  %v4475_v20 = vor.u32 %v5288_v63, %v4474_v62  ;;  %v6373_v32 = vor.u32 %v5011_v13, %v3350_v12  ;;  %v4587_v63 = vor.u32 %v5316_v56, %v4586_v55  ;;  %v4554_v55 = vld [vmem:[%s8149_s1 + $0x910] sm:$0xf]  ;;  %v5308_v56 = vld [vmem:[%s8149_s1 + $0x914] sm:$0xf0] }
  0x75   :  { %2758 = vmatpush.bf16.msrb.mxu1 %v4251_v21  ;;  %v4539_v21 = vor.u32 %v5304_v3, %v4538_v0  ;;  %v4450_v0 = vld [vmem:[%s8149_s1 + $0x840] sm:$0xf] }
  0x76   :  { %2772 = vmatpush.bf16.msrb.mxu2 %v4315_v22  ;;  %v3344_v22 = vld [vmem:[%s8150_s0 + $0x94] sm:$0xf0]  ;;  %v4514_v3 = vld [vmem:[%s8149_s1 + $0x8c0] sm:$0xf] }
  0x77   :  { %2786 = vmatpush.bf16.msrb.mxu3 %v4379_v26  ;;  %v4355_v26 = vor.u32 %v5258_v7, %v4354_v6  ;;  %v6384_v42 = vor.u32 %v4998_v19, %v3344_v22  ;;  %v5314_v6 = vld [vmem:[%s8149_s1 + $0x944] sm:$0xf0]  ;;  %v4515_v12 = vor.u32 %v5298_v4, %v4514_v3  ;;  %v4570_v19 = vld [vmem:[%s8149_s1 + $0x930] sm:$0xf]  ;;  %v4546_v3 = vld [vmem:[%s8149_s1 + $0x900] sm:$0xf] }
  0x78   :  { %2745 = vmatpush.bf16.msrb.mxu0 %v4179_v33  ;;  %v5302_v33 = vld [vmem:[%s8149_s1 + $0x8e4] sm:$0xf0]  ;;  %v4579_v13 = vor.u32 %v5314_v6, %v4578_v5  ;;  %v4555_v6 = vor.u32 %v5308_v56, %v4554_v55 }
  0x79   :  { %2759 = vmatpush.bf16.msrb.mxu1 %v4243_v38  ;;  %v5318_v38 = vld [vmem:[%s8149_s1 + $0x964] sm:$0xf0]  ;;  %v4531_v49 = vor.u32 %v5302_v33, %v4530_v29  ;;  %v4498_v29 = vld [vmem:[%s8149_s1 + $0x8a0] sm:$0xf] }
  0x7a   :  { %2773 = vmatpush.bf16.msrb.mxu2 %v4307_v39  ;;  %v4667_v39 = vor.u32 %v5336_v18, %v4666_v17  ;;  %v4595_v50 = vor.u32 %v5318_v38, %v4594_v34  ;;  %v4506_v17 = vld [vmem:[%s8149_s1 + $0x8b0] sm:$0xf]  ;;  %v5296_v18 = vld [vmem:[%s8149_s1 + $0x8b4] sm:$0xf0]  ;;  %v5294_v33 = vld [vmem:[%s8149_s1 + $0x8a4] sm:$0xf0] }
  0x7b   :  { %2787 = vmatpush.bf16.msrb.mxu3 %v4371_v46  ;;  %v4658_v46 = vld [vmem:[%s8149_s1 + $0x9e0] sm:$0xf]  ;;  %v5310_v38 = vld [vmem:[%s8149_s1 + $0x924] sm:$0xf0] }
  0x7c   :  { %2746 = vmatpush.bf16.msrb.mxu0 %v4171_v54  ;;  %v5300_v54 = vld [vmem:[%s8149_s1 + $0x8d4] sm:$0xf0]  ;;  %v4659_v57 = vor.u32 %v5334_v47, %v4658_v46  ;;  %v4562_v34 = vld [vmem:[%s8149_s1 + $0x920] sm:$0xf]  ;;  %v5326_v47 = vld [vmem:[%s8149_s1 + $0x9a4] sm:$0xf0] }
  0x7d   :  { %2760 = vmatpush.bf16.msrb.mxu1 %v4235_v59  ;;  %v4650_v59 = vld [vmem:[%s8149_s1 + $0x9d0] sm:$0xf]  ;;  %v4523_v62 = vor.u32 %v5300_v54, %v4522_v53  ;;  %v4626_v46 = vld [vmem:[%s8149_s1 + $0x9a0] sm:$0xf]  ;;  %v4563_v51 = vor.u32 %v5310_v38, %v4562_v34  ;;  %v5292_v54 = vld [vmem:[%s8149_s1 + $0x894] sm:$0xf0] }
  0x7e   :  { %2774 = vmatpush.bf16.msrb.mxu2 %v4299_v61  ;;  %v5332_v61 = vld [vmem:[%s8149_s1 + $0x9d4] sm:$0xf0]  ;;  %v4490_v53 = vld [vmem:[%s8149_s1 + $0x890] sm:$0xf]  ;;  %v5306_v4 = vld [vmem:[%s8149_s1 + $0x904] sm:$0xf0] }
  0x7f   :  { %2788 = vmatpush.bf16.msrb.mxu3 %v4363_v1  ;;  %v5282_v1 = vld [vmem:[%s8149_s1 + $0x844] sm:$0xf0]  ;;  %v4651_v7 = vor.u32 %v5332_v61, %v4650_v59  ;;  %v5324_v59 = vld [vmem:[%s8149_s1 + $0x994] sm:$0xf0]  ;;  %v4418_v61 = vld [vmem:[%s8149_s1 + $0x800] sm:$0xf]  ;;  %v4491_v5 = vor.u32 %v5292_v54, %v4490_v53 }
  0x80   :  { %2747 = vmatpush.bf16.msrb.mxu0 %v4163_v10  ;;  %v4451_v9 = vor.u32 %v5282_v1, %v4450_v0  ;;  %v4642_v10 = vld [vmem:[%s8149_s1 + $0x9c0] sm:$0xf]  ;;  %v5290_v1 = vld [vmem:[%s8149_s1 + $0x884] sm:$0xf0]  ;;  %v5001_v34 = vld [vmem:[%s8150_s0 + $0x4c] sm:$0xf] }
  0x81   :  { %2761 = vmatpush.bf16.msrb.mxu1 %v4227_v15  ;;  %v4442_v15 = vld [vmem:[%s8149_s1 + $0x830] sm:$0xf]  ;;  %v4482_v0 = vld [vmem:[%s8149_s1 + $0x880] sm:$0xf]  ;;  %v5382_v54 = vld [vmem:[%s8149_s1 + $0xb64] sm:$0xf0] }
  0x82   :  { %2775 = vmatpush.bf16.msrb.mxu2 %v4291_v16  ;;  %v5280_v16 = vld [vmem:[%s8149_s1 + $0x834] sm:$0xf0]  ;;  %v3368_v38 = vld [vmem:[%s8150_s0 + $0xac] sm:$0xf0]  ;;  %v4850_v53 = vld [vmem:[%s8149_s1 + $0xb60] sm:$0xf] }
  0x83   :  { %2789 = vmatpush.bf16.msrb.mxu3 %v4355_v26  ;;  %2748 = vmatmul.bf16.vlgmr.msrb.gmra.mxu0 %v6371_v31  ;;  %v4443_v22 = vor.u32 %v5280_v16, %v4442_v15  ;;  %v4610_v16 = vld [vmem:[%s8149_s1 + $0x980] sm:$0xf] }
  0x84   :  { %2796 = vmatpush.bf16.msra.mxu0 %v4475_v20  ;;  %2762 = vmatmul.bf16.vlgmr.msrb.gmra.mxu1 %v6384_v42  ;;  %v5312_v20 = vld [vmem:[%s8149_s1 + $0x934] sm:$0xf0] }
  0x85   :  { %2810 = vmatpush.bf16.msra.mxu1 %v4539_v21  ;;  %2776 = vmatmul.bf16.vlgmr.msrb.gmra.mxu2 %v6373_v32  ;;  %v4643_v21 = vor.u32 %v5330_v11, %v4642_v10  ;;  %v4571_v26 = vor.u32 %v5312_v20, %v4570_v19  ;;  %v4794_v10 = vld [vmem:[%s8149_s1 + $0xaf0] sm:$0xf]  ;;  %v5368_v11 = vld [vmem:[%s8149_s1 + $0xaf4] sm:$0xf0]  ;;  %v5012_v20 = vld [vmem:[%s8150_s0 + $0xa0] sm:$0xf0] }
  0x86   :  { %2824 = vmatpush.bf16.msra.mxu2 %v4603_v25  ;;  %2790 = vmatmul.bf16.vlgmr.msrb.gmra.mxu3 %v6386_v43  ;;  %v4507_v25 = vor.u32 %v5296_v18, %v4506_v17  ;;  %v5322_v17 = vld [vmem:[%s8149_s1 + $0x984] sm:$0xf0]  ;;  %v3358_v18 = vld [vmem:[%s8150_s0 + $0x40] sm:$0xf] }
  0x87   :  { %2838 = vmatpush.bf16.msra.mxu3 %v4667_v39  ;;  %v4635_v39 = vor.u32 %v5328_v24, %v4634_v23  ;;  %v4483_v23 = vor.u32 %v5290_v1, %v4482_v0  ;;  %v4547_v24 = vor.u32 %v5306_v4, %v4546_v3  ;;  %v4851_v0 = vor.u32 %v5382_v54, %v4850_v53  ;;  %v5348_v1 = vld [vmem:[%s8149_s1 + $0xa54] sm:$0xf0]  ;;  %v4778_v3 = vld [vmem:[%s8149_s1 + $0xad0] sm:$0xf] }
  0x88   :  { %2797 = vmatpush.bf16.msra.mxu0 %v4467_v45  ;;  %v4435_v45 = vor.u32 %v5278_v28, %v4434_v27  ;;  %v5000_v27 = vld [vmem:[%s8150_s0 + $0x44] sm:$0xf]  ;;  %v5364_v4 = vld [vmem:[%s8149_s1 + $0xad4] sm:$0xf0]  ;;  %v4890_v54 = vld [vmem:[%s8149_s1 + $0xbb0] sm:$0xf] }
  0x89   :  { %2811 = vmatpush.bf16.msra.mxu1 %v4531_v49  ;;  %v4426_v49 = vld [vmem:[%s8149_s1 + $0x810] sm:$0xf] }
  0x8a   :  { %2825 = vmatpush.bf16.msra.mxu2 %v4595_v50  ;;  %v4499_v50 = vor.u32 %v5294_v33, %v4498_v29  ;;  %v4795_v29 = vor.u32 %v5368_v11, %v4794_v10  ;;  %v3360_v33 = vld [vmem:[%s8150_s0 + $0xa4] sm:$0xf0]  ;;  %v4906_v11 = vld [vmem:[%s8149_s1 + $0xbd0] sm:$0xf] }
  0x8b   :  { %2839 = vmatpush.bf16.msra.mxu3 %v4659_v57  ;;  %v4618_v57 = vld [vmem:[%s8149_s1 + $0x990] sm:$0xf]  ;;  %v6612_v56 = vor.u32 %v5000_v27, %v3360_v33 }
  0x8c   :  { %2798 = vmatpush.bf16.msra.mxu0 %v4459_v58  ;;  %v4627_v58 = vor.u32 %v5326_v47, %v4626_v46  ;;  %v4619_v15 = vor.u32 %v5324_v59, %v4618_v57  ;;  %v4722_v46 = vld [vmem:[%s8149_s1 + $0xa60] sm:$0xf]  ;;  %v5350_v47 = vld [vmem:[%s8149_s1 + $0xa64] sm:$0xf0]  ;;  %v6614_v57 = vor.u32 %v5001_v34, %v3368_v38  ;;  %v4698_v33 = vld [vmem:[%s8149_s1 + $0xa30] sm:$0xf] }
  0x8d   :  { %2812 = vmatpush.bf16.msra.mxu1 %v4523_v62  ;;  %v5274_v62 = vld [vmem:[%s8149_s1 + $0x804] sm:$0xf0]  ;;  %v4914_v59 = vld [vmem:[%s8149_s1 + $0xbe0] sm:$0xf]  ;;  %v5344_v34 = vld [vmem:[%s8149_s1 + $0xa34] sm:$0xf0] }
  0x8e   :  { %2826 = vmatpush.bf16.msra.mxu2 %v4587_v63  ;;  %v4427_v63 = vor.u32 %v5276_v52, %v4426_v49  ;;  %v4419_v19 = vor.u32 %v5274_v62, %v4418_v61  ;;  %v4786_v49 = vld [vmem:[%s8149_s1 + $0xae0] sm:$0xf]  ;;  %v5366_v52 = vld [vmem:[%s8149_s1 + $0xae4] sm:$0xf0]  ;;  %v4714_v62 = vld [vmem:[%s8149_s1 + $0xa50] sm:$0xf]  ;;  %v4699_v53 = vor.u32 %v5344_v34, %v4698_v33 }
  0x8f   :  { %2840 = vmatpush.bf16.msra.mxu3 %v4651_v7  ;;  %v4730_v7 = vld [vmem:[%s8149_s1 + $0xa70] sm:$0xf]  ;;  %v5398_v61 = vld [vmem:[%s8149_s1 + $0xbe4] sm:$0xf0]  ;;  %v4715_v10 = vor.u32 %v5348_v1, %v4714_v62  ;;  %v4690_v62 = vld [vmem:[%s8149_s1 + $0xa20] sm:$0xf] }
  0x90   :  { %2799 = vmatpush.bf16.msra.mxu0 %v4451_v9  ;;  %v5352_v9 = vld [vmem:[%s8149_s1 + $0xa74] sm:$0xf0]  ;;  %v4762_v38 = vld [vmem:[%s8149_s1 + $0xab0] sm:$0xf]  ;;  %v5358_v1 = vld [vmem:[%s8149_s1 + $0xaa4] sm:$0xf0] }
  0x91   :  { %2813 = vmatpush.bf16.msra.mxu1 %v4515_v12  ;;  %v4858_v12 = vld [vmem:[%s8149_s1 + $0xb70] sm:$0xf]  ;;  %v4731_v28 = vor.u32 %v5352_v9, %v4730_v7  ;;  %v6645_v7 = vld [vmem:[%s8151_s2] sm:$0x3]  ;;  %v4915_v9 = vor.u32 %v5398_v61, %v4914_v59 }
  0x92   :  { %2827 = vmatpush.bf16.msra.mxu2 %v4579_v13  ;;  %v5384_v13 = vld [vmem:[%s8149_s1 + $0xb74] sm:$0xf0]  ;;  %v4738_v34 = vld [vmem:[%s8149_s1 + $0xa80] sm:$0xf] }
  0x93   :  { %2841 = vmatpush.bf16.msra.mxu3 %v4643_v21  ;;  %v3366_v21 = vld [vmem:[%s8150_s0 + $0x48] sm:$0xf] }
  0x94   :  { %2800 = vmatpush.bf16.msra.mxu0 %v4443_v22  ;;  %v5013_v22 = vld [vmem:[%s8150_s0 + $0xa8] sm:$0xf0] }
  0x95   :  { %2814 = vmatpush.bf16.msra.mxu1 %v4507_v25  ;;  %v4922_v25 = vld [vmem:[%s8149_s1 + $0xbf0] sm:$0xf] }
  0x96   :  { %2828 = vmatpush.bf16.msra.mxu2 %v4571_v26  ;;  %v5400_v26 = vld [vmem:[%s8149_s1 + $0xbf4] sm:$0xf0] }
  0x97   :  { %2842 = vmatpush.bf16.msra.mxu3 %v4635_v39  ;;  %v4859_v39 = vor.u32 %v5384_v13, %v4858_v12  ;;  %v4923_v55 = vor.u32 %v5400_v26, %v4922_v25  ;;  %v5396_v12 = vld [vmem:[%s8149_s1 + $0xbd4] sm:$0xf0]  ;;  %v4706_v13 = vld [vmem:[%s8149_s1 + $0xa40] sm:$0xf]  ;;  %v5394_v26 = vld [vmem:[%s8149_s1 + $0xbc4] sm:$0xf0] }
  0x98   :  { %2801 = vmatpush.bf16.msra.mxu0 %v4435_v45  ;;  %v4611_v45 = vor.u32 %v5322_v17, %v4610_v16  ;;  %v5346_v17 = vld [vmem:[%s8149_s1 + $0xa44] sm:$0xf0]  ;;  %v4898_v25 = vld [vmem:[%s8149_s1 + $0xbc0] sm:$0xf] }
  0x99   :  { %2815 = vmatpush.bf16.msra.mxu1 %v4499_v50  ;;  %v6599_v50 = vor.u32 %v5012_v20, %v3358_v18  ;;  %v4770_v18 = vld [vmem:[%s8149_s1 + $0xac0] sm:$0xf]  ;;  %v5362_v20 = vld [vmem:[%s8149_s1 + $0xac4] sm:$0xf0] }
  0x9a   :  { %2829 = vmatpush.bf16.msra.mxu2 %v4563_v51  ;;  %v6601_v51 = vor.u32 %v5013_v22, %v3366_v21  ;;  %v4834_v21 = vld [vmem:[%s8149_s1 + $0xb40] sm:$0xf]  ;;  %v5378_v22 = vld [vmem:[%s8149_s1 + $0xb44] sm:$0xf0] }
  0x9b   :  { %2843 = vmatpush.bf16.msra.mxu3 %v4627_v58  ;;  %v4723_v58 = vor.u32 %v5350_v47, %v4722_v46  ;;  %v4826_v46 = vld [vmem:[%s8149_s1 + $0xb30] sm:$0xf]  ;;  %v5376_v47 = vld [vmem:[%s8149_s1 + $0xb34] sm:$0xf0] }
  0x9c   :  { %2802 = vmatpush.bf16.msra.mxu0 %v4427_v63  ;;  %v4787_v63 = vor.u32 %v5366_v52, %v4786_v49  ;;  %v4899_v49 = vor.u32 %v5394_v26, %v4898_v25  ;;  %v4827_v61 = vor.u32 %v5376_v47, %v4826_v46  ;;  %v5388_v26 = vld [vmem:[%s8149_s1 + $0xb94] sm:$0xf0] }
  0x9d   :  { %2816 = vmatpush.bf16.msra.mxu1 %v4491_v5  ;;  %v4842_v5 = vld [vmem:[%s8149_s1 + $0xb50] sm:$0xf] }
  0x9e   :  { %2830 = vmatpush.bf16.msra.mxu2 %v4555_v6  ;;  %v5380_v6 = vld [vmem:[%s8149_s1 + $0xb54] sm:$0xf0] }
  0x9f   :  { %2844 = vmatpush.bf16.msra.mxu3 %v4619_v15  ;;  %v4779_v15 = vor.u32 %v5364_v4, %v4778_v3  ;;  %v4843_v16 = vor.u32 %v5380_v6, %v4842_v5  ;;  %v4818_v3 = vld [vmem:[%s8149_s1 + $0xb20] sm:$0xf]  ;;  %v5374_v4 = vld [vmem:[%s8149_s1 + $0xb24] sm:$0xf0] }
  0xa0   :  { %2803 = vmatpush.bf16.msra.mxu0 %v4419_v19  ;;  %v442_v19 = vperm.slane %v6645_v7, 0  ;;  %v2581_v27 = vpop.f32.mrf.mxu0 }
  0xa1   :  { %2817 = vmatpush.bf16.msra.mxu1 %v4483_v23  ;;  %v4907_v23 = vor.u32 %v5396_v12, %v4906_v11  ;;  %v2595_v52 = vpop.f32.mrf.mxu1  ;;  %v4682_v11 = vld [vmem:[%s8149_s1 + $0xa10] sm:$0xf] }
  0xa2   :  { %2831 = vmatpush.bf16.msra.mxu2 %v4547_v24  ;;  %v4707_v24 = vor.u32 %v5346_v17, %v4706_v13  ;;  %v5340_v17 = vld [vmem:[%s8149_s1 + $0xa14] sm:$0xf0] }
  0xa3   :  { %2845 = vmatpush.bf16.msra.mxu3 %v4611_v45  ;;  %2804 = vmatmul.bf16.vlgmr.msra.gmra.mxu0 %v6599_v50  ;;  %v5360_v45 = vld [vmem:[%s8149_s1 + $0xab4] sm:$0xf0]  ;;  %v4683_v33 = vor.u32 %v5340_v17, %v4682_v11 }
  0xa4   :  { %2852 = vmatpush.bf16.msrb.mxu0 %v4731_v28  ;;  %2818 = vmatmul.bf16.vlgmr.msra.gmra.mxu1 %v6612_v56  ;;  %v4771_v28 = vor.u32 %v5362_v20, %v4770_v18  ;;  %v4763_v59 = vor.u32 %v5360_v45, %v4762_v38  ;;  %v4746_v18 = vld [vmem:[%s8149_s1 + $0xa90] sm:$0xf]  ;;  %v5356_v20 = vld [vmem:[%s8149_s1 + $0xa94] sm:$0xf0]  ;;  %v5354_v38 = vld [vmem:[%s8149_s1 + $0xa84] sm:$0xf0] }
  0xa5   :  { %2866 = vmatpush.bf16.msrb.mxu1 %v4795_v29  ;;  %2832 = vmatmul.bf16.vlgmr.msra.gmra.mxu2 %v6601_v51  ;;  %v4835_v29 = vor.u32 %v5378_v22, %v4834_v21  ;;  %v4810_v22 = vld [vmem:[%s8149_s1 + $0xb10] sm:$0xf]  ;;  %v5370_v45 = vld [vmem:[%s8149_s1 + $0xb04] sm:$0xf0] }
  0xa6   :  { %2880 = vmatpush.bf16.msrb.mxu2 %v4859_v39  ;;  %2846 = vmatmul.bf16.vlgmr.msra.gmra.mxu3 %v6614_v57  ;;  %v2582_v39 = vadd.f32 %v2581_v27, %v442_v19  ;;  %v5338_v27 = vld [vmem:[%s8149_s1 + $0xa04] sm:$0xf0] }
  0xa7   :  { %2894 = vmatpush.bf16.msrb.mxu3 %v4923_v55  ;;  %v5392_v55 = vld [vmem:[%s8149_s1 + $0xbb4] sm:$0xf0] }
  0xa8   :  { %2853 = vmatpush.bf16.msrb.mxu0 %v4723_v58  ;;  %v2596_v58 = vadd.f32 %v2595_v52, %v2582_v39  ;;  %v4891_v5 = vor.u32 %v5392_v55, %v4890_v54  ;;  %v2609_v6 = vpop.f32.mrf.mxu2  ;;  %v2583_v13 = vpop.f32.mrf.mxu0  ;;  %v4802_v39 = vld [vmem:[%s8149_s1 + $0xb00] sm:$0xf]  ;;  %v5416_v54 = vld [vmem:[%s8149_s1 + $0xc74] sm:$0xf0]  ;;  %v5031_v55 = vld [vmem:[%s8149_s1 + $0x74] sm:$0xf] }
  0xa9   :  { %2867 = vmatpush.bf16.msrb.mxu1 %v4787_v63  ;;  %v5342_v63 = vld [vmem:[%s8149_s1 + $0xa24] sm:$0xf0]  ;;  %v2584_v21 = vadd.f32 %v2583_v13, %v442_v19  ;;  %v4674_v19 = vld [vmem:[%s8149_s1 + $0xa00] sm:$0xf]  ;;  %v4803_v11 = vor.u32 %v5370_v45, %v4802_v39  ;;  %v3580_v13 = vld [vmem:[%s8149_s1 + $0x178] sm:$0xf0] }
  0xaa   :  { %2881 = vmatpush.bf16.msrb.mxu2 %v4851_v0  ;;  %v4754_v0 = vld [vmem:[%s8149_s1 + $0xaa0] sm:$0xf]  ;;  %v4691_v7 = vor.u32 %v5342_v63, %v4690_v62  ;;  %v2610_v12 = vadd.f32 %v2609_v6, %v2596_v58  ;;  %v3452_v58 = vld [vmem:[%s8149_s1 + $0x78] sm:$0xf0]  ;;  %v3382_v6 = vld [vmem:[%s8150_s0 + $0x58] sm:$0xf] }
  0xab   :  { %2895 = vmatpush.bf16.msrb.mxu3 %v4915_v9  ;;  %v4882_v9 = vld [vmem:[%s8149_s1 + $0xba0] sm:$0xf]  ;;  %v3455_v17 = vor.u32 %v5031_v55, %v3452_v58  ;;  %v4970_v58 = vld [vmem:[%s8149_s1 + $0xc50] sm:$0xf] }
  0xac   :  { %2854 = vmatpush.bf16.msrb.mxu0 %v4715_v10  ;;  %v5390_v10 = vld [vmem:[%s8149_s1 + $0xba4] sm:$0xf0]  ;;  %v4866_v63 = vld [vmem:[%s8149_s1 + $0xb80] sm:$0xf] }
  0xad   :  { %2868 = vmatpush.bf16.msrb.mxu1 %v4779_v15  ;;  %v4755_v15 = vor.u32 %v5358_v1, %v4754_v0  ;;  %v4883_v25 = vor.u32 %v5390_v10, %v4882_v9  ;;  %v5386_v0 = vld [vmem:[%s8149_s1 + $0xb84] sm:$0xf0]  ;;  %v3374_v1 = vld [vmem:[%s8150_s0 + $0x50] sm:$0xf]  ;;  %v4739_v10 = vor.u32 %v5354_v38, %v4738_v34  ;;  %v3508_v34 = vld [vmem:[%s8149_s1 + $0xe8] sm:$0xf0] }
  0xae   :  { %2882 = vmatpush.bf16.msrb.mxu2 %v4843_v16  ;;  %v4819_v16 = vor.u32 %v5374_v4, %v4818_v3  ;;  %v4675_v4 = vor.u32 %v5338_v27, %v4674_v19 }
  0xaf   :  { %2896 = vmatpush.bf16.msrb.mxu3 %v4907_v23  ;;  %v5372_v23 = vld [vmem:[%s8149_s1 + $0xb14] sm:$0xf0] }
  0xb0   :  { %2855 = vmatpush.bf16.msrb.mxu0 %v4707_v24  ;;  %v4874_v24 = vld [vmem:[%s8149_s1 + $0xb90] sm:$0xf]  ;;  %v4811_v52 = vor.u32 %v5372_v23, %v4810_v22  ;;  %v2611_v3 = vpop.f32.mrf.mxu2  ;;  %v4867_v23 = vor.u32 %v5386_v0, %v4866_v63  ;;  %v5043_v63 = vld [vmem:[%s8149_s1 + $0xd4] sm:$0xf]  ;;  %v3500_v0 = vld [vmem:[%s8149_s1 + $0xd8] sm:$0xf0] }
  0xb1   :  { %2869 = vmatpush.bf16.msrb.mxu1 %v4771_v28  ;;  %v2623_v28 = vpop.f32.mrf.mxu3  ;;  %v4875_v62 = vor.u32 %v5388_v26, %v4874_v24  ;;  %v4978_v24 = vld [vmem:[%s8149_s1 + $0xc60] sm:$0xf]  ;;  %v5029_v26 = vld [vmem:[%s8149_s1 + $0x64] sm:$0xf] }
  0xb2   :  { %2883 = vmatpush.bf16.msrb.mxu2 %v4835_v29  ;;  %v2597_v29 = vpop.f32.mrf.mxu1  ;;  %v6770_v46 = vadd.f32 %v2623_v28, %v2610_v12  ;;  %v5063_v12 = vld [vmem:[%s8149_s1 + $0x174] sm:$0xf] }
  0xb3   :  { %2897 = vmatpush.bf16.msrb.mxu3 %v4899_v49  ;;  %v2598_v47 = vadd.f32 %v2597_v29, %v2584_v21  ;;  %v4747_v49 = vor.u32 %v5356_v20, %v4746_v18  ;;  %v3376_v18 = vld [vmem:[%s8150_s0 + $0xb4] sm:$0xf0]  ;;  %v5003_v20 = vld [vmem:[%s8150_s0 + $0x5c] sm:$0xf]  ;;  %v3384_v21 = vld [vmem:[%s8150_s0 + $0xbc] sm:$0xf0]  ;;  %v3583_v39 = vor.u32 %v5063_v12, %v3580_v13 }
  0xb4   :  { %2856 = vmatpush.bf16.msrb.mxu0 %v4699_v53  ;;  %v4986_v53 = vld [vmem:[%s8149_s1 + $0xc70] sm:$0xf]  ;;  %v3444_v29 = vld [vmem:[%s8149_s1 + $0x68] sm:$0xf0]  ;;  %v5041_v13 = vld [vmem:[%s8149_s1 + $0xc4] sm:$0xf] }
  0xb5   :  { %2870 = vmatpush.bf16.msrb.mxu1 %v4763_v59  ;;  %v5047_v59 = vld [vmem:[%s8149_s1 + $0xf4] sm:$0xf]  ;;  %v2612_v9 = vadd.f32 %v2611_v3, %v2598_v47  ;;  %v6852_v47 = vor.u32 %v5003_v20, %v3384_v21  ;;  %v3428_v12 = vld [vmem:[%s8149_s1 + $0x48] sm:$0xf0]  ;;  %v5057_v21 = vld [vmem:[%s8149_s1 + $0x144] sm:$0xf] }
  0xb6   :  { %2884 = vmatpush.bf16.msrb.mxu2 %v4827_v61  ;;  %v3516_v61 = vld [vmem:[%s8149_s1 + $0xf8] sm:$0xf0] }
  0xb7   :  { %2898 = vmatpush.bf16.msrb.mxu3 %v4891_v5  ;;  %v5014_v5 = vld [vmem:[%s8150_s0 + $0xb0] sm:$0xf0]  ;;  %v3519_v22 = vor.u32 %v5047_v59, %v3516_v61  ;;  %v5412_v59 = vld [vmem:[%s8149_s1 + $0xc54] sm:$0xf0] }
  0xb8   :  { %2857 = vmatpush.bf16.msrb.mxu0 %v4691_v7  ;;  %v5015_v7 = vld [vmem:[%s8150_s0 + $0xb8] sm:$0xf0]  ;;  %v6835_v27 = vor.u32 %v5014_v5, %v3374_v1  ;;  %v5027_v61 = vld [vmem:[%s8149_s1 + $0x54] sm:$0xf]  ;;  %v4971_v3 = vor.u32 %v5412_v59, %v4970_v58  ;;  %v4946_v59 = vld [vmem:[%s8149_s1 + $0xc20] sm:$0xf] }
  0xb9   :  { %2871 = vmatpush.bf16.msrb.mxu1 %v4755_v15  ;;  %v5002_v15 = vld [vmem:[%s8150_s0 + $0x54] sm:$0xf]  ;;  %v2625_v19 = vpop.f32.mrf.mxu3  ;;  %v6837_v28 = vor.u32 %v5015_v7, %v3382_v6  ;;  %v3564_v5 = vld [vmem:[%s8149_s1 + $0x158] sm:$0xf0]  ;;  %v3503_v7 = vor.u32 %v5043_v63, %v3500_v0  ;;  %v3412_v0 = vld [vmem:[%s8149_s1 + $0x28] sm:$0xf0] }
  0xba   :  { %2885 = vmatpush.bf16.msrb.mxu2 %v4819_v16  ;;  %v4987_v16 = vor.u32 %v5416_v54, %v4986_v53  ;;  %v6848_v38 = vadd.f32 %v2625_v19, %v2612_v9  ;;  %v6850_v45 = vor.u32 %v5002_v15, %v3376_v18  ;;  %v3572_v53 = vld [vmem:[%s8149_s1 + $0x168] sm:$0xf0]  ;;  %v3447_v54 = vor.u32 %v5029_v26, %v3444_v29  ;;  %v4962_v9 = vld [vmem:[%s8149_s1 + $0xc40] sm:$0xf]  ;;  %v4954_v26 = vld [vmem:[%s8149_s1 + $0xc30] sm:$0xf] }
  0xbb   :  { %2899 = vmatpush.bf16.msrb.mxu3 %v4883_v25  ;;  %v5414_v25 = vld [vmem:[%s8149_s1 + $0xc64] sm:$0xf0]  ;;  %v3492_v15 = vld [vmem:[%s8149_s1 + $0xc8] sm:$0xf0]  ;;  %v5023_v19 = vld [vmem:[%s8149_s1 + $0x34] sm:$0xf] }
  0xbc   :  { %2858 = vmatpush.bf16.msrb.mxu0 %v4683_v33  ;;  %v5045_v33 = vld [vmem:[%s8149_s1 + $0xe4] sm:$0xf] }
  0xbd   :  { %2872 = vmatpush.bf16.msrb.mxu1 %v4747_v49  ;;  %v4979_v49 = vor.u32 %v5414_v25, %v4978_v24  ;;  %v3511_v55 = vor.u32 %v5045_v33, %v3508_v34  ;;  %v3495_v24 = vor.u32 %v5041_v13, %v3492_v15  ;;  %v3420_v33 = vld [vmem:[%s8149_s1 + $0x38] sm:$0xf0]  ;;  %v5039_v34 = vld [vmem:[%s8149_s1 + $0xb4] sm:$0xf] }
  0xbe   :  { %2886 = vmatpush.bf16.msrb.mxu2 %v4811_v52  ;;  %v5061_v52 = vld [vmem:[%s8149_s1 + $0x164] sm:$0xf] }
  0xbf   :  { %2900 = vmatpush.bf16.msrb.mxu3 %v4875_v62  ;;  %v3436_v62 = vld [vmem:[%s8149_s1 + $0x58] sm:$0xf0]  ;;  %v3575_v1 = vor.u32 %v5061_v52, %v3572_v53  ;;  %v5055_v53 = vld [vmem:[%s8149_s1 + $0x134] sm:$0xf] }
  0xc0   :  { %2859 = vmatpush.bf16.msrb.mxu0 %v4675_v4  ;;  %v5059_v4 = vld [vmem:[%s8149_s1 + $0x154] sm:$0xf]  ;;  %v3439_v6 = vor.u32 %v5027_v61, %v3436_v62  ;;  %v5406_v61 = vld [vmem:[%s8149_s1 + $0xc24] sm:$0xf0]  ;;  %v5021_v62 = vld [vmem:[%s8149_s1 + $0x24] sm:$0xf] }
  0xc1   :  { %2873 = vmatpush.bf16.msrb.mxu1 %v4739_v10  ;;  %v5410_v10 = vld [vmem:[%s8149_s1 + $0xc44] sm:$0xf0]  ;;  %v2651_v25 = vpop.f32.mrf.mxu1  ;;  %v3415_v15 = vor.u32 %v5021_v62, %v3412_v0  ;;  %v3708_v0 = vld [vmem:[%s8149_s1 + $0x278] sm:$0xf0] }
  0xc2   :  { %2887 = vmatpush.bf16.msrb.mxu2 %v4803_v11  ;;  %v5025_v11 = vld [vmem:[%s8149_s1 + $0x44] sm:$0xf]  ;;  %v4963_v20 = vor.u32 %v5410_v10, %v4962_v9  ;;  %v4947_v10 = vor.u32 %v5406_v61, %v4946_v59  ;;  %v3644_v59 = vld [vmem:[%s8149_s1 + $0x1f8] sm:$0xf0]  ;;  %v5095_v61 = vld [vmem:[%s8149_s1 + $0x274] sm:$0xf] }
  0xc3   :  { %2901 = vmatpush.bf16.msrb.mxu3 %v4867_v23  ;;  %2860 = vmatmul.bf16.vlgmr.msrb.gmra.mxu0 %v6835_v27  ;;  %v3431_v23 = vor.u32 %v5025_v11, %v3428_v12  ;;  %v5053_v11 = vld [vmem:[%s8149_s1 + $0x124] sm:$0xf]  ;;  %v3540_v12 = vld [vmem:[%s8149_s1 + $0x128] sm:$0xf0] }
  0xc4   :  { %2908 = vmatpush.bf16.msra.mxu0 %v4987_v16  ;;  %2874 = vmatmul.bf16.vlgmr.msrb.gmra.mxu1 %v6850_v45  ;;  %v3567_v16 = vor.u32 %v5059_v4, %v3564_v5 }
  0xc5   :  { %2922 = vmatpush.bf16.msra.mxu1 %v3455_v17  ;;  %2888 = vmatmul.bf16.vlgmr.msrb.gmra.mxu2 %v6837_v28  ;;  %v2637_v17 = vpop.f32.mrf.mxu0 }
  0xc6   :  { %2936 = vmatpush.bf16.msra.mxu2 %v3519_v22  ;;  %2902 = vmatmul.bf16.vlgmr.msrb.gmra.mxu3 %v6852_v47  ;;  %v2638_v18 = vadd.f32 %v2637_v17, %v6770_v46  ;;  %v3556_v22 = vld [vmem:[%s8149_s1 + $0x148] sm:$0xf0]  ;;  %v5408_v46 = vld [vmem:[%s8149_s1 + $0xc34] sm:$0xf0] }
  0xc7   :  { %2950 = vmatpush.bf16.msra.mxu3 %v3583_v39  ;;  %v3484_v39 = vld [vmem:[%s8149_s1 + $0xb8] sm:$0xf0]  ;;  %v4955_v52 = vor.u32 %v5408_v46, %v4954_v26  ;;  %v5051_v26 = vld [vmem:[%s8149_s1 + $0x114] sm:$0xf] }
  0xc8   :  { %2909 = vmatpush.bf16.msra.mxu0 %v4979_v49  ;;  %v2652_v29 = vadd.f32 %v2651_v25, %v2638_v18  ;;  %v3559_v49 = vor.u32 %v5057_v21, %v3556_v22  ;;  %v3487_v58 = vor.u32 %v5039_v34, %v3484_v39  ;;  %v2665_v63 = vpop.f32.mrf.mxu2  ;;  %v5404_v18 = vld [vmem:[%s8149_s1 + $0xc14] sm:$0xf0]  ;;  %v3404_v22 = vld [vmem:[%s8149_s1 + $0x18] sm:$0xf0]  ;;  %v3543_v25 = vor.u32 %v5053_v11, %v3540_v12  ;;  %v5017_v34 = vld [vmem:[%s8149_s1 + $0x4] sm:$0xf] }
  0xc9   :  { %2923 = vmatpush.bf16.msra.mxu1 %v3447_v54  ;;  %v3548_v54 = vld [vmem:[%s8149_s1 + $0x138] sm:$0xf0]  ;;  %v2679_v9 = vpop.f32.mrf.mxu3  ;;  %v2653_v17 = vpop.f32.mrf.mxu1 }
  0xca   :  { %2937 = vmatpush.bf16.msra.mxu2 %v3511_v55  ;;  %v3423_v55 = vor.u32 %v5023_v19, %v3420_v33  ;;  %v2666_v4 = vadd.f32 %v2665_v63, %v2652_v29  ;;  %v3551_v5 = vor.u32 %v5055_v53, %v3548_v54  ;;  %v3532_v46 = vld [vmem:[%s8149_s1 + $0x118] sm:$0xf0]  ;;  %v4930_v29 = vld [vmem:[%s8149_s1 + $0xc00] sm:$0xf]  ;;  %v5402_v33 = vld [vmem:[%s8149_s1 + $0xc04] sm:$0xf0] }
  0xcb   :  { %2951 = vmatpush.bf16.msra.mxu3 %v3575_v1  ;;  %v5037_v1 = vld [vmem:[%s8149_s1 + $0xa4] sm:$0xf]  ;;  %v3460_v54 = vld [vmem:[%s8149_s1 + $0x88] sm:$0xf0]  ;;  %v3535_v63 = vor.u32 %v5051_v26, %v3532_v46 }
  0xcc   :  { %2910 = vmatpush.bf16.msra.mxu0 %v4971_v3  ;;  %v3476_v3 = vld [vmem:[%s8149_s1 + $0xa8] sm:$0xf0]  ;;  %v6962_v13 = vadd.f32 %v2679_v9, %v2666_v4  ;;  %v5033_v53 = vld [vmem:[%s8149_s1 + $0x84] sm:$0xf]  ;;  %v3390_v9 = vld [vmem:[%s8150_s0 + $0x60] sm:$0xf] }
  0xcd   :  { %2924 = vmatpush.bf16.msra.mxu1 %v3439_v6  ;;  %v2639_v6 = vpop.f32.mrf.mxu0  ;;  %v3463_v12 = vor.u32 %v5033_v53, %v3460_v54  ;;  %v3628_v54 = vld [vmem:[%s8149_s1 + $0x1d8] sm:$0xf0] }
  0xce   :  { %2938 = vmatpush.bf16.msra.mxu2 %v3503_v7  ;;  %v2640_v7 = vadd.f32 %v2639_v6, %v6848_v38  ;;  %v4938_v38 = vld [vmem:[%s8149_s1 + $0xc10] sm:$0xf]  ;;  %v5049_v6 = vld [vmem:[%s8149_s1 + $0x104] sm:$0xf] }
  0xcf   :  { %2952 = vmatpush.bf16.msra.mxu3 %v3567_v16  ;;  %v3479_v16 = vor.u32 %v5037_v1, %v3476_v3  ;;  %v4939_v19 = vor.u32 %v5404_v18, %v4938_v38  ;;  %v5111_v1 = vld [vmem:[%s8149_s1 + $0x2f4] sm:$0xf]  ;;  %v3772_v3 = vld [vmem:[%s8149_s1 + $0x2f8] sm:$0xf0]  ;;  %v3711_v18 = vor.u32 %v5095_v61, %v3708_v0 }
  0xd0   :  { %2911 = vmatpush.bf16.msra.mxu0 %v4963_v20  ;;  %v5019_v20 = vld [vmem:[%s8149_s1 + $0x14] sm:$0xf]  ;;  %v2654_v21 = vadd.f32 %v2653_v17, %v2640_v7  ;;  %v3524_v7 = vld [vmem:[%s8149_s1 + $0x108] sm:$0xf0]  ;;  %v3836_v17 = vld [vmem:[%s8149_s1 + $0x378] sm:$0xf0] }
  0xd1   :  { %2925 = vmatpush.bf16.msra.mxu1 %v3431_v23  ;;  %v5035_v23 = vld [vmem:[%s8149_s1 + $0x94] sm:$0xf]  ;;  %v3407_v39 = vor.u32 %v5019_v20, %v3404_v22  ;;  %v2681_v4 = vpop.f32.mrf.mxu3  ;;  %v5077_v20 = vld [vmem:[%s8149_s1 + $0x1e4] sm:$0xf]  ;;  %v3527_v22 = vor.u32 %v5049_v6, %v3524_v7  ;;  %v3820_v0 = vld [vmem:[%s8149_s1 + $0x358] sm:$0xf0] }
  0xd2   :  { %2939 = vmatpush.bf16.msra.mxu2 %v3495_v24  ;;  %v3468_v24 = vld [vmem:[%s8149_s1 + $0x98] sm:$0xf0]  ;;  %v5107_v61 = vld [vmem:[%s8149_s1 + $0x2d4] sm:$0xf]  ;;  %v3620_v6 = vld [vmem:[%s8149_s1 + $0x1c8] sm:$0xf0] }
  0xd3   :  { %2953 = vmatpush.bf16.msra.mxu3 %v3559_v49  ;;  %v3471_v49 = vor.u32 %v5035_v23, %v3468_v24  ;;  %v3636_v23 = vld [vmem:[%s8149_s1 + $0x1e8] sm:$0xf0]  ;;  %v5093_v24 = vld [vmem:[%s8149_s1 + $0x264] sm:$0xf] }
  0xd4   :  { %2912 = vmatpush.bf16.msra.mxu0 %v4955_v52  ;;  %v3396_v52 = vld [vmem:[%s8149_s1 + $0x8] sm:$0xf0] }
  0xd5   :  { %2926 = vmatpush.bf16.msra.mxu1 %v3423_v55  ;;  %v2667_v55 = vpop.f32.mrf.mxu2  ;;  %v3399_v11 = vor.u32 %v5017_v34, %v3396_v52  ;;  %v3828_v34 = vld [vmem:[%s8149_s1 + $0x368] sm:$0xf0]  ;;  %v5075_v52 = vld [vmem:[%s8149_s1 + $0x1d4] sm:$0xf] }
  0xd6   :  { %2940 = vmatpush.bf16.msra.mxu2 %v3487_v58  ;;  %v5079_v58 = vld [vmem:[%s8149_s1 + $0x1f4] sm:$0xf]  ;;  %v2668_v62 = vadd.f32 %v2667_v55, %v2654_v21  ;;  %v3775_v21 = vor.u32 %v5111_v1, %v3772_v3  ;;  %v3631_v1 = vor.u32 %v5075_v52, %v3628_v54  ;;  %v5085_v54 = vld [vmem:[%s8149_s1 + $0x224] sm:$0xf] }
  0xd7   :  { %2954 = vmatpush.bf16.msra.mxu3 %v3551_v5  ;;  %v4931_v5 = vor.u32 %v5402_v33, %v4930_v29  ;;  %v3647_v38 = vor.u32 %v5079_v58, %v3644_v59  ;;  %v3764_v29 = vld [vmem:[%s8149_s1 + $0x2e8] sm:$0xf0]  ;;  %v5125_v33 = vld [vmem:[%s8149_s1 + $0x364] sm:$0xf]  ;;  %v5091_v55 = vld [vmem:[%s8149_s1 + $0x254] sm:$0xf] }
  0xd8   :  { %2913 = vmatpush.bf16.msra.mxu0 %v4947_v10  ;;  %v7033_v10 = vadd.f32 %v2681_v4, %v2668_v62  ;;  %v3692_v58 = vld [vmem:[%s8149_s1 + $0x258] sm:$0xf0]  ;;  %v3831_v59 = vor.u32 %v5125_v33, %v3828_v34  ;;  %v5073_v4 = vld [vmem:[%s8149_s1 + $0x1c4] sm:$0xf] }
  0xd9   :  { %2927 = vmatpush.bf16.msra.mxu1 %v3415_v15  ;;  %v5016_v15 = vld [vmem:[%s8150_s0 + $0xc0] sm:$0xf0]  ;;  %v3756_v62 = vld [vmem:[%s8149_s1 + $0x2d8] sm:$0xf0]  ;;  %v3695_v3 = vor.u32 %v5091_v55, %v3692_v58  ;;  %v3668_v55 = vld [vmem:[%s8149_s1 + $0x228] sm:$0xf0] }
  0xda   :  { %2941 = vmatpush.bf16.msra.mxu2 %v3479_v16  ;;  %v5127_v16 = vld [vmem:[%s8149_s1 + $0x374] sm:$0xf]  ;;  %v7056_v26 = vor.u32 %v5016_v15, %v3390_v9  ;;  %v5105_v9 = vld [vmem:[%s8149_s1 + $0x2c4] sm:$0xf]  ;;  %v3804_v33 = vld [vmem:[%s8149_s1 + $0x338] sm:$0xf0] }
  0xdb   :  { %2955 = vmatpush.bf16.msra.mxu3 %v3543_v25  ;;  %v3700_v25 = vld [vmem:[%s8149_s1 + $0x268] sm:$0xf0]  ;;  %v3839_v46 = vor.u32 %v5127_v16, %v3836_v17  ;;  %v5121_v15 = vld [vmem:[%s8149_s1 + $0x344] sm:$0xf]  ;;  %v3623_v17 = vor.u32 %v5073_v4, %v3620_v6 }
  0xdc   :  { %2914 = vmatpush.bf16.msra.mxu0 %v4939_v19  ;;  %v5109_v19 = vld [vmem:[%s8149_s1 + $0x2e4] sm:$0xf]  ;;  %v3812_v16 = vld [vmem:[%s8149_s1 + $0x348] sm:$0xf0] }
  0xdd   :  { %2928 = vmatpush.bf16.msra.mxu1 %v3407_v39  ;;  %v3639_v39 = vor.u32 %v5077_v20, %v3636_v23  ;;  %v3767_v53 = vor.u32 %v5109_v19, %v3764_v29  ;;  %v5071_v20 = vld [vmem:[%s8149_s1 + $0x1b4] sm:$0xf]  ;;  %v3740_v19 = vld [vmem:[%s8149_s1 + $0x2b8] sm:$0xf0]  ;;  %v3796_v4 = vld [vmem:[%s8149_s1 + $0x328] sm:$0xf0] }
  0xde   :  { %2942 = vmatpush.bf16.msra.mxu2 %v3471_v49  ;;  %v3703_v49 = vor.u32 %v5093_v24, %v3700_v25  ;;  %v5087_v23 = vld [vmem:[%s8149_s1 + $0x234] sm:$0xf]  ;;  %v3815_v25 = vor.u32 %v5121_v15, %v3812_v16 }
  0xdf   :  { %2956 = vmatpush.bf16.msra.mxu3 %v3535_v63  ;;  %v5123_v63 = vld [vmem:[%s8149_s1 + $0x354] sm:$0xf] }
  0xe0   :  { %2915 = vmatpush.bf16.msra.mxu0 %v4931_v5  ;;  %v3759_v5 = vor.u32 %v5107_v61, %v3756_v62  ;;  %v3823_v7 = vor.u32 %v5123_v63, %v3820_v0  ;;  %v5119_v29 = vld [vmem:[%s8149_s1 + $0x334] sm:$0xf]  ;;  %v5101_v61 = vld [vmem:[%s8149_s1 + $0x2a4] sm:$0xf]  ;;  %v3732_v62 = vld [vmem:[%s8149_s1 + $0x2a8] sm:$0xf0] }
  0xe1   :  { %2929 = vmatpush.bf16.msra.mxu1 %v3399_v11  ;;  %v3748_v11 = vld [vmem:[%s8149_s1 + $0x2c8] sm:$0xf0]  ;;  %v5083_v15 = vld [vmem:[%s8149_s1 + $0x214] sm:$0xf] }
  0xe2   :  { %2943 = vmatpush.bf16.msra.mxu2 %v3463_v12  ;;  %v2693_v12 = vpop.f32.mrf.mxu0 }
  0xe3   :  { %2957 = vmatpush.bf16.msra.mxu3 %v3527_v22  ;;  %2916 = vmatmul.bf16.vlgmr.msra.gmra.mxu0 %v7056_v26  ;;  %v3612_v22 = vld [vmem:[%s8149_s1 + $0x1b8] sm:$0xf0] }
  0xe4   :  { %2964 = vmatpush.bf16.msrb.mxu0 %v3647_v38  ;;  %2930 = vmatmul.bf16.vlgmr.msra.gmra.mxu1 %v5696_v60  ;;  %v3684_v60 = vld [vmem:[%s8149_s1 + $0x248] sm:$0xf0]  ;;  %v3615_v34 = vor.u32 %v5071_v20, %v3612_v22  ;;  %v3788_v20 = vld [vmem:[%s8149_s1 + $0x318] sm:$0xf0] }
  0xe5   :  { %2978 = vmatpush.bf16.msrb.mxu1 %v3711_v18  ;;  %2944 = vmatmul.bf16.vlgmr.msra.gmra.mxu2 %v5726_v8  ;;  %v5089_v8 = vld [vmem:[%s8149_s1 + $0x244] sm:$0xf]  ;;  %v2707_v18 = vpop.f32.mrf.mxu1 }
  0xe6   :  { %2992 = vmatpush.bf16.msrb.mxu2 %v3775_v21  ;;  %2958 = vmatmul.bf16.vlgmr.msra.gmra.mxu3 %v5710_v2  ;;  %v2694_v2 = vadd.f32 %v2693_v12, %v6962_v13  ;;  %v3687_v38 = vor.u32 %v5089_v8, %v3684_v60  ;;  %v3751_v21 = vor.u32 %v5105_v9, %v3748_v11  ;;  %v3676_v13 = vld [vmem:[%s8149_s1 + $0x238] sm:$0xf0] }
  0xe7   :  { %3006 = vmatpush.bf16.msrb.mxu3 %v3839_v46  ;;  %v5103_v46 = vld [vmem:[%s8149_s1 + $0x2b4] sm:$0xf]  ;;  %v3671_v8 = vor.u32 %v5085_v54, %v3668_v55  ;;  %v3735_v11 = vor.u32 %v5101_v61, %v3732_v62  ;;  %v3596_v12 = vld [vmem:[%s8149_s1 + $0x198] sm:$0xf0] }
  0xe8   :  { %2965 = vmatpush.bf16.msrb.mxu0 %v3639_v39  ;;  %v2708_v24 = vadd.f32 %v2707_v18, %v2694_v2  ;;  %v3679_v39 = vor.u32 %v5087_v23, %v3676_v13  ;;  %v3743_v52 = vor.u32 %v5103_v46, %v3740_v19  ;;  %v2721_v58 = vpop.f32.mrf.mxu2  ;;  %v5115_v18 = vld [vmem:[%s8149_s1 + $0x314] sm:$0xf]  ;;  %v5065_v23 = vld [vmem:[%s8149_s1 + $0x184] sm:$0xf]  ;;  %v3588_v13 = vld [vmem:[%s8149_s1 + $0x188] sm:$0xf0] }
  0xe9   :  { %2979 = vmatpush.bf16.msrb.mxu1 %v3703_v49  ;;  %v5069_v49 = vld [vmem:[%s8149_s1 + $0x1a4] sm:$0xf]  ;;  %v3652_v46 = vld [vmem:[%s8149_s1 + $0x208] sm:$0xf0]  ;;  %v3964_v55 = vld [vmem:[%s8149_s1 + $0x478] sm:$0xf0]  ;;  %v3591_v61 = vor.u32 %v5065_v23, %v3588_v13 }
  0xea   :  { %2993 = vmatpush.bf16.msrb.mxu2 %v3767_v53  ;;  %v3604_v53 = vld [vmem:[%s8149_s1 + $0x1a8] sm:$0xf0]  ;;  %v2722_v63 = vadd.f32 %v2721_v58, %v2708_v24  ;;  %v2695_v0 = vpop.f32.mrf.mxu0  ;;  %v5081_v24 = vld [vmem:[%s8149_s1 + $0x204] sm:$0xf]  ;;  %v5175_v58 = vld [vmem:[%s8149_s1 + $0x4f4] sm:$0xf] }
  0xeb   :  { %3007 = vmatpush.bf16.msrb.mxu3 %v3831_v59  ;;  %v3807_v59 = vor.u32 %v5119_v29, %v3804_v33  ;;  %v3607_v6 = vor.u32 %v5069_v49, %v3604_v53  ;;  %v5097_v19 = vld [vmem:[%s8149_s1 + $0x284] sm:$0xf]  ;;  %v3716_v29 = vld [vmem:[%s8149_s1 + $0x288] sm:$0xf0]  ;;  %v3900_v49 = vld [vmem:[%s8149_s1 + $0x3f8] sm:$0xf0]  ;;  %v3655_v62 = vor.u32 %v5081_v24, %v3652_v46 }
  0xec   :  { %2966 = vmatpush.bf16.msrb.mxu0 %v3631_v1  ;;  %v2735_v1 = vpop.f32.mrf.mxu3  ;;  %v3884_v23 = vld [vmem:[%s8149_s1 + $0x3d8] sm:$0xf0]  ;;  %v5155_v24 = vld [vmem:[%s8149_s1 + $0x454] sm:$0xf] }
  0xed   :  { %2980 = vmatpush.bf16.msrb.mxu1 %v3695_v3  ;;  %v5117_v3 = vld [vmem:[%s8149_s1 + $0x324] sm:$0xf]  ;;  %v2709_v60 = vpop.f32.mrf.mxu1  ;;  %v7175_v9 = vadd.f32 %v2735_v1, %v2722_v63 }
  0xee   :  { %2994 = vmatpush.bf16.msrb.mxu2 %v3759_v5  ;;  %v2696_v5 = vadd.f32 %v2695_v0, %v7033_v10  ;;  %v3660_v10 = vld [vmem:[%s8149_s1 + $0x218] sm:$0xf0]  ;;  %v3799_v2 = vor.u32 %v5117_v3, %v3796_v4  ;;  %v5113_v63 = vld [vmem:[%s8149_s1 + $0x304] sm:$0xf]  ;;  %v3780_v0 = vld [vmem:[%s8149_s1 + $0x308] sm:$0xf0]  ;;  %v3719_v3 = vor.u32 %v5097_v19, %v3716_v29 }
  0xef   :  { %3008 = vmatpush.bf16.msrb.mxu3 %v3823_v7  ;;  %v5067_v7 = vld [vmem:[%s8149_s1 + $0x194] sm:$0xf]  ;;  %v3663_v22 = vor.u32 %v5083_v15, %v3660_v10  ;;  %v5157_v15 = vld [vmem:[%s8149_s1 + $0x464] sm:$0xf]  ;;  %v3956_v10 = vld [vmem:[%s8149_s1 + $0x468] sm:$0xf0] }
  0xf0   :  { %2967 = vmatpush.bf16.msrb.mxu0 %v3623_v17  ;;  %v2710_v16 = vadd.f32 %v2709_v60, %v2696_v5  ;;  %v5099_v17 = vld [vmem:[%s8149_s1 + $0x294] sm:$0xf]  ;;  %v2723_v33 = vpop.f32.mrf.mxu2 }
  0xf1   :  { %2981 = vmatpush.bf16.msrb.mxu1 %v3687_v38  ;;  %v3724_v38 = vld [vmem:[%s8149_s1 + $0x298] sm:$0xf0]  ;;  %v5191_v5 = vld [vmem:[%s8149_s1 + $0x574] sm:$0xf] }
  0xf2   :  { %2995 = vmatpush.bf16.msrb.mxu2 %v3751_v21  ;;  %v3599_v21 = vor.u32 %v5067_v7, %v3596_v12  ;;  %v2724_v53 = vadd.f32 %v2723_v33, %v2710_v16  ;;  %v5141_v7 = vld [vmem:[%s8149_s1 + $0x3e4] sm:$0xf]  ;;  %v3783_v12 = vor.u32 %v5113_v63, %v3780_v0  ;;  %v5171_v19 = vld [vmem:[%s8149_s1 + $0x4d4] sm:$0xf] }
  0xf3   :  { %3009 = vmatpush.bf16.msrb.mxu3 %v3815_v25  ;;  %v3727_v25 = vor.u32 %v5099_v17, %v3724_v38  ;;  %v4020_v17 = vld [vmem:[%s8149_s1 + $0x4e8] sm:$0xf0]  ;;  %v5187_v33 = vld [vmem:[%s8149_s1 + $0x554] sm:$0xf] }
  0xf4   :  { %2968 = vmatpush.bf16.msrb.mxu0 %v3615_v34  ;;  %v3791_v34 = vor.u32 %v5115_v18, %v3788_v20  ;;  %v2737_v54 = vpop.f32.mrf.mxu3  ;;  %v5189_v18 = vld [vmem:[%s8149_s1 + $0x564] sm:$0xf]  ;;  %v4084_v20 = vld [vmem:[%s8149_s1 + $0x568] sm:$0xf0] }
  0xf5   :  { %2982 = vmatpush.bf16.msrb.mxu1 %v3679_v39  ;;  %v5143_v39 = vld [vmem:[%s8149_s1 + $0x3f4] sm:$0xf]  ;;  %v7240_v1 = vadd.f32 %v2737_v54, %v2724_v53  ;;  %v4087_v46 = vor.u32 %v5189_v18, %v4084_v20  ;;  %v5169_v54 = vld [vmem:[%s8149_s1 + $0x4c4] sm:$0xf] }
  0xf6   :  { %2996 = vmatpush.bf16.msrb.mxu2 %v3743_v52  ;;  %v5159_v52 = vld [vmem:[%s8149_s1 + $0x474] sm:$0xf]  ;;  %v3903_v4 = vor.u32 %v5143_v39, %v3900_v49  ;;  %v5137_v39 = vld [vmem:[%s8149_s1 + $0x3c4] sm:$0xf] }
  0xf7   :  { %3010 = vmatpush.bf16.msrb.mxu3 %v3807_v59  ;;  %v4028_v59 = vld [vmem:[%s8149_s1 + $0x4f8] sm:$0xf0] }
  0xf8   :  { %2969 = vmatpush.bf16.msrb.mxu0 %v3607_v6  ;;  %v4092_v6 = vld [vmem:[%s8149_s1 + $0x578] sm:$0xf0]  ;;  %v4031_v60 = vor.u32 %v5175_v58, %v4028_v59 }
  0xf9   :  { %2983 = vmatpush.bf16.msrb.mxu1 %v3671_v8  ;;  %v3967_v8 = vor.u32 %v5159_v52, %v3964_v55  ;;  %v4095_v16 = vor.u32 %v5191_v5, %v4092_v6  ;;  %v5153_v52 = vld [vmem:[%s8149_s1 + $0x444] sm:$0xf]  ;;  %v4004_v55 = vld [vmem:[%s8149_s1 + $0x4c8] sm:$0xf0]  ;;  %v3868_v5 = vld [vmem:[%s8149_s1 + $0x3b8] sm:$0xf0] }
  0xfa   :  { %2997 = vmatpush.bf16.msrb.mxu2 %v3735_v11  ;;  %v3892_v11 = vld [vmem:[%s8149_s1 + $0x3e8] sm:$0xf0]  ;;  %v4007_v6 = vor.u32 %v5169_v54, %v4004_v55 }
  0xfb   :  { %3011 = vmatpush.bf16.msrb.mxu3 %v3799_v2  ;;  %v5173_v2 = vld [vmem:[%s8149_s1 + $0x4e4] sm:$0xf]  ;;  %v3895_v38 = vor.u32 %v5141_v7, %v3892_v11  ;;  %v5167_v11 = vld [vmem:[%s8149_s1 + $0x4b4] sm:$0xf] }
  0xfc   :  { %2970 = vmatpush.bf16.msrb.mxu0 %v3599_v21  ;;  %v3959_v21 = vor.u32 %v5157_v15, %v3956_v10  ;;  %v4023_v13 = vor.u32 %v5173_v2, %v4020_v17  ;;  %v5183_v10 = vld [vmem:[%s8149_s1 + $0x534] sm:$0xf]  ;;  %v5133_v17 = vld [vmem:[%s8149_s1 + $0x3a4] sm:$0xf] }
  0xfd   :  { %2984 = vmatpush.bf16.msrb.mxu1 %v3663_v22  ;;  %v5139_v22 = vld [vmem:[%s8149_s1 + $0x3d4] sm:$0xf] }
  0xfe   :  { %2998 = vmatpush.bf16.msrb.mxu2 %v3727_v25  ;;  %v3948_v25 = vld [vmem:[%s8149_s1 + $0x458] sm:$0xf0]  ;;  %v3887_v29 = vor.u32 %v5139_v22, %v3884_v23  ;;  %v3924_v22 = vld [vmem:[%s8149_s1 + $0x428] sm:$0xf0] }
  0xff   :  { %3012 = vmatpush.bf16.msrb.mxu3 %v3791_v34  ;;  %v3951_v34 = vor.u32 %v5155_v24, %v3948_v25  ;;  %v5165_v24 = vld [vmem:[%s8149_s1 + $0x4a4] sm:$0xf]  ;;  %v3988_v25 = vld [vmem:[%s8149_s1 + $0x4a8] sm:$0xf0] }
 0x100   :  { %2971 = vmatpush.bf16.msrb.mxu0 %v3591_v61  ;;  %v2749_v58 = vpop.f32.mrf.mxu0  ;;  %v5185_v61 = vld [vmem:[%s8149_s1 + $0x544] sm:$0xf] }
 0x101   :  { %2985 = vmatpush.bf16.msrb.mxu1 %v3655_v62  ;;  %v4068_v62 = vld [vmem:[%s8149_s1 + $0x548] sm:$0xf0]  ;;  %v2750_v63 = vadd.f32 %v2749_v58, %v7175_v9  ;;  %v3932_v9 = vld [vmem:[%s8149_s1 + $0x438] sm:$0xf0]  ;;  %v5163_v58 = vld [vmem:[%s8149_s1 + $0x494] sm:$0xf] }
 0x102   :  { %2999 = vmatpush.bf16.msrb.mxu2 %v3719_v3  ;;  %v2763_v3 = vpop.f32.mrf.mxu1  ;;  %v4071_v7 = vor.u32 %v5185_v61, %v4068_v62  ;;  %v5179_v61 = vld [vmem:[%s8149_s1 + $0x514] sm:$0xf] }
 0x103   :  { %3013 = vmatpush.bf16.msrb.mxu3 %v3783_v12  ;;  %2972 = vmatmul.bf16.vlgmr.msrb.gmra.mxu0 %v5737_v14  ;;  %v4012_v14 = vld [vmem:[%s8149_s1 + $0x4d8] sm:$0xf0] }
 0x104   :  { %3020 = vmatpush.bf16.msra.mxu0 %v3903_v4  ;;  %2986 = vmatmul.bf16.vlgmr.msrb.gmra.mxu1 %v5909_v36  ;;  %v3876_v36 = vld [vmem:[%s8149_s1 + $0x3c8] sm:$0xf0]  ;;  %v4015_v49 = vor.u32 %v5171_v19, %v4012_v14  ;;  %v5135_v4 = vld [vmem:[%s8149_s1 + $0x3b4] sm:$0xf]  ;;  %v3996_v12 = vld [vmem:[%s8149_s1 + $0x4b8] sm:$0xf0] }
 0x105   :  { %3034 = vmatpush.bf16.msra.mxu1 %v3967_v8  ;;  %3000 = vmatmul.bf16.vlgmr.msrb.gmra.mxu2 %v5928_v44  ;;  %v4076_v44 = vld [vmem:[%s8149_s1 + $0x558] sm:$0xf0]  ;;  %v3879_v59 = vor.u32 %v5137_v39, %v3876_v36  ;;  %v5151_v8 = vld [vmem:[%s8149_s1 + $0x434] sm:$0xf]  ;;  %v3871_v15 = vor.u32 %v5135_v4, %v3868_v5  ;;  %v3999_v18 = vor.u32 %v5167_v11, %v3996_v12  ;;  %v5145_v5 = vld [vmem:[%s8149_s1 + $0x404] sm:$0xf] }
 0x106   :  { %3048 = vmatpush.bf16.msra.mxu2 %v4031_v60  ;;  %3014 = vmatmul.bf16.vlgmr.msrb.gmra.mxu3 %v5920_v40  ;;  %v3940_v40 = vld [vmem:[%s8149_s1 + $0x448] sm:$0xf0]  ;;  %v4079_v53 = vor.u32 %v5187_v33, %v4076_v44  ;;  %v2764_v60 = vadd.f32 %v2763_v3, %v2750_v63  ;;  %v3935_v2 = vor.u32 %v5151_v8, %v3932_v9  ;;  %v4044_v63 = vld [vmem:[%s8149_s1 + $0x518] sm:$0xf0]  ;;  %v5161_v8 = vld [vmem:[%s8149_s1 + $0x484] sm:$0xf] }
 0x107   :  { %3062 = vmatpush.bf16.msra.mxu3 %v4095_v16  ;;  %v3943_v0 = vor.u32 %v5153_v52, %v3940_v40  ;;  %v4060_v16 = vld [vmem:[%s8149_s1 + $0x538] sm:$0xf0]  ;;  %v4052_v33 = vld [vmem:[%s8149_s1 + $0x528] sm:$0xf0]  ;;  %v3991_v40 = vor.u32 %v5165_v24, %v3988_v25  ;;  %v5207_v11 = vld [vmem:[%s8149_s1 + $0x5f4] sm:$0xf] }
 0x108   :  { %3021 = vmatpush.bf16.msra.mxu0 %v3895_v38  ;;  %v3860_v38 = vld [vmem:[%s8149_s1 + $0x3a8] sm:$0xf0]  ;;  %v2777_v20 = vpop.f32.mrf.mxu2  ;;  %v3852_v52 = vld [vmem:[%s8149_s1 + $0x398] sm:$0xf0]  ;;  %v5255_v25 = vld [vmem:[%s8149_s1 + $0x774] sm:$0xf] }
 0x109   :  { %3035 = vmatpush.bf16.msra.mxu1 %v3959_v21  ;;  %v5149_v21 = vld [vmem:[%s8149_s1 + $0x424] sm:$0xf]  ;;  %v2778_v23 = vadd.f32 %v2777_v20, %v2764_v60  ;;  %v2791_v19 = vpop.f32.mrf.mxu3  ;;  %v3863_v14 = vor.u32 %v5133_v17, %v3860_v38  ;;  %v3844_v3 = vld [vmem:[%s8149_s1 + $0x388] sm:$0xf0]  ;;  %v4156_v12 = vld [vmem:[%s8149_s1 + $0x5f8] sm:$0xf0] }
 0x10a   :  { %3049 = vmatpush.bf16.msra.mxu2 %v4023_v13  ;;  %v4063_v13 = vor.u32 %v5183_v10, %v4060_v16  ;;  %v3927_v39 = vor.u32 %v5149_v21, %v3924_v22  ;;  %v2765_v36 = vpop.f32.mrf.mxu1  ;;  %v4047_v10 = vor.u32 %v5179_v61, %v4044_v63  ;;  %v5223_v16 = vld [vmem:[%s8149_s1 + $0x674] sm:$0xf]  ;;  %v4284_v20 = vld [vmem:[%s8149_s1 + $0x6f8] sm:$0xf0]  ;;  %v5177_v21 = vld [vmem:[%s8149_s1 + $0x504] sm:$0xf]  ;;  %v4159_v24 = vor.u32 %v5207_v11, %v4156_v12 }
 0x10b   :  { %3063 = vmatpush.bf16.msra.mxu3 %v4087_v46  ;;  %v2751_v46 = vpop.f32.mrf.mxu0  ;;  %v5239_v17 = vld [vmem:[%s8149_s1 + $0x6f4] sm:$0xf]  ;;  %v4036_v22 = vld [vmem:[%s8149_s1 + $0x508] sm:$0xf0]  ;;  %v5233_v12 = vld [vmem:[%s8149_s1 + $0x6c4] sm:$0xf] }
 0x10c   :  { %3022 = vmatpush.bf16.msra.mxu0 %v3887_v29  ;;  %v5181_v29 = vld [vmem:[%s8149_s1 + $0x524] sm:$0xf]  ;;  %v2752_v44 = vadd.f32 %v2751_v46, %v7240_v1  ;;  %v3916_v1 = vld [vmem:[%s8149_s1 + $0x418] sm:$0xf0]  ;;  %v5203_v61 = vld [vmem:[%s8149_s1 + $0x5d4] sm:$0xf] }
 0x10d   :  { %3036 = vmatpush.bf16.msra.mxu1 %v3951_v34  ;;  %v7374_v34 = vadd.f32 %v2791_v19, %v2778_v23  ;;  %v4055_v55 = vor.u32 %v5181_v29, %v4052_v33  ;;  %v4348_v46 = vld [vmem:[%s8149_s1 + $0x778] sm:$0xf0]  ;;  %v4287_v29 = vor.u32 %v5239_v17, %v4284_v20  ;;  %v4039_v33 = vor.u32 %v5177_v21, %v4036_v22  ;;  %v5219_v63 = vld [vmem:[%s8149_s1 + $0x654] sm:$0xf]  ;;  %v4196_v11 = vld [vmem:[%s8149_s1 + $0x648] sm:$0xf0] }
 0x10e   :  { %3050 = vmatpush.bf16.msra.mxu2 %v4015_v49  ;;  %v5131_v49 = vld [vmem:[%s8149_s1 + $0x394] sm:$0xf]  ;;  %v2766_v54 = vadd.f32 %v2765_v36, %v2752_v44  ;;  %v5205_v44 = vld [vmem:[%s8149_s1 + $0x5e4] sm:$0xf] }
 0x10f   :  { %3064 = vmatpush.bf16.msra.mxu3 %v4079_v53  ;;  %v5147_v53 = vld [vmem:[%s8149_s1 + $0x414] sm:$0xf]  ;;  %v3855_v62 = vor.u32 %v5131_v49, %v3852_v52  ;;  %v5221_v36 = vld [vmem:[%s8149_s1 + $0x664] sm:$0xf]  ;;  %v4351_v49 = vor.u32 %v5255_v25, %v4348_v46  ;;  %v4212_v52 = vld [vmem:[%s8149_s1 + $0x668] sm:$0xf0] }
 0x110   :  { %3023 = vmatpush.bf16.msra.mxu0 %v3879_v59  ;;  %v3980_v59 = vld [vmem:[%s8149_s1 + $0x498] sm:$0xf0]  ;;  %v3919_v4 = vor.u32 %v5147_v53, %v3916_v1  ;;  %v2779_v60 = vpop.f32.mrf.mxu2  ;;  %v4276_v53 = vld [vmem:[%s8149_s1 + $0x6e8] sm:$0xf0]  ;;  %v5253_v1 = vld [vmem:[%s8149_s1 + $0x764] sm:$0xf] }
 0x111   :  { %3037 = vmatpush.bf16.msra.mxu1 %v3943_v0  ;;  %v5129_v0 = vld [vmem:[%s8149_s1 + $0x384] sm:$0xf]  ;;  %v3983_v9 = vor.u32 %v5163_v58, %v3980_v59  ;;  %v2793_v38 = vpop.f32.mrf.mxu3  ;;  %v4215_v58 = vor.u32 %v5221_v36, %v4212_v52  ;;  %v5199_v22 = vld [vmem:[%s8149_s1 + $0x5b4] sm:$0xf]  ;;  %v4116_v52 = vld [vmem:[%s8149_s1 + $0x5a8] sm:$0xf0] }
 0x112   :  { %3051 = vmatpush.bf16.msra.mxu2 %v4007_v6  ;;  %v3908_v6 = vld [vmem:[%s8149_s1 + $0x408] sm:$0xf0]  ;;  %v5231_v46 = vld [vmem:[%s8149_s1 + $0x6b4] sm:$0xf] }
 0x113   :  { %3065 = vmatpush.bf16.msra.mxu3 %v4071_v7  ;;  %v3972_v7 = vld [vmem:[%s8149_s1 + $0x488] sm:$0xf0] }
 0x114   :  { %3024 = vmatpush.bf16.msra.mxu0 %v3871_v15  ;;  %v2780_v15 = vadd.f32 %v2779_v60, %v2766_v54  ;;  %v3975_v19 = vor.u32 %v5161_v8, %v3972_v7  ;;  %v4340_v54 = vld [vmem:[%s8149_s1 + $0x768] sm:$0xf0]  ;;  %v5217_v7 = vld [vmem:[%s8149_s1 + $0x644] sm:$0xf] }
 0x115   :  { %3038 = vmatpush.bf16.msra.mxu1 %v3935_v2  ;;  %v4220_v2 = vld [vmem:[%s8149_s1 + $0x678] sm:$0xf0] }
 0x116   :  { %3052 = vmatpush.bf16.msra.mxu2 %v3999_v18  ;;  %v3847_v18 = vor.u32 %v5129_v0, %v3844_v3  ;;  %v7442_v23 = vadd.f32 %v2793_v38, %v2780_v15  ;;  %v4343_v0 = vor.u32 %v5253_v1, %v4340_v54  ;;  %v4204_v3 = vld [vmem:[%s8149_s1 + $0x658] sm:$0xf0]  ;;  %v4260_v15 = vld [vmem:[%s8149_s1 + $0x6c8] sm:$0xf0] }
 0x117   :  { %3066 = vmatpush.bf16.msra.mxu3 %v4063_v13  ;;  %v3911_v13 = vor.u32 %v5145_v5, %v3908_v6  ;;  %v4268_v5 = vld [vmem:[%s8149_s1 + $0x6d8] sm:$0xf0]  ;;  %v4263_v20 = vor.u32 %v5233_v12, %v4260_v15  ;;  %v5243_v12 = vld [vmem:[%s8149_s1 + $0x714] sm:$0xf] }
 0x118   :  { %3025 = vmatpush.bf16.msra.mxu0 %v3863_v14  ;;  %v4223_v14 = vor.u32 %v5223_v16, %v4220_v2  ;;  %v4332_v6 = vld [vmem:[%s8149_s1 + $0x758] sm:$0xf0]  ;;  %v4324_v16 = vld [vmem:[%s8149_s1 + $0x748] sm:$0xf0] }
 0x119   :  { %3039 = vmatpush.bf16.msra.mxu1 %v3927_v39  ;;  %v4148_v39 = vld [vmem:[%s8149_s1 + $0x5e8] sm:$0xf0]  ;;  %v4300_v15 = vld [vmem:[%s8149_s1 + $0x718] sm:$0xf0] }
 0x11a   :  { %3053 = vmatpush.bf16.msra.mxu2 %v3991_v40  ;;  %v5237_v40 = vld [vmem:[%s8149_s1 + $0x6e4] sm:$0xf] }
 0x11b   :  { %3067 = vmatpush.bf16.msra.mxu3 %v4055_v55  ;;  %v4151_v55 = vor.u32 %v5205_v44, %v4148_v39  ;;  %v4279_v59 = vor.u32 %v5237_v40, %v4276_v53  ;;  %v5197_v39 = vld [vmem:[%s8149_s1 + $0x5a4] sm:$0xf]  ;;  %v4180_v53 = vld [vmem:[%s8149_s1 + $0x628] sm:$0xf0] }
 0x11c   :  { %3026 = vmatpush.bf16.msra.mxu0 %v3855_v62  ;;  %v4140_v62 = vld [vmem:[%s8149_s1 + $0x5d8] sm:$0xf0]  ;;  %v5213_v40 = vld [vmem:[%s8149_s1 + $0x624] sm:$0xf] }
 0x11d   :  { %3040 = vmatpush.bf16.msra.mxu1 %v3919_v4  ;;  %v5235_v4 = vld [vmem:[%s8149_s1 + $0x6d4] sm:$0xf]  ;;  %v4143_v8 = vor.u32 %v5203_v61, %v4140_v62  ;;  %v5245_v61 = vld [vmem:[%s8149_s1 + $0x724] sm:$0xf]  ;;  %v4308_v62 = vld [vmem:[%s8149_s1 + $0x728] sm:$0xf0] }
 0x11e   :  { %3054 = vmatpush.bf16.msra.mxu2 %v3983_v9  ;;  %v4207_v9 = vor.u32 %v5219_v63, %v4204_v3  ;;  %v4271_v60 = vor.u32 %v5235_v4, %v4268_v5  ;;  %v4119_v3 = vor.u32 %v5197_v39, %v4116_v52  ;;  %v4183_v4 = vor.u32 %v5213_v40, %v4180_v53  ;;  %v4540_v39 = vld [vmem:[%s8149_s1 + $0x8f8] sm:$0xf0] }
 0x11f   :  { %3068 = vmatpush.bf16.msra.mxu3 %v4047_v10  ;;  %v5249_v10 = vld [vmem:[%s8149_s1 + $0x744] sm:$0xf] }
 0x120   :  { %3027 = vmatpush.bf16.msra.mxu0 %v3847_v18  ;;  %v2805_v2 = vpop.f32.mrf.mxu0  ;;  %v4199_v18 = vor.u32 %v5217_v7, %v4196_v11  ;;  %v4327_v25 = vor.u32 %v5249_v10, %v4324_v16  ;;  %v5227_v7 = vld [vmem:[%s8149_s1 + $0x694] sm:$0xf]  ;;  %v5193_v16 = vld [vmem:[%s8149_s1 + $0x584] sm:$0xf] }
 0x121   :  { %3041 = vmatpush.bf16.msra.mxu1 %v3911_v13  ;;  %v2806_v38 = vadd.f32 %v2805_v2, %v7374_v34  ;;  %v2819_v21 = vpop.f32.mrf.mxu1  ;;  %v4124_v13 = vld [vmem:[%s8149_s1 + $0x5b8] sm:$0xf0]  ;;  %v4100_v2 = vld [vmem:[%s8149_s1 + $0x588] sm:$0xf0] }
 0x122   :  { %3055 = vmatpush.bf16.msra.mxu2 %v3975_v19  ;;  %v4188_v34 = vld [vmem:[%s8149_s1 + $0x638] sm:$0xf0]  ;;  %v4127_v44 = vor.u32 %v5199_v22, %v4124_v13  ;;  %v4303_v13 = vor.u32 %v5243_v12, %v4300_v15  ;;  %v5299_v12 = vld [vmem:[%s8149_s1 + $0x8d4] sm:$0xf] }
 0x123   :  { %3069 = vmatpush.bf16.msra.mxu3 %v4039_v33  ;;  %3028 = vmatmul.bf16.vlgmr.msra.gmra.mxu0 %v5936_v48  ;;  %v5251_v48 = vld [vmem:[%s8149_s1 + $0x754] sm:$0xf]  ;;  %v4252_v19 = vld [vmem:[%s8149_s1 + $0x6b8] sm:$0xf0] }
 0x124   :  { %3076 = vmatpush.bf16.msrb.mxu0 %v4159_v24  ;;  %3042 = vmatmul.bf16.vlgmr.msra.gmra.mxu1 %v6143_v30  ;;  %v5201_v30 = vld [vmem:[%s8149_s1 + $0x5c4] sm:$0xf]  ;;  %v5215_v24 = vld [vmem:[%s8149_s1 + $0x634] sm:$0xf]  ;;  %v4316_v33 = vld [vmem:[%s8149_s1 + $0x738] sm:$0xf0] }
 0x125   :  { %3090 = vmatpush.bf16.msrb.mxu1 %v4223_v14  ;;  %3056 = vmatmul.bf16.vlgmr.msra.gmra.mxu2 %v6156_v37  ;;  %v4132_v37 = vld [vmem:[%s8149_s1 + $0x5c8] sm:$0xf0]  ;;  %v2820_v14 = vadd.f32 %v2819_v21, %v2806_v38  ;;  %v4191_v36 = vor.u32 %v5215_v24, %v4188_v34  ;;  %v5225_v21 = vld [vmem:[%s8149_s1 + $0x684] sm:$0xf]  ;;  %v4412_v34 = vld [vmem:[%s8149_s1 + $0x7f8] sm:$0xf0] }
 0x126   :  { %3104 = vmatpush.bf16.msrb.mxu2 %v4287_v29  ;;  %3070 = vmatmul.bf16.vlgmr.msra.gmra.mxu3 %v6154_v35  ;;  %v4335_v35 = vor.u32 %v5251_v48, %v4332_v6  ;;  %v4135_v17 = vor.u32 %v5201_v30, %v4132_v37  ;;  %v5247_v29 = vld [vmem:[%s8149_s1 + $0x734] sm:$0xf]  ;;  %v4311_v37 = vor.u32 %v5245_v61, %v4308_v62  ;;  %v4228_v24 = vld [vmem:[%s8149_s1 + $0x688] sm:$0xf0]  ;;  %v5269_v62 = vld [vmem:[%s8149_s1 + $0x7e4] sm:$0xf] }
 0x127   :  { %3118 = vmatpush.bf16.msrb.mxu3 %v4351_v49  ;;  %v4255_v49 = vor.u32 %v5231_v46, %v4252_v19  ;;  %v4319_v54 = vor.u32 %v5247_v29, %v4316_v33  ;;  %v5211_v30 = vld [vmem:[%s8149_s1 + $0x614] sm:$0xf]  ;;  %v4231_v53 = vor.u32 %v5225_v21, %v4228_v24  ;;  %v4524_v15 = vld [vmem:[%s8149_s1 + $0x8d8] sm:$0xf0]  ;;  %v4516_v21 = vld [vmem:[%s8149_s1 + $0x8c8] sm:$0xf0] }
 0x128   :  { %3077 = vmatpush.bf16.msrb.mxu0 %v4151_v55  ;;  %v2833_v1 = vpop.f32.mrf.mxu2  ;;  %v5229_v55 = vld [vmem:[%s8149_s1 + $0x6a4] sm:$0xf]  ;;  %v2807_v63 = vpop.f32.mrf.mxu0  ;;  %v5287_v19 = vld [vmem:[%s8149_s1 + $0x874] sm:$0xf] }
 0x129   :  { %3091 = vmatpush.bf16.msrb.mxu1 %v4215_v58  ;;  %v4244_v58 = vld [vmem:[%s8149_s1 + $0x6a8] sm:$0xf0]  ;;  %v2808_v5 = vadd.f32 %v2807_v63, %v7442_v23  ;;  %v4172_v23 = vld [vmem:[%s8149_s1 + $0x618] sm:$0xf0]  ;;  %v5303_v29 = vld [vmem:[%s8149_s1 + $0x8f4] sm:$0xf] }
 0x12a   :  { %3105 = vmatpush.bf16.msrb.mxu2 %v4279_v59  ;;  %v2834_v59 = vadd.f32 %v2833_v1, %v2820_v14  ;;  %v4247_v6 = vor.u32 %v5229_v55, %v4244_v58  ;;  %v4476_v14 = vld [vmem:[%s8149_s1 + $0x878] sm:$0xf0]  ;;  %v5319_v55 = vld [vmem:[%s8149_s1 + $0x974] sm:$0xf]  ;;  %v4404_v63 = vld [vmem:[%s8149_s1 + $0x7e8] sm:$0xf0] }
 0x12b   :  { %3119 = vmatpush.bf16.msrb.mxu3 %v4343_v0  ;;  %v2847_v0 = vpop.f32.mrf.mxu3  ;;  %v4604_v58 = vld [vmem:[%s8149_s1 + $0x978] sm:$0xf0] }
 0x12c   :  { %3078 = vmatpush.bf16.msrb.mxu0 %v4143_v8  ;;  %v7576_v48 = vadd.f32 %v2847_v0, %v2834_v59  ;;  %v2821_v8 = vpop.f32.mrf.mxu1  ;;  %v4543_v59 = vor.u32 %v5303_v29, %v4540_v39  ;;  %v5285_v0 = vld [vmem:[%s8149_s1 + $0x864] sm:$0xf]  ;;  %v5279_v39 = vld [vmem:[%s8149_s1 + $0x834] sm:$0xf] }
 0x12d   :  { %3092 = vmatpush.bf16.msrb.mxu1 %v4207_v9  ;;  %v5195_v9 = vld [vmem:[%s8149_s1 + $0x594] sm:$0xf]  ;;  %v2822_v11 = vadd.f32 %v2821_v8, %v2808_v5  ;;  %v4532_v5 = vld [vmem:[%s8149_s1 + $0x8e8] sm:$0xf0]  ;;  %v4407_v8 = vor.u32 %v5269_v62, %v4404_v63  ;;  %v5277_v63 = vld [vmem:[%s8149_s1 + $0x824] sm:$0xf] }
 0x12e   :  { %3106 = vmatpush.bf16.msrb.mxu2 %v4271_v60  ;;  %v4108_v60 = vld [vmem:[%s8149_s1 + $0x598] sm:$0xf0]  ;;  %v4372_v62 = vld [vmem:[%s8149_s1 + $0x7a8] sm:$0xf0] }
 0x12f   :  { %3120 = vmatpush.bf16.msrb.mxu3 %v4335_v35  ;;  %v4236_v35 = vld [vmem:[%s8149_s1 + $0x698] sm:$0xf0]  ;;  %v4111_v10 = vor.u32 %v5195_v9, %v4108_v60  ;;  %v5317_v9 = vld [vmem:[%s8149_s1 + $0x964] sm:$0xf]  ;;  %v4596_v60 = vld [vmem:[%s8149_s1 + $0x968] sm:$0xf0] }
 0x130   :  { %3079 = vmatpush.bf16.msrb.mxu0 %v4135_v17  ;;  %v4175_v17 = vor.u32 %v5211_v30, %v4172_v23  ;;  %v4239_v38 = vor.u32 %v5227_v7, %v4236_v35  ;;  %v2835_v22 = vpop.f32.mrf.mxu2  ;;  %v5267_v23 = vld [vmem:[%s8149_s1 + $0x7d4] sm:$0xf]  ;;  %v4396_v7 = vld [vmem:[%s8149_s1 + $0x7d8] sm:$0xf0] }
 0x131   :  { %3093 = vmatpush.bf16.msrb.mxu1 %v4199_v18  ;;  %v5209_v18 = vld [vmem:[%s8149_s1 + $0x604] sm:$0xf]  ;;  %v2836_v46 = vadd.f32 %v2835_v22, %v2822_v11  ;;  %v5283_v35 = vld [vmem:[%s8149_s1 + $0x854] sm:$0xf]  ;;  %v4460_v11 = vld [vmem:[%s8149_s1 + $0x858] sm:$0xf0] }
 0x132   :  { %3107 = vmatpush.bf16.msrb.mxu2 %v4263_v20  ;;  %v4164_v20 = vld [vmem:[%s8149_s1 + $0x608] sm:$0xf0] }
 0x133   :  { %3121 = vmatpush.bf16.msrb.mxu3 %v4327_v25  ;;  %v5271_v25 = vld [vmem:[%s8149_s1 + $0x7f4] sm:$0xf]  ;;  %v2849_v33 = vpop.f32.mrf.mxu3  ;;  %v4167_v40 = vor.u32 %v5209_v18, %v4164_v20  ;;  %v4452_v18 = vld [vmem:[%s8149_s1 + $0x848] sm:$0xf0]  ;;  %v5297_v20 = vld [vmem:[%s8149_s1 + $0x8c4] sm:$0xf] }
 0x134   :  { %3080 = vmatpush.bf16.msrb.mxu0 %v4127_v44  ;;  %v4103_v44 = vor.u32 %v5193_v16, %v4100_v2  ;;  %v7644_v52 = vadd.f32 %v2849_v33, %v2836_v46  ;;  %v4415_v1 = vor.u32 %v5271_v25, %v4412_v34  ;;  %v4588_v16 = vld [vmem:[%s8149_s1 + $0x958] sm:$0xf0]  ;;  %v4463_v2 = vor.u32 %v5283_v35, %v4460_v11  ;;  %v5313_v25 = vld [vmem:[%s8149_s1 + $0x944] sm:$0xf]  ;;  %v4580_v34 = vld [vmem:[%s8149_s1 + $0x948] sm:$0xf0] }
 0x135   :  { %3094 = vmatpush.bf16.msrb.mxu1 %v4191_v36  ;;  %v5241_v36 = vld [vmem:[%s8149_s1 + $0x704] sm:$0xf]  ;;  %v5263_v33 = vld [vmem:[%s8149_s1 + $0x7b4] sm:$0xf] }
 0x136   :  { %3108 = vmatpush.bf16.msrb.mxu2 %v4255_v49  ;;  %v4292_v49 = vld [vmem:[%s8149_s1 + $0x708] sm:$0xf0] }
 0x137   :  { %3122 = vmatpush.bf16.msrb.mxu3 %v4319_v54  ;;  %v4479_v54 = vor.u32 %v5287_v19, %v4476_v14  ;;  %v4295_v61 = vor.u32 %v5241_v36, %v4292_v49  ;;  %v4519_v14 = vor.u32 %v5297_v20, %v4516_v21  ;;  %v4444_v36 = vld [vmem:[%s8149_s1 + $0x838] sm:$0xf0]  ;;  %v5257_v20 = vld [vmem:[%s8149_s1 + $0x784] sm:$0xf]  ;;  %v4356_v21 = vld [vmem:[%s8149_s1 + $0x788] sm:$0xf0] }
 0x138   :  { %3081 = vmatpush.bf16.msrb.mxu0 %v4119_v3  ;;  %v4468_v3 = vld [vmem:[%s8149_s1 + $0x868] sm:$0xf0]  ;;  %v4508_v49 = vld [vmem:[%s8149_s1 + $0x8b8] sm:$0xf0] }
 0x139   :  { %3095 = vmatpush.bf16.msrb.mxu1 %v4183_v4  ;;  %v5301_v4 = vld [vmem:[%s8149_s1 + $0x8e4] sm:$0xf]  ;;  %v4471_v30 = vor.u32 %v5285_v0, %v4468_v3  ;;  %v4436_v0 = vld [vmem:[%s8149_s1 + $0x828] sm:$0xf0] }
 0x13a   :  { %3109 = vmatpush.bf16.msrb.mxu2 %v4247_v6  ;;  %v4607_v6 = vor.u32 %v5319_v55, %v4604_v58  ;;  %v4572_v55 = vld [vmem:[%s8149_s1 + $0x938] sm:$0xf0]  ;;  %v5261_v58 = vld [vmem:[%s8149_s1 + $0x7a4] sm:$0xf] }
 0x13b   :  { %3123 = vmatpush.bf16.msrb.mxu3 %v4311_v37  ;;  %v4535_v37 = vor.u32 %v5301_v4, %v4532_v5  ;;  %v5293_v4 = vld [vmem:[%s8149_s1 + $0x8a4] sm:$0xf]  ;;  %v4500_v5 = vld [vmem:[%s8149_s1 + $0x8a8] sm:$0xf0] }
 0x13c   :  { %3082 = vmatpush.bf16.msrb.mxu0 %v4111_v10  ;;  %v4599_v10 = vor.u32 %v5317_v9, %v4596_v60 }
 0x13d   :  { %3096 = vmatpush.bf16.msrb.mxu1 %v4175_v17  ;;  %v4527_v17 = vor.u32 %v5299_v12, %v4524_v15  ;;  %v4503_v12 = vor.u32 %v5293_v4, %v4500_v5  ;;  %v5333_v5 = vld [vmem:[%s8149_s1 + $0x9e4] sm:$0xf] }
 0x13e   :  { %3110 = vmatpush.bf16.msrb.mxu2 %v4239_v38  ;;  %v5281_v38 = vld [vmem:[%s8149_s1 + $0x844] sm:$0xf] }
 0x13f   :  { %3124 = vmatpush.bf16.msrb.mxu3 %v4303_v13  ;;  %v4455_v19 = vor.u32 %v5281_v38, %v4452_v18  ;;  %v4556_v18 = vld [vmem:[%s8149_s1 + $0x918] sm:$0xf0] }
 0x140   :  { %3083 = vmatpush.bf16.msrb.mxu0 %v4103_v44  ;;  %v2861_v13 = vpop.f32.mrf.mxu0  ;;  %v4380_v44 = vld [vmem:[%s8149_s1 + $0x7b8] sm:$0xf0] }
 0x141   :  { %3097 = vmatpush.bf16.msrb.mxu1 %v4167_v40  ;;  %v2862_v46 = vadd.f32 %v2861_v13, %v7576_v48  ;;  %v2875_v29 = vpop.f32.mrf.mxu1  ;;  %v5295_v48 = vld [vmem:[%s8149_s1 + $0x8b4] sm:$0xf] }
 0x142   :  { %3111 = vmatpush.bf16.msrb.mxu2 %v4231_v53  ;;  %v4583_v53 = vor.u32 %v5313_v25, %v4580_v34  ;;  %v4420_v25 = vld [vmem:[%s8149_s1 + $0x808] sm:$0xf0]  ;;  %v5289_v34 = vld [vmem:[%s8149_s1 + $0x884] sm:$0xf] }
 0x143   :  { %3125 = vmatpush.bf16.msrb.mxu3 %v4295_v61  ;;  %3084 = vmatmul.bf16.vlgmr.msrb.gmra.mxu0 %v6164_v41  ;;  %v4399_v41 = vor.u32 %v5267_v23, %v4396_v7  ;;  %v2876_v40 = vadd.f32 %v2875_v29, %v2862_v46  ;;  %v4511_v61 = vor.u32 %v5295_v48, %v4508_v49  ;;  %v5309_v23 = vld [vmem:[%s8149_s1 + $0x924] sm:$0xf]  ;;  %v4564_v7 = vld [vmem:[%s8149_s1 + $0x928] sm:$0xf0]  ;;  %v4668_v29 = vld [vmem:[%s8149_s1 + $0x9f8] sm:$0xf0] }
 0x144   :  { %3132 = vmatpush.bf16.msra.mxu0 %v4415_v1  ;;  %3098 = vmatmul.bf16.vlgmr.msrb.gmra.mxu1 %v6371_v31  ;;  %v5265_v31 = vld [vmem:[%s8149_s1 + $0x7c4] sm:$0xf]  ;;  %v4383_v1 = vor.u32 %v5263_v33, %v4380_v44  ;;  %v5367_v48 = vld [vmem:[%s8149_s1 + $0xaf4] sm:$0xf] }
 0x145   :  { %3146 = vmatpush.bf16.msra.mxu1 %v4479_v54  ;;  %3112 = vmatmul.bf16.vlgmr.msrb.gmra.mxu2 %v6384_v42  ;;  %v5315_v42 = vld [vmem:[%s8149_s1 + $0x954] sm:$0xf] }
 0x146   :  { %3160 = vmatpush.bf16.msra.mxu2 %v4543_v59  ;;  %3126 = vmatmul.bf16.vlgmr.msrb.gmra.mxu3 %v6373_v32  ;;  %v4388_v32 = vld [vmem:[%s8149_s1 + $0x7c8] sm:$0xf0]  ;;  %v4591_v22 = vor.u32 %v5315_v42, %v4588_v16  ;;  %v5311_v54 = vld [vmem:[%s8149_s1 + $0x934] sm:$0xf]  ;;  %v4447_v59 = vor.u32 %v5279_v39, %v4444_v36  ;;  %v4732_v36 = vld [vmem:[%s8149_s1 + $0xa78] sm:$0xf0] }
 0x147   :  { %3174 = vmatpush.bf16.msra.mxu3 %v4607_v6  ;;  %v4391_v24 = vor.u32 %v5265_v31, %v4388_v32  ;;  %v5275_v42 = vld [vmem:[%s8149_s1 + $0x814] sm:$0xf]  ;;  %v4567_v31 = vor.u32 %v5309_v23, %v4564_v7  ;;  %v5381_v7 = vld [vmem:[%s8149_s1 + $0xb64] sm:$0xf] }
 0x148   :  { %3133 = vmatpush.bf16.msra.mxu0 %v4407_v8  ;;  %v2889_v3 = vpop.f32.mrf.mxu2  ;;  %v4575_v8 = vor.u32 %v5311_v54, %v4572_v55  ;;  %v2863_v9 = vpop.f32.mrf.mxu0  ;;  %v5291_v16 = vld [vmem:[%s8149_s1 + $0x894] sm:$0xf]  ;;  %v4548_v54 = vld [vmem:[%s8149_s1 + $0x908] sm:$0xf0] }
 0x149   :  { %3147 = vmatpush.bf16.msra.mxu1 %v4471_v30  ;;  %v2890_v6 = vadd.f32 %v2889_v3, %v2876_v40  ;;  %v2903_v60 = vpop.f32.mrf.mxu3  ;;  %v4375_v30 = vor.u32 %v5261_v58, %v4372_v62  ;;  %v2864_v35 = vadd.f32 %v2863_v9, %v7644_v52  ;;  %v2877_v15 = vpop.f32.mrf.mxu1  ;;  %v4428_v52 = vld [vmem:[%s8149_s1 + $0x818] sm:$0xf0]  ;;  %v5307_v32 = vld [vmem:[%s8149_s1 + $0x914] sm:$0xf]  ;;  %v4359_v40 = vor.u32 %v5257_v20, %v4356_v21  ;;  %v4724_v9 = vld [vmem:[%s8149_s1 + $0xa68] sm:$0xf0] }
 0x14a   :  { %3161 = vmatpush.bf16.msra.mxu2 %v4535_v37  ;;  %v4439_v37 = vor.u32 %v5277_v63, %v4436_v0  ;;  %v4559_v44 = vor.u32 %v5307_v32, %v4556_v18  ;;  %v5351_v39 = vld [vmem:[%s8149_s1 + $0xa74] sm:$0xf]  ;;  %v4860_v0 = vld [vmem:[%s8149_s1 + $0xb78] sm:$0xf0]  ;;  %v5345_v18 = vld [vmem:[%s8149_s1 + $0xa44] sm:$0xf] }
 0x14b   :  { %3175 = vmatpush.bf16.msra.mxu3 %v4599_v10  ;;  %v7778_v11 = vadd.f32 %v2903_v60, %v2890_v6  ;;  %v5259_v10 = vld [vmem:[%s8149_s1 + $0x794] sm:$0xf]  ;;  %v4735_v62 = vor.u32 %v5351_v39, %v4732_v36  ;;  %v4660_v6 = vld [vmem:[%s8149_s1 + $0x9e8] sm:$0xf0]  ;;  %v5365_v60 = vld [vmem:[%s8149_s1 + $0xae4] sm:$0xf] }
 0x14c   :  { %3134 = vmatpush.bf16.msra.mxu0 %v4399_v41  ;;  %v4364_v41 = vld [vmem:[%s8149_s1 + $0x798] sm:$0xf0]  ;;  %v5383_v63 = vld [vmem:[%s8149_s1 + $0xb74] sm:$0xf]  ;;  %v4663_v23 = vor.u32 %v5333_v5, %v4660_v6  ;;  %v4708_v20 = vld [vmem:[%s8149_s1 + $0xa48] sm:$0xf0] }
 0x14d   :  { %3148 = vmatpush.bf16.msra.mxu1 %v4463_v2  ;;  %v4492_v2 = vld [vmem:[%s8149_s1 + $0x898] sm:$0xf0]  ;;  %v4367_v38 = vor.u32 %v5259_v10, %v4364_v41  ;;  %v5331_v10 = vld [vmem:[%s8149_s1 + $0x9d4] sm:$0xf]  ;;  %v5361_v21 = vld [vmem:[%s8149_s1 + $0xac4] sm:$0xf] }
 0x14e   :  { %3162 = vmatpush.bf16.msra.mxu2 %v4527_v17  ;;  %v2878_v17 = vadd.f32 %v2877_v15, %v2864_v35  ;;  %v4495_v13 = vor.u32 %v5291_v16, %v4492_v2  ;;  %v4852_v35 = vld [vmem:[%s8149_s1 + $0xb68] sm:$0xf0]  ;;  %v4652_v41 = vld [vmem:[%s8149_s1 + $0x9d8] sm:$0xf0]  ;;  %v5363_v16 = vld [vmem:[%s8149_s1 + $0xad4] sm:$0xf] }
 0x14f   :  { %3176 = vmatpush.bf16.msra.mxu3 %v4591_v22  ;;  %v4431_v22 = vor.u32 %v5275_v42, %v4428_v52  ;;  %v5347_v42 = vld [vmem:[%s8149_s1 + $0xa54] sm:$0xf]  ;;  %v4716_v52 = vld [vmem:[%s8149_s1 + $0xa58] sm:$0xf0] }
 0x150   :  { %3135 = vmatpush.bf16.msra.mxu0 %v4391_v24  ;;  %v5273_v24 = vld [vmem:[%s8149_s1 + $0x804] sm:$0xf]  ;;  %v2891_v46 = vpop.f32.mrf.mxu2  ;;  %v4780_v2 = vld [vmem:[%s8149_s1 + $0xad8] sm:$0xf0]  ;;  %v4719_v32 = vor.u32 %v5347_v42, %v4716_v52  ;;  %v5343_v39 = vld [vmem:[%s8149_s1 + $0xa34] sm:$0xf] }
 0x151   :  { %3149 = vmatpush.bf16.msra.mxu1 %v4455_v19  ;;  %v4484_v19 = vld [vmem:[%s8149_s1 + $0x888] sm:$0xf0]  ;;  %v2892_v33 = vadd.f32 %v2891_v46, %v2878_v17  ;;  %v2905_v49 = vpop.f32.mrf.mxu3  ;;  %v4423_v58 = vor.u32 %v5273_v24, %v4420_v25  ;;  %v4855_v17 = vor.u32 %v5381_v7, %v4852_v35  ;;  %v4700_v36 = vld [vmem:[%s8149_s1 + $0xa38] sm:$0xf0]  ;;  %v5339_v35 = vld [vmem:[%s8149_s1 + $0xa14] sm:$0xf] }
 0x152   :  { %3163 = vmatpush.bf16.msra.mxu2 %v4519_v14  ;;  %v5335_v14 = vld [vmem:[%s8149_s1 + $0x9f4] sm:$0xf]  ;;  %v4836_v46 = vld [vmem:[%s8149_s1 + $0xb48] sm:$0xf0]  ;;  %v4620_v7 = vld [vmem:[%s8149_s1 + $0x998] sm:$0xf0] }
 0x153   :  { %3177 = vmatpush.bf16.msra.mxu3 %v4583_v53  ;;  %v4796_v53 = vld [vmem:[%s8149_s1 + $0xaf8] sm:$0xf0]  ;;  %v7846_v55 = vadd.f32 %v2905_v49, %v2892_v33  ;;  %v5327_v33 = vld [vmem:[%s8149_s1 + $0x9b4] sm:$0xf] }
 0x154   :  { %3136 = vmatpush.bf16.msra.mxu0 %v4383_v1  ;;  %v5305_v1 = vld [vmem:[%s8149_s1 + $0x904] sm:$0xf]  ;;  %v4799_v3 = vor.u32 %v5367_v48, %v4796_v53  ;;  %v4764_v48 = vld [vmem:[%s8149_s1 + $0xab8] sm:$0xf0]  ;;  %v5375_v53 = vld [vmem:[%s8149_s1 + $0xb34] sm:$0xf] }
 0x155   :  { %3150 = vmatpush.bf16.msra.mxu1 %v4447_v59  ;;  %v4487_v59 = vor.u32 %v5289_v34, %v4484_v19  ;;  %v4551_v4 = vor.u32 %v5305_v1, %v4548_v54  ;;  %v5377_v34 = vld [vmem:[%s8149_s1 + $0xb44] sm:$0xf]  ;;  %v4828_v1 = vld [vmem:[%s8149_s1 + $0xb38] sm:$0xf0]  ;;  %v4703_v54 = vor.u32 %v5343_v39, %v4700_v36  ;;  %v5371_v42 = vld [vmem:[%s8149_s1 + $0xb14] sm:$0xf] }
 0x156   :  { %3164 = vmatpush.bf16.msra.mxu2 %v4511_v61  ;;  %v4671_v61 = vor.u32 %v5335_v14, %v4668_v29  ;;  %v4711_v14 = vor.u32 %v5345_v18, %v4708_v20  ;;  %v4839_v49 = vor.u32 %v5377_v34, %v4836_v46  ;;  %v4812_v52 = vld [vmem:[%s8149_s1 + $0xb18] sm:$0xf0]  ;;  %v5415_v20 = vld [vmem:[%s8149_s1 + $0xc74] sm:$0xf]  ;;  %v5413_v39 = vld [vmem:[%s8149_s1 + $0xc64] sm:$0xf] }
 0x157   :  { %3178 = vmatpush.bf16.msra.mxu3 %v4575_v8  ;;  %v5349_v8 = vld [vmem:[%s8149_s1 + $0xa64] sm:$0xf]  ;;  %v4924_v18 = vld [vmem:[%s8149_s1 + $0xbf8] sm:$0xf0]  ;;  %v4980_v36 = vld [vmem:[%s8149_s1 + $0xc68] sm:$0xf0] }
 0x158   :  { %3137 = vmatpush.bf16.msra.mxu0 %v4375_v30  ;;  %v4788_v30 = vld [vmem:[%s8149_s1 + $0xae8] sm:$0xf0] }
 0x159   :  { %3151 = vmatpush.bf16.msra.mxu1 %v4439_v37  ;;  %v4863_v37 = vor.u32 %v5383_v63, %v4860_v0  ;;  %v4791_v15 = vor.u32 %v5365_v60, %v4788_v30  ;;  %v4692_v63 = vld [vmem:[%s8149_s1 + $0xa28] sm:$0xf0]  ;;  %v5357_v0 = vld [vmem:[%s8149_s1 + $0xaa4] sm:$0xf] }
 0x15a   :  { %3165 = vmatpush.bf16.msra.mxu2 %v4503_v12  ;;  %v4727_v12 = vor.u32 %v5349_v8, %v4724_v9  ;;  %v5373_v8 = vld [vmem:[%s8149_s1 + $0xb24] sm:$0xf]  ;;  %v4820_v9 = vld [vmem:[%s8149_s1 + $0xb28] sm:$0xf0] }
 0x15b   :  { %3179 = vmatpush.bf16.msra.mxu3 %v4567_v31  ;;  %v4844_v31 = vld [vmem:[%s8149_s1 + $0xb58] sm:$0xf0] }
 0x15c   :  { %3138 = vmatpush.bf16.msra.mxu0 %v4367_v38  ;;  %v4783_v38 = vor.u32 %v5363_v16, %v4780_v2  ;;  %v5321_v16 = vld [vmem:[%s8149_s1 + $0x984] sm:$0xf] }
 0x15d   :  { %3152 = vmatpush.bf16.msra.mxu1 %v4431_v22  ;;  %v4772_v22 = vld [vmem:[%s8149_s1 + $0xac8] sm:$0xf0] }
 0x15e   :  { %3166 = vmatpush.bf16.msra.mxu2 %v4495_v13  ;;  %v4775_v29 = vor.u32 %v5361_v21, %v4772_v22  ;;  %v4988_v21 = vld [vmem:[%s8149_s1 + $0xc78] sm:$0xf0] }
 0x15f   :  { %3180 = vmatpush.bf16.msra.mxu3 %v4559_v44  ;;  %v4636_v44 = vld [vmem:[%s8149_s1 + $0x9b8] sm:$0xf0] }
 0x160   :  { %3139 = vmatpush.bf16.msra.mxu0 %v4359_v40  ;;  %v2917_v24 = vpop.f32.mrf.mxu0  ;;  %v4639_v40 = vor.u32 %v5327_v33, %v4636_v44  ;;  %v5397_v33 = vld [vmem:[%s8149_s1 + $0xbe4] sm:$0xf]  ;;  %v4916_v44 = vld [vmem:[%s8149_s1 + $0xbe8] sm:$0xf0] }
 0x161   :  { %3153 = vmatpush.bf16.msra.mxu1 %v4423_v58  ;;  %v7931_v19 = vadd.f32 %v2917_v24, %v7778_v11  ;;  %v5359_v11 = vld [vmem:[%s8149_s1 + $0xab4] sm:$0xf]  ;;  %v4804_v24 = vld [vmem:[%s8149_s1 + $0xb08] sm:$0xf0] }
 0x162   :  { %3167 = vmatpush.bf16.msra.mxu2 %v4487_v59  ;;  %v4767_v58 = vor.u32 %v5359_v11, %v4764_v48  ;;  %v5325_v59 = vld [vmem:[%s8149_s1 + $0x9a4] sm:$0xf]  ;;  %v4919_v11 = vor.u32 %v5397_v33, %v4916_v44  ;;  %v4983_v48 = vor.u32 %v5413_v39, %v4980_v36 }
 0x163   :  { %3181 = vmatpush.bf16.msra.mxu3 %v4551_v4  ;;  %3140 = vmatmul.bf16.vlgmr.msra.gmra.mxu0 %v6386_v43  ;;  %v4655_v43 = vor.u32 %v5331_v10, %v4652_v41  ;;  %v4831_v4 = vor.u32 %v5375_v53, %v4828_v1  ;;  %v4823_v10 = vor.u32 %v5373_v8, %v4820_v9  ;;  %v5411_v53 = vld [vmem:[%s8149_s1 + $0xc54] sm:$0xf]  ;;  %v4884_v8 = vld [vmem:[%s8149_s1 + $0xba8] sm:$0xf0]  ;;  %v5405_v9 = vld [vmem:[%s8149_s1 + $0xc24] sm:$0xf] }
 0x164   :  { %3188 = vmatpush.bf16.msrb.mxu0 %v4671_v61  ;;  %3154 = vmatmul.bf16.vlgmr.msra.gmra.mxu1 %v6599_v50  ;;  %v5329_v50 = vld [vmem:[%s8149_s1 + $0x9c4] sm:$0xf]  ;;  %v4628_v61 = vld [vmem:[%s8149_s1 + $0x9a8] sm:$0xf0]  ;;  %vm3272_vm0 = vcmp.ge.f32.partialorder %v7931_v19, 0.0 }
 0x165   :  { %3202 = vmatpush.bf16.msrb.mxu1 %v4735_v62  ;;  %3168 = vmatmul.bf16.vlgmr.msra.gmra.mxu2 %v6612_v56  ;;  %v5379_v56 = vld [vmem:[%s8149_s1 + $0xb54] sm:$0xf]  ;;  %v5341_v62 = vld [vmem:[%s8149_s1 + $0xa24] sm:$0xf]  ;;  %v4631_v6 = vor.u32 %v5325_v59, %v4628_v61 }
 0x166   :  { %3216 = vmatpush.bf16.msrb.mxu2 %v4799_v3  ;;  %3182 = vmatmul.bf16.vlgmr.msra.gmra.mxu3 %v6601_v51  ;;  %v4644_v51 = vld [vmem:[%s8149_s1 + $0x9c8] sm:$0xf0]  ;;  %v4847_v13 = vor.u32 %v5379_v56, %v4844_v31  ;;  %v4695_v30 = vor.u32 %v5341_v62, %v4692_v63  ;;  %v5337_v56 = vld [vmem:[%s8149_s1 + $0xa04] sm:$0xf]  ;;  %v5391_v62 = vld [vmem:[%s8149_s1 + $0xbb4] sm:$0xf] }
 0x167   :  { %3230 = vmatpush.bf16.msrb.mxu3 %v4863_v37  ;;  %v4647_v25 = vor.u32 %v5329_v50, %v4644_v51  ;;  %v4756_v3 = vld [vmem:[%s8149_s1 + $0xaa8] sm:$0xf0]  ;;  %v5399_v50 = vld [vmem:[%s8149_s1 + $0xbf4] sm:$0xf]  ;;  %v4815_v51 = vor.u32 %v5371_v42, %v4812_v52  ;;  %v4892_v63 = vld [vmem:[%s8149_s1 + $0xbb8] sm:$0xf0] }
 0x168   :  { %3189 = vmatpush.bf16.msrb.mxu0 %v4663_v23  ;;  %v2919_v5 = vpop.f32.mrf.mxu0  ;;  %v4759_v37 = vor.u32 %v5357_v0, %v4756_v3  ;;  %v5323_v23 = vld [vmem:[%s8149_s1 + $0x994] sm:$0xf]  ;;  %v4676_v31 = vld [vmem:[%s8149_s1 + $0xa08] sm:$0xf0]  ;;  %v4927_v46 = vor.u32 %v5399_v50, %v4924_v18  ;;  %v4956_v3 = vld [vmem:[%s8149_s1 + $0xc38] sm:$0xf0] }
 0x169   :  { %3203 = vmatpush.bf16.msrb.mxu1 %v4727_v12  ;;  %v7982_v60 = vadd.f32 %v2919_v5, %v7846_v55  ;;  %v4684_v12 = vld [vmem:[%s8149_s1 + $0xa18] sm:$0xf0]  ;;  %v5355_v55 = vld [vmem:[%s8149_s1 + $0xa94] sm:$0xf]  ;;  %v4623_v41 = vor.u32 %v5323_v23, %v4620_v7  ;;  %v4868_v42 = vld [vmem:[%s8149_s1 + $0xb88] sm:$0xf0] }
 0x16a   :  { %3217 = vmatpush.bf16.msrb.mxu2 %v4791_v15  ;;  %v4748_v15 = vld [vmem:[%s8149_s1 + $0xa98] sm:$0xf0]  ;;  %v4687_v2 = vor.u32 %v5339_v35, %v4684_v12  ;;  %v5407_v0 = vld [vmem:[%s8149_s1 + $0xc34] sm:$0xf]  ;;  %v5401_v52 = vld [vmem:[%s8149_s1 + $0xc04] sm:$0xf] }
 0x16b   :  { %3231 = vmatpush.bf16.msrb.mxu3 %v4855_v17  ;;  %v4751_v17 = vor.u32 %v5355_v55, %v4748_v15  ;;  %v4959_v5 = vor.u32 %v5407_v0, %v4956_v3  ;;  %v5387_v7 = vld [vmem:[%s8149_s1 + $0xb94] sm:$0xf]  ;;  %v4876_v35 = vld [vmem:[%s8149_s1 + $0xb98] sm:$0xf0]  ;;  %vm3274_vm2 = vcmp.ge.f32.partialorder %v7982_v60, 0.0 }
 0x16c   :  { %3190 = vmatpush.bf16.msrb.mxu0 %v4655_v43  ;;  %v4612_v43 = vld [vmem:[%s8149_s1 + $0x988] sm:$0xf0]  ;;  %v5403_v12 = vld [vmem:[%s8149_s1 + $0xc14] sm:$0xf]  ;;  %v4940_v55 = vld [vmem:[%s8149_s1 + $0xc18] sm:$0xf0]  ;;  %v4879_v15 = vor.u32 %v5387_v7, %v4876_v35 }
 0x16d   :  { %3204 = vmatpush.bf16.msrb.mxu1 %v4719_v32  ;;  %v5353_v32 = vld [vmem:[%s8149_s1 + $0xa84] sm:$0xf]  ;;  %v4615_v22 = vor.u32 %v5321_v16, %v4612_v43  ;;  %v4932_v16 = vld [vmem:[%s8149_s1 + $0xc08] sm:$0xf0]  ;;  %v2931_v43 = vpop.f32.mrf.mxu1 }
 0x16e   :  { %3218 = vmatpush.bf16.msrb.mxu2 %v4783_v38  ;;  %v4740_v38 = vld [vmem:[%s8149_s1 + $0xa88] sm:$0xf0] }
 0x16f   :  { %3232 = vmatpush.bf16.msrb.mxu3 %v4847_v13  ;;  %v5369_v13 = vld [vmem:[%s8149_s1 + $0xb04] sm:$0xf]  ;;  %v4743_v34 = vor.u32 %v5353_v32, %v4740_v38  ;;  %v2959_v32 = vpop.f32.mrf.mxu3 }
 0x170   :  { %3191 = vmatpush.bf16.msrb.mxu0 %v4647_v25  ;;  %v4679_v25 = vor.u32 %v5337_v56, %v4676_v31  ;;  %v2945_v56 = vpop.f32.mrf.mxu2 }
 0x171   :  { %3205 = vmatpush.bf16.msrb.mxu1 %v4711_v14  ;;  %v4991_v14 = vor.u32 %v5415_v20, %v4988_v21 }
 0x172   :  { %3219 = vmatpush.bf16.msrb.mxu2 %v4775_v29  ;;  %v4807_v29 = vor.u32 %v5369_v13, %v4804_v24  ;;  %v5417_v24 = vld [vmem:[%s8151_s2] sm:$0x3] }
 0x173   :  { %3233 = vmatpush.bf16.msrb.mxu3 %v4839_v49  ;;  %v5395_v49 = vld [vmem:[%s8149_s1 + $0xbd4] sm:$0xf] }
 0x174   :  { %3192 = vmatpush.bf16.msrb.mxu0 %v4639_v40  ;;  %v4908_v40 = vld [vmem:[%s8149_s1 + $0xbd8] sm:$0xf0] }
 0x175   :  { %3206 = vmatpush.bf16.msrb.mxu1 %v4703_v54  ;;  %v4911_v1 = vor.u32 %v5395_v49, %v4908_v40  ;;  %v2933_v31 = vpop.f32.mrf.mxu1 }
 0x176   :  { %3220 = vmatpush.bf16.msrb.mxu2 %v4767_v58  ;;  %v5409_v58 = vld [vmem:[%s8149_s1 + $0xc44] sm:$0xf] }
 0x177   :  { %3234 = vmatpush.bf16.msrb.mxu3 %v4831_v4  ;;  %v4895_v4 = vor.u32 %v5391_v62, %v4892_v63  ;;  %v2961_v18 = vpop.f32.mrf.mxu3 }
 0x178   :  { %3193 = vmatpush.bf16.msrb.mxu0 %v4631_v6  ;;  %v5389_v6 = vld [vmem:[%s8149_s1 + $0xba4] sm:$0xf]  ;;  %v2947_v38 = vpop.f32.mrf.mxu2 }
 0x179   :  { %3207 = vmatpush.bf16.msrb.mxu1 %v4695_v30  ;;  %v4948_v30 = vld [vmem:[%s8149_s1 + $0xc28] sm:$0xf0] }
 0x17a   :  { %3221 = vmatpush.bf16.msrb.mxu2 %v4759_v37  ;;  %v4887_v37 = vor.u32 %v5389_v6, %v4884_v8  ;;  %v4951_v23 = vor.u32 %v5405_v9, %v4948_v30 }
 0x17b   :  { %3235 = vmatpush.bf16.msrb.mxu3 %v4823_v10  ;;  %v4943_v10 = vor.u32 %v5403_v12, %v4940_v55 }
 0x17c   :  { %3194 = vmatpush.bf16.msrb.mxu0 %v4623_v41  ;;  %v5385_v41 = vld [vmem:[%s8149_s1 + $0xb84] sm:$0xf] }
 0x17d   :  { %3208 = vmatpush.bf16.msrb.mxu1 %v4687_v2  ;;  %v4871_v2 = vor.u32 %v5385_v41, %v4868_v42 }
 0x17e   :  { %3222 = vmatpush.bf16.msrb.mxu2 %v4751_v17  ;;  %v4935_v17 = vor.u32 %v5401_v52, %v4932_v16 }
 0x17f   :  { %3236 = vmatpush.bf16.msrb.mxu3 %v4815_v51 }
 0x180   :  { %3195 = vmatpush.bf16.msrb.mxu0 %v4615_v22  ;;  %v2973_v50 = vpop.f32.mrf.mxu0 }
 0x181   :  { %3209 = vmatpush.bf16.msrb.mxu1 %v4679_v25  ;;  %v2987_v51 = vpop.f32.mrf.mxu1  ;;  %v443_v25 = vperm.slane %v5417_v24, 1 }
 0x182   :  { %3223 = vmatpush.bf16.msrb.mxu2 %v4743_v34 }
 0x183   :  { %3237 = vmatpush.bf16.msrb.mxu3 %v4807_v29  ;;  %3196 = vmatmul.bf16.vlgmr.msrb.gmra.mxu0 %v6614_v57  ;;  %v4972_v57 = vld [vmem:[%s8149_s1 + $0xc58] sm:$0xf0]  ;;  %v2934_v36 = vadd.f32 %v2933_v31, %v443_v25 }
 0x184   :  { %3244 = vmatpush.bf16.msra.mxu0 %v4927_v46  ;;  %3210 = vmatmul.bf16.vlgmr.msrb.gmra.mxu1 %v6835_v27  ;;  %v4975_v54 = vor.u32 %v5411_v53, %v4972_v57  ;;  %v4900_v27 = vld [vmem:[%s8149_s1 + $0xbc8] sm:$0xf0] }
 0x185   :  { %3258 = vmatpush.bf16.msra.mxu1 %v4991_v14  ;;  %3224 = vmatmul.bf16.vlgmr.msrb.gmra.mxu2 %v6850_v45  ;;  %v5393_v45 = vld [vmem:[%s8149_s1 + $0xbc4] sm:$0xf]  ;;  %v2948_v40 = vadd.f32 %v2947_v38, %v2934_v36 }
 0x186   :  { %3238 = vmatmul.bf16.vlgmr.msrb.gmra.mxu3 %v6837_v28  ;;  %v4964_v28 = vld [vmem:[%s8149_s1 + $0xc48] sm:$0xf0]  ;;  %v4903_v59 = vor.u32 %v5393_v45, %v4900_v27 }
 0x187   :  { %v4967_v61 = vor.u32 %v5409_v58, %v4964_v28 }
 0x188   :  { %3245 = vmatpush.bf16.msra.mxu0 %v4919_v11  ;;  %v3001_v20 = vpop.f32.mrf.mxu2  ;;  %v2975_v21 = vpop.f32.mrf.mxu0 }
 0x189   :  { %3259 = vmatpush.bf16.msra.mxu1 %v4983_v48  ;;  %v2989_v22 = vpop.f32.mrf.mxu1  ;;  %v3015_v13 = vpop.f32.mrf.mxu3 }
 0x18c   :  { %3246 = vmatpush.bf16.msra.mxu0 %v4911_v1 }
 0x18d   :  { %3260 = vmatpush.bf16.msra.mxu1 %v4975_v54  ;;  %v2962_v54 = vadd.f32 %v2961_v18, %v2948_v40 }
 0x18f   :  { %v2976_v58 = vadd.f32 %v2975_v21, %v2962_v54 }
 0x190   :  { %3247 = vmatpush.bf16.msra.mxu0 %v4903_v59  ;;  %v3003_v34 = vpop.f32.mrf.mxu2 }
 0x191   :  { %3261 = vmatpush.bf16.msra.mxu1 %v4967_v61  ;;  %v3017_v29 = vpop.f32.mrf.mxu3  ;;  %v2990_v61 = vadd.f32 %v2989_v22, %v2976_v58 }
 0x193   :  { %v3004_v0 = vadd.f32 %v3003_v34, %v2990_v61 }
 0x194   :  { %3248 = vmatpush.bf16.msra.mxu0 %v4895_v4 }
 0x195   :  { %3262 = vmatpush.bf16.msra.mxu1 %v4959_v5  ;;  %v3018_v8 = vadd.f32 %v3017_v29, %v3004_v0 }
 0x198   :  { %3249 = vmatpush.bf16.msra.mxu0 %v4887_v37 }
 0x199   :  { %3263 = vmatpush.bf16.msra.mxu1 %v4951_v23 }
 0x19c   :  { %3250 = vmatpush.bf16.msra.mxu0 %v4879_v15 }
 0x19d   :  { %3264 = vmatpush.bf16.msra.mxu1 %v4943_v10 }
 0x1a0   :  { %3251 = vmatpush.bf16.msra.mxu0 %v4871_v2 }
 0x1a1   :  { %3265 = vmatpush.bf16.msra.mxu1 %v4935_v17  ;;  %v3043_v46 = vpop.f32.mrf.mxu1 }
 0x1a3   :  { %3252 = vmatmul.bf16.vlgmr.msra.gmra.mxu0 %v6852_v47  ;;  %v2932_v47 = vadd.f32 %v2931_v43, %v443_v25 }
 0x1a4   :  { %3266 = vmatmul.bf16.vlgmr.msra.gmra.mxu1 %v7056_v26  ;;  %v3029_v26 = vpop.f32.mrf.mxu0 }
 0x1a5   :  { %v2946_v14 = vadd.f32 %v2945_v56, %v2932_v47 }
 0x1a7   :  { %v2960_v33 = vadd.f32 %v2959_v32, %v2946_v14 }
 0x1a8   :  { %v3057_v44 = vpop.f32.mrf.mxu2 }
 0x1a9   :  { %v2974_v11 = vadd.f32 %v2973_v50, %v2960_v33  ;;  %v3045_v48 = vpop.f32.mrf.mxu1  ;;  %v3071_v49 = vpop.f32.mrf.mxu3 }
 0x1ab   :  { %v2988_v53 = vadd.f32 %v2987_v51, %v2974_v11 }
 0x1ac   :  { %v3031_v39 = vpop.f32.mrf.mxu0 }
 0x1ad   :  { %v3002_v45 = vadd.f32 %v3001_v20, %v2988_v53  ;;  %v3032_v30 = vadd.f32 %v3031_v39, %v3018_v8 }
 0x1af   :  { %v3016_v59 = vadd.f32 %v3015_v13, %v3002_v45  ;;  %v3046_v35 = vadd.f32 %v3045_v48, %v3032_v30  ;;  %v3276_v45 = vmul.f32 0.1, %v7931_v19 }
 0x1b0   :  { %v3059_v57 = vpop.f32.mrf.mxu2 }
 0x1b1   :  { %v3073_v28 = vpop.f32.mrf.mxu3  ;;  %v3030_v62 = vadd.f32 %v3029_v26, %v3016_v59  ;;  %v3060_v15 = vadd.f32 %v3059_v57, %v3046_v35  ;;  %v3280_v61 = vsel %vm3272_vm0, %v7931_v19, %v3276_v45 }
 0x1b3   :  { %v3044_v4 = vadd.f32 %v3043_v46, %v3030_v62  ;;  %v3074_v42 = vadd.f32 %v3073_v28, %v3060_v15 }
 0x1b5   :  { %v3058_v9 = vadd.f32 %v3057_v44, %v3044_v4 }
 0x1b7   :  { %v3072_v37 = vadd.f32 %v3071_v49, %v3058_v9 }
 0x1c0   :  { %v3085_v1 = vpop.f32.mrf.mxu0 }
 0x1c1   :  { %v3099_v27 = vpop.f32.mrf.mxu1  ;;  %v3086_v12 = vadd.f32 %v3085_v1, %v3072_v37 }
 0x1c3   :  { %v3100_v41 = vadd.f32 %v3099_v27, %v3086_v12 }
 0x1c8   :  { %v3113_v63 = vpop.f32.mrf.mxu2  ;;  %v3087_v3 = vpop.f32.mrf.mxu0 }
 0x1c9   :  { %v3101_v5 = vpop.f32.mrf.mxu1  ;;  %v3127_v6 = vpop.f32.mrf.mxu3  ;;  %v3114_v52 = vadd.f32 %v3113_v63, %v3100_v41  ;;  %v3088_v2 = vadd.f32 %v3087_v3, %v3074_v42 }
 0x1cb   :  { %v3128_v43 = vadd.f32 %v3127_v6, %v3114_v52  ;;  %v3102_v32 = vadd.f32 %v3101_v5, %v3088_v2  ;;  %v3278_v6 = vmul.f32 0.1, %v7982_v60 }
 0x1cd   :  { %v3282_v30 = vsel %vm3274_vm2, %v7982_v60, %v3278_v6 }
 0x1d0   :  { %v3115_v23 = vpop.f32.mrf.mxu2 }
 0x1d1   :  { %v3129_v10 = vpop.f32.mrf.mxu3  ;;  %v3116_v50 = vadd.f32 %v3115_v23, %v3102_v32 }
 0x1d3   :  { %v3130_v21 = vadd.f32 %v3129_v10, %v3116_v50 }
 0x1e0   :  { %v3141_v7 = vpop.f32.mrf.mxu0 }
 0x1e1   :  { %v3155_v55 = vpop.f32.mrf.mxu1  ;;  %v3142_v38 = vadd.f32 %v3141_v7, %v3128_v43 }
 0x1e3   :  { %v3156_v51 = vadd.f32 %v3155_v55, %v3142_v38 }
 0x1e8   :  { %v3169_v16 = vpop.f32.mrf.mxu2  ;;  %v3143_v17 = vpop.f32.mrf.mxu0 }
 0x1e9   :  { %v3157_v56 = vpop.f32.mrf.mxu1  ;;  %v3183_v31 = vpop.f32.mrf.mxu3  ;;  %v3170_v22 = vadd.f32 %v3169_v16, %v3156_v51  ;;  %v3144_v24 = vadd.f32 %v3143_v17, %v3130_v21 }
 0x1eb   :  { %v3184_v47 = vadd.f32 %v3183_v31, %v3170_v22  ;;  %v3158_v34 = vadd.f32 %v3157_v56, %v3144_v24 }
 0x1f0   :  { %v3171_v18 = vpop.f32.mrf.mxu2 }
 0x1f1   :  { %v3185_v25 = vpop.f32.mrf.mxu3  ;;  %v3172_v14 = vadd.f32 %v3171_v18, %v3158_v34 }
 0x1f3   :  { %v3186_v36 = vadd.f32 %v3185_v25, %v3172_v14 }
 0x200   :  { %v3197_v20 = vpop.f32.mrf.mxu0 }
 0x201   :  { %v3211_v13 = vpop.f32.mrf.mxu1  ;;  %v3198_v26 = vadd.f32 %v3197_v20, %v3184_v47 }
 0x203   :  { %v3212_v33 = vadd.f32 %v3211_v13, %v3198_v26 }
 0x208   :  { %v3225_v46 = vpop.f32.mrf.mxu2  ;;  %v3199_v29 = vpop.f32.mrf.mxu0 }
 0x209   :  { %v3213_v44 = vpop.f32.mrf.mxu1  ;;  %v3239_v39 = vpop.f32.mrf.mxu3  ;;  %v3226_v11 = vadd.f32 %v3225_v46, %v3212_v33  ;;  %v3200_v48 = vadd.f32 %v3199_v29, %v3186_v36 }
 0x20b   :  { %v3240_v49 = vadd.f32 %v3239_v39, %v3226_v11  ;;  %v3214_v57 = vadd.f32 %v3213_v44, %v3200_v48 }
 0x210   :  { %v3227_v40 = vpop.f32.mrf.mxu2 }
 0x211   :  { %v3228_v27 = vadd.f32 %v3227_v40, %v3214_v57  ;;  %v3241_v28 = vpop.f32.mrf.mxu3 }
 0x213   :  { %v3242_v62 = vadd.f32 %v3241_v28, %v3228_v27 }
 0x220   :  { %v3253_v53 = vpop.f32.mrf.mxu0 }
 0x221   :  { %v3254_v1 = vadd.f32 %v3253_v53, %v3240_v49  ;;  %v3267_v54 = vpop.f32.mrf.mxu1 }
 0x223   :  { %v3268_v58 = vadd.f32 %v3267_v54, %v3254_v1 }
 0x225   :  { %vm3273_vm1 = vcmp.ge.f32.partialorder %v3268_v58, 0.0  ;;  %v3277_v59 = vmul.f32 0.1, %v3268_v58 }
 0x227   :  { %v3281_v63 = vsel %vm3273_vm1, %v3268_v58, %v3277_v59 }
 0x228   :  { %v3284_v0 = vpack.c.bf16 %v3281_v63, %v3280_v61  ;;  %v3255_v3 = vpop.f32.mrf.mxu0 }
 0x229   :  { %v3256_v4 = vadd.f32 %v3255_v3, %v3242_v62  ;;  %v3269_v5 = vpop.f32.mrf.mxu1 }
 0x22a   :  { %3286 = vst [vmem:[%s8152_s3] sm:$0xff] %v3284_v0 }
 0x22b   :  { %v3270_v8 = vadd.f32 %v3269_v5, %v3256_v4 }
 0x22d   :  { %vm3275_vm3 = vcmp.ge.f32.partialorder %v3270_v8, 0.0  ;;  %v3279_v9 = vmul.f32 0.1, %v3270_v8 }
 0x22f   :  { %v3283_v19 = vsel %vm3275_vm3, %v3270_v8, %v3279_v9 }
 0x230   :  { %v3285_v37 = vpack.c.bf16 %v3283_v19, %v3282_v30 }
 0x232   :  { %3287 = vst [vmem:[%s8152_s3 + $0x8] sm:$0xff] %v3285_v37 }

</bundles_post_ra>
